<compile_context>
chip_gen: v7x
topology: tpu7x:2x2x1
jax: 0.10.0
libtpu: 0.0.40
codegen_flags: <defaults>
</compile_context>

<pallas_src>
import jax
import jax.numpy as jnp
from jax import lax
from jax.experimental import pallas as pl
from jax.experimental.pallas import tpu as pltpu

IN_FEATURES = 10
OUT_FEATURES = 1

PACK = 128                        # batch rows folded into the lane axis per packed row
HALF_PACK = PACK // 2             # 64
PACKED_W = PACK * IN_FEATURES     # 1280 = 10 * 128 lanes (lane-dense input rows)
HALF_W = HALF_PACK * IN_FEATURES  # 640  = 5 * 128 lanes


def _round_up(n, m):
    return (n + m - 1) // m * m


def linear_kernel(x_ref, w_ref, b_ref, o_ref):
    # x_ref: (tb, 1280) VMEM -- each row packs 128 consecutive batch rows.
    # w_ref: (640, 64)  VMEM -- block-diagonal expansion of the (1, 10) weight;
    #                           constant index_map => DMA'd once, stays resident.
    # b_ref: (1,)       SMEM -- scalar bias.
    # o_ref: (tb, 128)  VMEM -- lane-dense packed output: o[r, j] = y[128 r + j].
    x = x_ref[...]
    w = w_ref[...]
    b = b_ref[0]
    # y[128 r + j] = sum_f x_packed[r, 10 j + f] * w[f]: one MXU matmul per
    # 64-batch-row half of the packed row.  HIGHEST precision == exact float32
    # nn.Linear semantics (and keeps an f32 accumulator if inputs become bf16).
    y_lo = jnp.dot(x[:, :HALF_W], w,
                   preferred_element_type=jnp.float32,
                   precision=lax.Precision.HIGHEST)
    y_hi = jnp.dot(x[:, HALF_W:], w,
                   preferred_element_type=jnp.float32,
                   precision=lax.Precision.HIGHEST)
    y = jnp.concatenate([y_lo, y_hi], axis=-1) + b          # (tb, 128) f32
    o_ref[...] = y.astype(o_ref.dtype)


def linear_forward(x, weight, bias, *, max_packed_block=1024):
    """nn.Linear(10, 1) forward.  x: (B, 10), weight: (1, 10), bias: (1,) -> (B, 1)."""
    B, F = x.shape
    assert F == IN_FEATURES
    assert weight.shape == (OUT_FEATURES, IN_FEATURES)
    assert bias.shape == (OUT_FEATURES,)

    # ---- pack the batch into the lane axis (free, contiguous reshape) -------
    b_pad = _round_up(B, PACK)
    if b_pad != B:
        # Pads only to the next multiple of 128 (never to the tile size).
        # NOTE: this materializes one padded copy; large-batch callers should
        # feed B % 128 == 0 so the packed view below is fully zero-copy.
        x = jnp.pad(x, ((0, b_pad - B), (0, 0)))
    r = b_pad // PACK                              # number of packed rows
    x_packed = x.reshape(r, PACKED_W)              # row-major view: no data movement

    # ---- expanded weight: w_half[10*g + f, g] = w[f] (shared by both halves) --
    w_flat = weight.reshape(IN_FEATURES).astype(jnp.float32)
    eye = jnp.eye(HALF_PACK, dtype=jnp.float32)
    w_half = (eye[:, None, :] * w_flat[None, :, None]).reshape(HALF_W, HALF_PACK)

    # ---- tile selection -------------------------------------------------------
    # Large tiles amortize the ~0.35 us/grid-step pipeline overhead.  At the
    # default cap (1024 packed rows = 131072 batch rows: ~5.2 MiB in + ~0.5 MiB
    # out per block, ~11.5 MiB double-buffered) step overhead is <10% of DMA
    # time while fitting every chip's VMEM budget.  Once there is enough work,
    # aim for >=4 grid steps so both v7x TensorCores get blocks and DMA/compute
    # overlap (no-op on single-core v5e/v6e).
    max_packed_block = max(8, _round_up(max_packed_block, 8))
    if r < 32:
        tb = r                                     # tiny batch: single block
    else:
        tb = min(max_packed_block, _round_up(pl.cdiv(r, 4), 8))
    grid = (pl.cdiv(r, tb),)

    out_packed = pl.pallas_call(
        linear_kernel,
        out_shape=jax.ShapeDtypeStruct((r, PACK), x.dtype),
        grid=grid,
        in_specs=[
            # Streamed lane-dense input blocks.
            pl.BlockSpec((tb, PACKED_W), lambda i: (i, 0)),
            # Small expanded weight: constant index map -> fetched once, resident.
            pl.BlockSpec((HALF_W, HALF_PACK), lambda i: (0, 0)),
            # Scalar bias in SMEM (no padded VMEM tile / extra DMA).
            pl.BlockSpec(memory_space=pltpu.MemorySpace.SMEM),
        ],
        # Lane-dense output slab (full-width unmasked stores).
        out_specs=pl.BlockSpec((tb, PACK), lambda i: (i, 0)),
        compiler_params=pltpu.CompilerParams(
            # Independent batch tiles: shard across both TensorCores on v7x.
            dimension_semantics=("parallel",),
            # Covers the double-buffered footprint on v5e's 16 MiB scoped
            # default; a no-op on v6e/v7x (32 MiB defaults) and well under
            # v7x's 64 MiB physical VMEM.
            vmem_limit_bytes=32 * 1024 * 1024,
        ),
    )(x_packed, w_half, bias)

    # Free reshape back to (b_pad, 1); drop the padded rows.
    return out_packed.reshape(b_pad, OUT_FEATURES)[:B]


if __name__ == "__main__":
    key = jax.random.PRNGKey(0)
    k_x, k_w, k_b = jax.random.split(key, 3)

    # Small demo shapes chosen to exercise the interesting code paths:
    # batch not a multiple of 128 (pad path) plus a small packed-block cap so
    # the run uses a multi-step "parallel" grid with a resident weight block.
    batch = 8100   # -> padded to 8192 = 64 packed rows; cap 16 -> 4 grid steps

    bound = 1.0 / jnp.sqrt(jnp.float32(IN_FEATURES))
    weight = jax.random.uniform(
        k_w, (OUT_FEATURES, IN_FEATURES), dtype=jnp.float32, minval=-bound, maxval=bound
    )
    bias = jax.random.uniform(
        k_b, (OUT_FEATURES,), dtype=jnp.float32, minval=-bound, maxval=bound
    )
    x = jax.random.normal(k_x, (batch, IN_FEATURES), dtype=jnp.float32)

    out = linear_forward(x, weight, bias, max_packed_block=16)
    out = jax.block_until_ready(out)

    # Reference: exact nn.Linear float32 semantics (pure elementwise + reduce).
    ref = jnp.sum(x * weight[0][None, :], axis=-1, keepdims=True) + bias
    assert out.shape == (batch, OUT_FEATURES)
    assert jnp.allclose(out, ref, atol=1e-5, rtol=1e-5)

    print("KERNEL_OK")
</pallas_src>

<mosaic_0001>
module attributes {stable_mosaic.version = 11 : i64} {
  func.func @linear_kernel(%arg0: i32, %arg1: memref<16x1280xf32, #tpu.memory_space<vmem>>, %arg2: memref<640x64xf32, #tpu.memory_space<vmem>>, %arg3: memref<1xf32, #tpu.memory_space<smem>>, %arg4: memref<16x128xf32, #tpu.memory_space<vmem>>) attributes {dimension_semantics = [#tpu.dimension_semantics<parallel>], iteration_bounds = array<i64: 4>, scalar_prefetch = 0 : i64, scratch_operands = 0 : i64, tpu.core_type = #tpu.core_type<tc>, window_params = [{transform_indices = @transform_0, window_bounds = array<i64: 16, 1280>}, {pipeline_mode = #tpu.pipeline_mode<synchronous>, transform_indices = @transform_1, window_bounds = array<i64: 640, 64>}, {transform_indices = @transform_2, window_bounds = array<i64: 1>}, {transform_indices = @transform_3, window_bounds = array<i64: 16, 128>}]} {
    %c0 = arith.constant 0 : index
    %c0_0 = arith.constant 0 : index
    %0 = vector.load %arg1[%c0, %c0_0] : memref<16x1280xf32, #tpu.memory_space<vmem>>, vector<16x1280xf32>
    %c0_1 = arith.constant 0 : index
    %c0_2 = arith.constant 0 : index
    %1 = vector.load %arg2[%c0_1, %c0_2] : memref<640x64xf32, #tpu.memory_space<vmem>>, vector<640x64xf32>
    %c0_3 = arith.constant 0 : index
    %2 = memref.load %arg3[%c0_3] : memref<1xf32, #tpu.memory_space<smem>>
    %3 = vector.extract_strided_slice %0 {offsets = [0, 0], sizes = [16, 640], strides = [1, 1]} : vector<16x1280xf32> to vector<16x640xf32>
    %cst = arith.constant dense<0.000000e+00> : vector<16x64xf32>
    %4 = tpu.matmul %3, %1, %cst {dimension_numbers = #tpu.dot_dimension_numbers<[1], [0], [0], [1], [0, 0, 1, 1], [], []>, precision = #tpu.contract_precision<fp32>} : vector<16x640xf32>, vector<640x64xf32>, vector<16x64xf32> -> vector<16x64xf32>
    %5 = vector.extract_strided_slice %0 {offsets = [0, 640], sizes = [16, 640], strides = [1, 1]} : vector<16x1280xf32> to vector<16x640xf32>
    %cst_4 = arith.constant dense<0.000000e+00> : vector<16x64xf32>
    %6 = tpu.matmul %5, %1, %cst_4 {dimension_numbers = #tpu.dot_dimension_numbers<[1], [0], [0], [1], [0, 0, 1, 1], [], []>, precision = #tpu.contract_precision<fp32>} : vector<16x640xf32>, vector<640x64xf32>, vector<16x64xf32> -> vector<16x64xf32>
    %7 = tpu.concatenate %4, %6 in 1 : vector<16x64xf32>, vector<16x64xf32> -> vector<16x128xf32>
    %8 = vector.broadcast %2 : f32 to vector<16x128xf32>
    %9 = arith.addf %7, %8 : vector<16x128xf32>
    %c0_5 = arith.constant 0 : index
    %c0_6 = arith.constant 0 : index
    %10 = vector.load %arg4[%c0_5, %c0_6] : memref<16x128xf32, #tpu.memory_space<vmem>>, vector<16x128xf32>
    tpu.vector_store %arg4[%c0_5, %c0_6], %9 {strides = array<i32>} : memref<16x128xf32, #tpu.memory_space<vmem>>, vector<16x128xf32>,
    return
  }
  func.func @transform_0(%arg0: i32) -> (i32, i32) {
    %c0_i32 = arith.constant 0 : i32
    %c0_i32_0 = arith.constant 0 : i32
    return %arg0, %c0_i32 : i32, i32
  }
  func.func @transform_1(%arg0: i32) -> (i32, i32) {
    %c0_i32 = arith.constant 0 : i32
    %c0_i32_0 = arith.constant 0 : i32
    %c0_i32_1 = arith.constant 0 : i32
    return %c0_i32, %c0_i32_0 : i32, i32
  }
  func.func @transform_2(%arg0: i32) -> i32 {
    %c0_i32 = arith.constant 0 : i32
    %c0_i32_0 = arith.constant 0 : i32
    return %c0_i32 : i32
  }
  func.func @transform_3(%arg0: i32) -> (i32, i32) {
    %c0_i32 = arith.constant 0 : i32
    %c0_i32_0 = arith.constant 0 : i32
    return %arg0, %c0_i32 : i32, i32
  }
}

</mosaic_0001>

<bundles_post_ra>
// kernel: tpu_custom_call.1
= control target key start
LH: loop header
LB: loop body
LE: loop exit
PB: predicated region body
PF: predicated region fallthrough
CT: control target
= control target key end

     0   :  { %s10756_s0 = inlined_call_operand.vmem [shape: f32[64,1280], index: 0, kind: input, shape index: {}]   ;;  %s10757_s1 = inlined_call_operand.vmem [shape: f32[640,64], index: 1, kind: input, shape index: {}]   ;;  %s10758_s2 = inlined_call_operand.<no memory space> [shape: f32[1], index: 2, kind: input, shape index: {}]   ;;  %s10759_s3 = inlined_call_operand.hbm [shape: f32[64,128], index: 3, kind: output, shape index: {}]  }
   0x1   :  { %8 = sst [smem:[#allocation2]] %s10758_s2 }
   0x2   :  { %9 = vsyncpa [#allocation4], 0 }
   0x3   :  { %11 = vsyncpa [#allocation4 + $0x1], 0  ;;  %s8280_s14 = smov 0   ;;  %s8282_s15 = smov 0  }
   0x4   :  { %s8284_s16 = smov 0   ;;  %s8286_s17 = smov 0  }
   0x5 LB: > { %s8301_s2 = sadd.s32 4294967295, %s8251_s17   ;;  %s5409_s18 = sadd.s32 4294967294, %s8251_s17   ;;  %s8251_s17 = sphi %s8286_s17, %s11634_s17   ;;  %s8247_s16 = sphi %s8284_s16, %s11633_s16   ;;  %s8243_s15 = sphi %s8282_s15, %s11632_s15   ;;  %s8239_s14 = sphi %s8280_s14, %s11631_s14  }
   0x6   : > { %s8305_s19 = sadd.s32 1, %s8251_s17   ;;  %s92_s20 = sadd.s32 1, %s8247_s16 }
   0x7   : > { %s89_s21 = ssub.s32 %s8251_s17, %s8305_s19  ;;  %p102_p0 = scmp.ne.s32.totalorder %s8247_s16, %s8243_s15 }
   0x8   : > { %p90_p1 = scmp.eq.s32.totalorder %s89_s21, 0  ;;  %p103_p2 = scmp.eq.s32.totalorder %s8301_s2, 3 }
   0x9   : > { %p108_p3 = scmp.ne.s32.totalorder %s8243_s15, %s8239_s14  ;;  %p109_p4 = scmp.eq.s32.totalorder %s5409_s18, 3 }
   0xa   : > { %s8316_s22 = scalar_select %p90_p1, %s8247_s16, %s92_s20  }
   0xb   : > { %p8318_p5 = por %p103_p2, %p102_p0  ;;  %p8322_p6 = por %p109_p4, %p108_p3 }
   0xc   : > { %p5412_p7 = scmp.ge.s32.totalorder %s8251_s17, 1  ;;  %p143_p8 = scmp.lt.s32.totalorder %s8251_s17, 5 }
   0xe   : > { %p144_p9 = pnand %p5412_p7, %p143_p8 }
  0x10   : > { %147 = sbr.rel (%p144_p9) target bundleno = 976 (0x3d0), region = 32 }
  0x17   : > { %v212_v0 = vld [vmem:[%s10757_s1 + $0x80] sm:$0xff]  ;;  %v213_v1 = vld [vmem:[%s10757_s1 + $0x88] sm:$0xff]  ;;  %v214_v7 = vld [vmem:[%s10757_s1 + $0x90] sm:$0xff]  ;;  %s5414_s27 = sshll.u32 %s8301_s2, 1  ;;  %s276_s25 = sld [smem:[#allocation2]]  ;;  %vm5325_vm0 = vcmask 523264  }
  0x18   : > { %v196_v2 = vld [vmem:[%s10757_s1] sm:$0xff]  ;;  %v326_v3 = vand.u32 4294901760, %v212_v0  ;;  %v329_v4 = vand.u32 4294901760, %v213_v1  ;;  %v197_v5 = vld [vmem:[%s10757_s1 + $0x8] sm:$0xff]  ;;  %v215_v8 = vld [vmem:[%s10757_s1 + $0x98] sm:$0xff]  ;;  %v332_v10 = vand.u32 4294901760, %v214_v7 }
  0x19   : > { %v278_v6 = vand.u32 4294901760, %v196_v2  ;;  %v281_v9 = vand.u32 4294901760, %v197_v5  ;;  %v335_v11 = vand.u32 4294901760, %v215_v8  ;;  %v198_v12 = vld [vmem:[%s10757_s1 + $0x10] sm:$0xff]  ;;  %v199_v13 = vld [vmem:[%s10757_s1 + $0x18] sm:$0xff]  ;;  %v216_v14 = vld [vmem:[%s10757_s1 + $0xa0] sm:$0xff] }
  0x1a   : > { %v8355_v15 = vpack.c.bf16 %v329_v4, %v326_v3  ;;  %v8357_v16 = vsub.f32 %v212_v0, %v326_v3  ;;  %v8359_v17 = vsub.f32 %v213_v1, %v329_v4  ;;  %v284_v18 = vand.u32 4294901760, %v198_v12  ;;  %v217_v19 = vld [vmem:[%s10757_s1 + $0xa8] sm:$0xff]  ;;  %v200_v32 = vld [vmem:[%s10757_s1 + $0x20] sm:$0xff]  ;;  %v218_v39 = vld [vmem:[%s10757_s1 + $0xb0] sm:$0xff]  ;;  %p8500_p10 = scmp.lt.s32.totalorder %s5414_s27, 7  ;;  %s5421_s30 = sshll.u32 %s8301_s2, 8 }
  0x1b   : > { %v8364_v20 = vpack.c.bf16 %v281_v9, %v278_v6  ;;  %v8366_v21 = vpack.c.bf16 %v335_v11, %v332_v10  ;;  %v287_v22 = vand.u32 4294901760, %v199_v13  ;;  %v8368_v23 = vsub.f32 %v196_v2, %v278_v6  ;;  %v201_v33 = vld [vmem:[%s10757_s1 + $0x28] sm:$0xff]  ;;  %v219_v40 = vld [vmem:[%s10757_s1 + $0xb8] sm:$0xff]  ;;  %v202_v47 = vld [vmem:[%s10757_s1 + $0x30] sm:$0xff]  ;;  %s10713_s6 = scalar_lea.hbm %s10759_s3, %s5421_s30  ;;  %s8254_s2 = smov [#allocation3]  }
  0x1c   : > { %11077 = vst [vmem:[#allocation6_spill] sm:$0xff] %v8355_v15  ;;  %6971 = vmatprep.subr.bf16.mxu1 %v8355_v15  ;;  %v519_v24 = vand.u32 4294901760, %v8357_v16  ;;  %v526_v25 = vand.u32 4294901760, %v8359_v17  ;;  %v8373_v26 = vsub.f32 %v197_v5, %v281_v9  ;;  %v338_v27 = vand.u32 4294901760, %v216_v14  ;;  %v203_v48 = vld [vmem:[%s10757_s1 + $0x38] sm:$0xff]  ;;  %v220_v61 = vld [vmem:[%s10757_s1 + $0xc0] sm:$0xff] }
  0x1d   : > { %11078 = vst [vmem:[#allocation7_spill] sm:$0xff] %v8364_v20  ;;  %11079 = vst [vmem:[#allocation8_spill] sm:$0xff] %v8366_v21  ;;  %6973 = vmatpush3.bf16.msra.mxu1 %v8364_v20  ;;  %v8376_v28 = vpack.c.bf16 %v287_v22, %v284_v18  ;;  %v407_v29 = vand.u32 4294901760, %v8368_v23  ;;  %v341_v30 = vand.u32 4294901760, %v217_v19  ;;  %v8379_v31 = vsub.f32 %v214_v7, %v332_v10  ;;  %v221_v62 = vld [vmem:[%s10757_s1 + $0xc8] sm:$0xff]  ;;  %v204_v7 = vld [vmem:[%s10757_s1 + $0x40] sm:$0xff] }
  0x1e   : > { %6975 = vmatprep.subr.bf16.mxu1 %v8366_v21  ;;  %v8388_v34 = vpack.c.bf16 %v526_v25, %v519_v24  ;;  %v414_v35 = vand.u32 4294901760, %v8373_v26  ;;  %v8394_v38 = vsub.f32 %v215_v8, %v335_v11  ;;  %v290_v42 = vand.u32 4294901760, %v200_v32  ;;  %v205_v8 = vld [vmem:[%s10757_s1 + $0x48] sm:$0xff]  ;;  %s11636_s27 = smov (!%p8500_p10, %s5414_s27), 7  ;;  %s8193_s9 = sshll.u32 %s8254_s2, 4  ;;  %s8194_s9 = int_to_ptr.vmem [resolvable:$false] %s8193_s9 }
  0x1f   : > { %11080 = vst [vmem:[#allocation9_spill] sm:$0xff] %v8376_v28  ;;  %v8391_v36 = vpack.c.bf16 %v341_v30, %v338_v27  ;;  %v10763_v37 = vand.u32 4294901760, %v8379_v31  ;;  %v293_v43 = vand.u32 4294901760, %v201_v33  ;;  %v8407_v45 = vsub.f32 %v198_v12, %v284_v18  ;;  %s8146_s26 = smul.u32 80, %s11636_s27  ;;  %s8195_s11 = scalar_lea.vmem %s8194_s9, 512 }
  0x20   : > { %11081 = vst [vmem:[#allocation10_spill] sm:$0xff] %v8388_v34  ;;  %7099 = vmatprep.subr.bf16.mxu0 %v8388_v34  ;;  %v8403_v41 = vpack.c.bf16 %v414_v35, %v407_v29  ;;  %v10762_v44 = vand.u32 4294901760, %v8394_v38  ;;  %v8409_v46 = vsub.f32 %v199_v13, %v287_v22  ;;  %v8418_v49 = vsub.f32 %v8357_v16, %v519_v24 }
  0x21   : > { %11082 = vst [vmem:[#allocation11_spill] sm:$0xff] %v8391_v36  ;;  %6977 = vmatpush3.bf16.msra.mxu1 %v8376_v28  ;;  %v8422_v50 = vpack.c.bf16 %v293_v43, %v290_v42  ;;  %v344_v51 = vand.u32 4294901760, %v218_v39  ;;  %v347_v52 = vand.u32 4294901760, %v219_v40  ;;  %v421_v54 = vand.u32 4294901760, %v8407_v45  ;;  %s8632_s10 = scalar_lea.vmem %s10756_s0, %s8146_s26  ;;  %s165_s26 = sand.u32 1, %s8243_s15  }
  0x22   : > { %11083 = vst [vmem:[#allocation12_spill] sm:$0xff] %v8403_v41  ;;  %7101 = vmatpush3.bf16.msra.mxu0 %v8403_v41  ;;  %6979 = vmatprep.subr.bf16.mxu1 %v8391_v36  ;;  %v8428_v53 = vpack.c.bf16 %v10762_v44, %v10763_v37  ;;  %v428_v55 = vand.u32 4294901760, %v8409_v46  ;;  %v8432_v56 = vsub.f32 %v216_v14, %v338_v27  ;;  %v296_v59 = vand.u32 4294901760, %v202_v47  ;;  %v177_v21 = vld [vmem:[%s8632_s10 + $0x8] sm:$0xff]  ;;  %s5413_s27 = sshll.u32 %s165_s26, 4  ;;  %s10715_s7 = scalar_lea.sflag [#allocation4], %s165_s26 }
  0x23   : > { %11084 = vst [vmem:[#allocation13_spill] sm:$0xff] %v8422_v50  ;;  %v8434_v57 = vpack.c.bf16 %v347_v52, %v344_v51  ;;  %v8436_v58 = vsub.f32 %v217_v19, %v341_v30  ;;  %v299_v60 = vand.u32 4294901760, %v203_v48  ;;  %v8445_v63 = vsub.f32 %v8368_v23, %v407_v29  ;;  %v222_v29 = vld [vmem:[%s10757_s1 + $0xd0] sm:$0xff]  ;;  %v223_v30 = vld [vmem:[%s10757_s1 + $0xd8] sm:$0xff]  ;;  %s167_s28 = scalar_lea.vmem [#allocation3], %s5413_s27 }
  0x24   : > { %11085 = vst [vmem:[#allocation14_spill] sm:$0xff] %v8428_v53  ;;  %v8448_v0 = vsub.f32 %v8373_v26, %v414_v35  ;;  %7103 = vmatprep.subr.bf16.mxu0 %v8428_v53  ;;  %v8452_v1 = vpack.c.bf16 %v428_v55, %v421_v54  ;;  %v10761_v2 = vand.u32 4294901760, %v8432_v56  ;;  %v8459_v5 = vsub.f32 %v200_v32, %v290_v42  ;;  %s5347_s29 = sshll.u32 %s167_s28, 4  ;;  %s10707_s29 = int_to_ptr.vmem [resolvable:$true] %s5347_s29 }
  0x25   : > { %11086 = vst [vmem:[#allocation15_spill] sm:$0xff] %v8434_v57  ;;  %6981 = vmatpush3.bf16.msra.mxu1 %v8422_v50  ;;  %v10760_v3 = vand.u32 4294901760, %v8436_v58  ;;  %v8457_v4 = vpack.c.bf16 %v299_v60, %v296_v59  ;;  %v8461_v6 = vsub.f32 %v201_v33, %v293_v43  ;;  %v8471_v9 = vsub.f32 %v8359_v17, %v526_v25  ;;  %s8189_s8 = scalar_lea.vmem %s10707_s29, 256  ;;  %p8196_p0 = scmp.lt.s32.totalorder %s10707_s29, %s8194_s9 }
  0x26   : > { %11087 = vst [vmem:[#allocation16_spill] sm:$0xff] %v8452_v1  ;;  %6983 = vmatprep.subr.bf16.mxu1 %v8434_v57  ;;  %v8474_v10 = vsub.f32 %v8407_v45, %v421_v54  ;;  %7105 = vmatpush3.bf16.msra.mxu0 %v8452_v1  ;;  %v350_v11 = vand.u32 4294901760, %v220_v61  ;;  %v353_v12 = vand.u32 4294901760, %v221_v62  ;;  %v435_v14 = vand.u32 4294901760, %v8459_v5  ;;  %v207_v54 = vld [vmem:[%s10757_s1 + $0x58] sm:$0xff]  ;;  %p8190_p11 = scmp.ne.s32.totalorder %s10707_s29, %s8189_s8  ;;  %p8197_p1 = scmp.lt.s32.totalorder %s8195_s11, %s8189_s8 }
  0x27   : > { %11088 = vst [vmem:[#allocation17_spill] sm:$0xff] %v8457_v4  ;;  %v8481_v13 = vpack.c.bf16 %v10760_v3, %v10761_v2  ;;  %v442_v18 = vand.u32 4294901760, %v8461_v6  ;;  %v8485_v19 = vsub.f32 %v218_v39, %v344_v51  ;;  %v8490_v24 = vsub.f32 %v219_v40, %v347_v52  ;;  %v206_v52 = vld [vmem:[%s10757_s1 + $0x50] sm:$0xff] }
  0x28   : > { %v8488_v22 = vpack.c.bf16 %v353_v12, %v350_v11  ;;  %v302_v25 = vand.u32 4294901760, %v204_v7  ;;  %v305_v27 = vand.u32 4294901760, %v205_v8  ;;  %v8514_v43 = vsub.f32 %v202_v47, %v296_v59  ;;  %p8191_p12 = pnand %p8190_p11, %p8318_p5  ;;  %p8198_p2 = por %p8197_p1, %p8196_p0 }
  0x29   : > { %11089 = vst [vmem:[#allocation18_spill] sm:$0xff] %v8481_v13  ;;  %6985 = vmatpush3.bf16.msra.mxu1 %v8457_v4  ;;  %11091 = vst [vmem:[#allocation20_spill] sm:$0xff] %v8490_v24  ;;  %7107 = vmatprep.subr.bf16.mxu0 %v8481_v13  ;;  %v8507_v35 = vpack.c.bf16 %v442_v18, %v435_v14  ;;  %v10765_v39 = vand.u32 4294901760, %v8485_v19  ;;  %v10764_v40 = vand.u32 4294901760, %v8490_v24  ;;  %v356_v33 = vand.u32 4294901760, %v222_v29 }
  0x2a   : > { %11090 = vst [vmem:[#allocation19_spill] sm:$0xff] %v8488_v22  ;;  %6987 = vmatprep.subr.bf16.mxu1 %v8488_v22  ;;  %v8512_v42 = vpack.c.bf16 %v305_v27, %v302_v25  ;;  %11095 = vst [vmem:[#allocation23_spill] sm:$0xff] %v8514_v43  ;;  %v8516_v51 = vsub.f32 %v203_v48, %v299_v60  ;;  %v8526_v2 = vsub.f32 %v8409_v46, %v428_v55  ;;  %v226_v22 = vld [vmem:[%s10757_s1 + $0xf0] sm:$0xff]  ;;  %p8192_p13 = pneg %p8191_p12 }
  0x2b   : > { %11093 = vst [vmem:[#allocation21_spill] sm:$0xff] %v8507_v35  ;;  %7109 = vmatpush3.bf16.msra.mxu0 %v8507_v35  ;;  %v359_v47 = vand.u32 4294901760, %v223_v30  ;;  %v8533_v48 = vpack.c.bf16 %v10764_v40, %v10765_v39  ;;  %v449_v59 = vand.u32 4294901760, %v8514_v43  ;;  %v8538_v3 = vsub.f32 %v220_v61, %v350_v11  ;;  %v224_v40 = vld [vmem:[%s10757_s1 + $0xe0] sm:$0xff]  ;;  %v225_v39 = vld [vmem:[%s10757_s1 + $0xe8] sm:$0xff] }
  0x2c   : > { %11094 = vst [vmem:[#allocation22_spill] sm:$0xff] %v8512_v42  ;;  %11096 = vst [vmem:[#allocation24_spill] sm:$0xff] %v8516_v51  ;;  %v456_v60 = vand.u32 4294901760, %v8516_v51  ;;  %v8548_v32 = vsub.f32 %v221_v62, %v353_v12  ;;  %v308_v44 = vand.u32 4294901760, %v206_v52  ;;  %v311_v37 = vand.u32 4294901760, %v207_v54  ;;  %p8199_p3 = pnand %p8198_p2, %p8192_p13 }
  0x2d   : > { %11097 = vst [vmem:[#allocation25_spill] sm:$0xff] %v8533_v48  ;;  %6989 = vmatpush3.bf16.msra.mxu1 %v8512_v42  ;;  %v8546_v55 = vpack.c.bf16 %v359_v47, %v356_v33  ;;  %v8557_v61 = vsub.f32 %v8459_v5, %v435_v14  ;;  %v8560_v11 = vsub.f32 %v8461_v6, %v442_v18  ;;  %v208_v18 = vld [vmem:[%s10757_s1 + $0x60] sm:$0xff]  ;;  %v362_v35 = vand.u32 4294901760, %v224_v40 }
  0x2e   : > { %11099 = vst [vmem:[#allocation27_spill] sm:$0xff] %v8548_v32  ;;  %7111 = vmatprep.subr.bf16.mxu0 %v8533_v48  ;;  %v8563_v62 = vpack.c.bf16 %v456_v60, %v449_v59  ;;  %v8568_v13 = vpack.c.bf16 %v311_v37, %v308_v44  ;;  %v8570_v1 = vsub.f32 %v204_v7, %v302_v25  ;;  %v209_v48 = vld [vmem:[%s10757_s1 + $0x68] sm:$0xff]  ;;  %v365_v7 = vand.u32 4294901760, %v225_v39 }
  0x2f   : > { %11098 = vst [vmem:[#allocation26_spill] sm:$0xff] %v8546_v55  ;;  %6991 = vmatprep.subr.bf16.mxu1 %v8546_v55  ;;  %v8572_v14 = vsub.f32 %v205_v8, %v305_v27  ;;  %v8582_v53 = vsub.f32 %v8514_v43, %v449_v59  ;;  %v11104_v8 = vand.u32 4294901760, %v8538_v3  ;;  %v11105_v25 = vand.u32 4294901760, %v8548_v32 }
  0x30   : > { %11100 = vst [vmem:[#allocation28_spill] sm:$0xff] %v8563_v62  ;;  %11101 = vst [vmem:[#allocation29_spill] sm:$0xff] %v8568_v13  ;;  %7113 = vmatpush3.bf16.msra.mxu0 %v8563_v62  ;;  %v463_v41 = vand.u32 4294901760, %v8570_v1  ;;  %v8595_v34 = vsub.f32 %v222_v29, %v356_v33  ;;  %v8597_v59 = vpack.c.bf16 %v365_v7, %v362_v35  ;;  %v314_v55 = vand.u32 4294901760, %v208_v18 }
  0x31   : > { %11102 = vst [vmem:[#allocation30_spill] sm:$0xff] %v8570_v1  ;;  %11103 = vst [vmem:[#allocation31_spill] sm:$0xff] %v8572_v14  ;;  %v8590_v27 = vpack.c.bf16 %v11105_v25, %v11104_v8  ;;  %6993 = vmatpush3.bf16.msra.mxu1 %v8568_v13  ;;  %v470_v12 = vand.u32 4294901760, %v8572_v14  ;;  %v8599_v62 = vsub.f32 %v223_v30, %v359_v47  ;;  %v317_v42 = vand.u32 4294901760, %v209_v48  ;;  %v227_v8 = vld [vmem:[%s10757_s1 + $0xf8] sm:$0xff]  ;;  %v210_v13 = vld [vmem:[%s10757_s1 + $0x70] sm:$0xff] }
  0x32   : > { %11107 = vst [vmem:[#allocation33_spill] sm:$0xff] %v8597_v59  ;;  %v10799_v30 = vand.u32 4294901760, %v8595_v34  ;;  %6995 = vmatprep.subr.bf16.mxu1 %v8597_v59  ;;  %v8617_v4 = vsub.f32 %v206_v52, %v308_v44  ;;  %v8619_v57 = vsub.f32 %v207_v54, %v311_v37  ;;  %v8627_v25 = vld [vmem:[%s10757_s1 + $0x78] sm:$0xff]  ;;  %v8636_v37 = vsub.f32 %v8516_v51, %v456_v60 }
  0x33   : > { %11106 = vst [vmem:[#allocation32_spill] sm:$0xff] %v8590_v27  ;;  %7115 = vmatprep.subr.bf16.mxu0 %v8590_v27  ;;  %v8610_v29 = vpack.c.bf16 %v470_v12, %v463_v41  ;;  %v10798_v33 = vand.u32 4294901760, %v8599_v62  ;;  %v8615_v47 = vpack.c.bf16 %v317_v42, %v314_v55  ;;  %v368_v52 = vand.u32 4294901760, %v226_v22 }
  0x34   : > { %11110 = vst [vmem:[#allocation36_spill] sm:$0xff] %v8617_v4  ;;  %11111 = vst [vmem:[#allocation37_spill] sm:$0xff] %v8619_v57  ;;  %v371_v54 = vand.u32 4294901760, %v227_v8  ;;  %v477_v59 = vand.u32 4294901760, %v8617_v4  ;;  %v484_v50 = vand.u32 4294901760, %v8619_v57  ;;  %v8648_v44 = vsub.f32 %v224_v40, %v362_v35 }
  0x35   : > { %11108 = vst [vmem:[#allocation34_spill] sm:$0xff] %v8610_v29  ;;  %11109 = vst [vmem:[#allocation35_spill] sm:$0xff] %v8615_v47  ;;  %7117 = vmatpush3.bf16.msra.mxu0 %v8610_v29  ;;  %v8643_v27 = vpack.c.bf16 %v10798_v33, %v10799_v30  ;;  %6997 = vmatpush3.bf16.msra.mxu1 %v8615_v47  ;;  %v8652_v29 = vsub.f32 %v225_v39, %v365_v7  ;;  %v320_v36 = vand.u32 4294901760, %v210_v13 }
  0x36   : > { %11113 = vst [vmem:[#allocation39_spill] sm:$0xff] %v8648_v44  ;;  %v8650_v60 = vpack.c.bf16 %v371_v54, %v368_v52  ;;  %v323_v28 = vand.u32 4294901760, %v8627_v25  ;;  %v8657_v33 = vsub.f32 %v8570_v1, %v463_v41  ;;  %v8660_v30 = vsub.f32 %v8572_v14, %v470_v12  ;;  %v176_v41 = vld [vmem:[%s8632_s10] sm:$0xff]  ;;  %v8891_v1 = vld [vmem:[%s10757_s1 + $0x1b8] sm:$0xff] }
  0x37   : > { %11112 = vst [vmem:[#allocation38_spill] sm:$0xff] %v8643_v27  ;;  %11115 = vst [vmem:[#allocation41_spill] sm:$0xff] %v8652_v29  ;;  %7119 = vmatprep.subr.bf16.mxu0 %v8643_v27  ;;  %v8663_v47 = vpack.c.bf16 %v484_v50, %v477_v59  ;;  %v8670_v7 = vsub.f32 %v208_v18, %v314_v55  ;;  %v8672_v20 = vsub.f32 %v209_v48, %v317_v42 }
  0x38   : > { %11114 = vst [vmem:[#allocation40_spill] sm:$0xff] %v8650_v60  ;;  %6999 = vmatprep.subr.bf16.mxu1 %v8650_v60  ;;  %v8668_v40 = vpack.c.bf16 %v323_v28, %v320_v36  ;;  %v8677_v15 = vsub.f32 %v8617_v4, %v477_v59  ;;  %v8680_v27 = vand.u32 4294901760, %v177_v21  ;;  %v521_v35 = vand.u32 4294901760, %v8418_v49  ;;  %11157 = vst [vmem:[#allocation65_spill] sm:$0xff] %v8891_v1 }
  0x39   : > { %11116 = vst [vmem:[#allocation42_spill] sm:$0xff] %v8663_v47  ;;  %11118 = vst [vmem:[#allocation44_spill] sm:$0xff] %v8670_v7  ;;  %7121 = vmatpush3.bf16.msra.mxu0 %v8663_v47  ;;  %v11120_v39 = vand.u32 4294901760, %v8648_v44  ;;  %v11121_v60 = vand.u32 4294901760, %v8652_v29  ;;  %v491_v42 = vand.u32 4294901760, %v8670_v7  ;;  %v498_v48 = vand.u32 4294901760, %v8672_v20 }
  0x3a   : > { %11117 = vst [vmem:[#allocation43_spill] sm:$0xff] %v8668_v40  ;;  %11119 = vst [vmem:[#allocation45_spill] sm:$0xff] %v8672_v20  ;;  %7001 = vmatpush3.bf16.msra.mxu1 %v8668_v40  ;;  %v528_v18 = vand.u32 4294901760, %v8471_v9  ;;  %v8694_v59 = vsub.f32 %v177_v21, %v8680_v27  ;;  %v8696_v12 = vsub.f32 %v226_v22, %v368_v52  ;;  %v8700_v47 = vand.u32 4294901760, %v176_v41 }
  0x3b   : > { %v8687_v55 = vpack.c.bf16 %v11121_v60, %v11120_v39  ;;  %v8698_v49 = vsub.f32 %v227_v8, %v371_v54  ;;  %1070 = vmatprep.mubr.f32.mxu0 %v8680_v27  ;;  %v8706_v40 = vpack.c.bf16 %v498_v48, %v491_v42  ;;  %v8719_v54 = vld [vmem:[%s10757_s1 + $0x180] sm:$0xff]  ;;  %v8723_v60 = vsub.f32 %v8619_v57, %v484_v50 }
  0x3c   : > { %11123 = vst [vmem:[#allocation47_spill] sm:$0xff] %v8694_v59  ;;  %11124 = vst [vmem:[#allocation48_spill] sm:$0xff] %v8696_v12  ;;  %v8708_v9 = vpack.c.bf16 %v528_v18, %v521_v35  ;;  %v10815_v21 = vand.u32 4294901760, %v8694_v59  ;;  %v10820_v22 = vand.u32 4294901760, %v8696_v12  ;;  %v8714_v52 = vsub.f32 %v176_v41, %v8700_v47  ;;  %v8735_v41 = vld [vmem:[%s10757_s1 + $0x188] sm:$0xff] }
  0x3d   : > { %11122 = vst [vmem:[#allocation46_spill] sm:$0xff] %v8687_v55  ;;  %11125 = vst [vmem:[#allocation49_spill] sm:$0xff] %v8700_v47  ;;  %7123 = vmatprep.subr.bf16.mxu0 %v8687_v55  ;;  %v10819_v8 = vand.u32 4294901760, %v8698_v49  ;;  %v8726_v35 = vsub.f32 %v8670_v7, %v491_v42  ;;  %v8730_v18 = vsub.f32 %v210_v13, %v320_v36 }
  0x3e   : > { %11126 = vst [vmem:[#allocation50_spill] sm:$0xff] %v8706_v40  ;;  %11127 = vst [vmem:[#allocation51_spill] sm:$0xff] %v8708_v9  ;;  %7125 = vmatpush3.bf16.msra.mxu0 %v8706_v40  ;;  %7003 = vmatprep.subr.bf16.mxu1 %v8708_v9  ;;  %v376_v39 = vsub.f32 %v8694_v59, %v10815_v21  ;;  %v10821_v42 = vand.u32 4294901760, %v8714_v52  ;;  %v8748_v36 = vsub.f32 %v8627_v25, %v323_v28 }
  0x3f   : > { %11128 = vst [vmem:[#allocation52_spill] sm:$0xff] %v8714_v52  ;;  %11129 = vst [vmem:[#allocation53_spill] sm:$0xff] %v8730_v18  ;;  %v8744_v50 = vpack.c.bf16 %v10819_v8, %v10820_v22  ;;  %v505_v13 = vand.u32 4294901760, %v8730_v18  ;;  %v11132_v40 = vand.u32 4294901760, %v8379_v31  ;;  %v11133_v9 = vand.u32 4294901760, %v8394_v38 }
  0x40   : > { %11131 = vst [vmem:[#allocation55_spill] sm:$0xff] %v8748_v36  ;;  %v377_v7 = vand.u32 4294901760, %v376_v39  ;;  %v382_v28 = vsub.f32 %v8714_v52, %v10821_v42  ;;  %v11134_v22 = vand.u32 4294901760, %v8445_v63  ;;  %v11135_v42 = vand.u32 4294901760, %v8448_v0 }
  0x41   : > { %11130 = vst [vmem:[#allocation54_spill] sm:$0xff] %v8744_v50  ;;  %v534_v55 = vsub.f32 %v8379_v31, %v11132_v40  ;;  %v541_v21 = vsub.f32 %v8394_v38, %v11133_v9  ;;  %7127 = vmatprep.subr.bf16.mxu0 %v8744_v50  ;;  %v8767_v40 = vld [vmem:[%s10757_s1 + $0x100] sm:$0xff]  ;;  %v8772_v9 = vld [vmem:[%s10757_s1 + $0x108] sm:$0xff]  ;;  %v8784_v50 = vld [vmem:[%s10757_s1 + $0x190] sm:$0xff]  ;;  %v8787_v52 = vsub.f32 %v8672_v20, %v498_v48  ;;  %v11137_v39 = vand.u32 4294901760, %v8748_v36 }
  0x42   : > { %v8779_v59 = vpack.c.bf16 %v11135_v42, %v11134_v22  ;;  %378 = vmatprep.mubr.f32.mxu1 %v377_v7  ;;  %v383_v57 = vand.u32 4294901760, %v382_v28  ;;  %v11139_v63 = vand.u32 4294901760, %v8719_v54  ;;  %v11140_v0 = vand.u32 4294901760, %v8735_v41  ;;  %v8807_v7 = vld [vmem:[%s10757_s1 + $0x110] sm:$0xff]  ;;  %v8833_v42 = vld [vmem:[%s10757_s1 + $0x1a0] sm:$0xff] }
  0x43   : > { %v535_v25 = vand.u32 4294901760, %v534_v55  ;;  %v542_v8 = vand.u32 4294901760, %v541_v21  ;;  %v8791_v4 = vpack.c.bf16 %v11137_v39, %v505_v13  ;;  %v8802_v21 = vld [vmem:[%s10757_s1 + $0x198] sm:$0xff]  ;;  %11145 = vst [vmem:[#allocation60_spill] sm:$0xff] %v8833_v42  ;;  %v11150_v28 = vand.u32 4294901760, %v8767_v40 }
  0x44   : > { %11136 = vst [vmem:[#allocation56_spill] sm:$0xff] %v8779_v59  ;;  %v8797_v55 = vpack.c.bf16 %v11140_v0, %v11139_v63  ;;  %v8817_v39 = vld [vmem:[%s10757_s1 + $0x118] sm:$0xff]  ;;  %384 = vmatmul.mubr.f32.vlgmr.msra.gmra.mrb[0].mxu1 %v383_v57  ;;  %v8820_v63 = vsub.f32 %v8730_v18, %v505_v13  ;;  %v11143_v0 = vand.u32 4294901760, %v8432_v56  ;;  %v8838_v57 = vld [vmem:[%s10757_s1 + $0x1a8] sm:$0xff]  ;;  %v11147_v13 = vand.u32 4294901760, %v8474_v10 }
  0x45   : > { %11138 = vst [vmem:[#allocation57_spill] sm:$0xff] %v8791_v4  ;;  %v8810_v22 = vpack.c.bf16 %v542_v8, %v535_v25  ;;  %7129 = vmatpush3.bf16.msra.mxu0 %v8791_v4  ;;  %v11144_v25 = vand.u32 4294901760, %v8436_v58  ;;  %11146 = vst [vmem:[#allocation61_spill] sm:$0xff] %v8838_v57  ;;  %7005 = vmatpush3.bf16.msra.mxu1 %v8779_v59  ;;  %v11151_v4 = vand.u32 4294901760, %v8772_v9  ;;  %v10836_v20 = vand.u32 4294901760, %v8802_v21 }
  0x46   : > { %11141 = vst [vmem:[#allocation58_spill] sm:$0xff] %v8797_v55  ;;  %v548_v8 = vsub.f32 %v8432_v56, %v11143_v0  ;;  %7163 = vmatprep.subr.bf16.mxu0 %v8797_v55  ;;  %v11148_v0 = vand.u32 4294901760, %v8526_v2  ;;  %v11153_v2 = vand.u32 4294901760, %v8485_v19  ;;  %v11162_v14 = vand.u32 4294901760, %v8807_v7 }
  0x47   : > { %11142 = vst [vmem:[#allocation59_spill] sm:$0xff] %v8810_v22  ;;  %v555_v48 = vsub.f32 %v8436_v58, %v11144_v25  ;;  %v8852_v18 = vpack.c.bf16 %v11151_v4, %v11150_v28  ;;  %7007 = vmatprep.subr.bf16.mxu1 %v8810_v22  ;;  %v8869_v4 = vld [vmem:[%s10757_s1 + $0x128] sm:$0xff]  ;;  %v8886_v22 = vld [vmem:[%s10757_s1 + $0x1b0] sm:$0xff] }
  0x48   : > { %v8846_v25 = vpack.c.bf16 %v11148_v0, %v11147_v13  ;;  %v549_v59 = vand.u32 4294901760, %v548_v8  ;;  %v562_v13 = vsub.f32 %v8485_v19, %v11153_v2  ;;  %v8864_v0 = vld [vmem:[%s10757_s1 + $0x120] sm:$0xff]  ;;  %1072 = vmatmul.mubr.f32.vlgmr.msra.gmra.mrb[0].mxu0 %v8700_v47  ;;  %v11156_v8 = vand.u32 4294901760, %v8490_v24 }
  0x49   : > { %11152 = vst [vmem:[#allocation63_spill] sm:$0xff] %v8852_v18  ;;  %v556_v55 = vand.u32 4294901760, %v555_v48  ;;  %v11154_v48 = vand.u32 4294901760, %v8784_v50  ;;  %7165 = vmatpush3.bf16.msra.mxu0 %v8852_v18  ;;  %v11163_v47 = vand.u32 4294901760, %v8817_v39 }
  0x4a   : > { %11149 = vst [vmem:[#allocation62_spill] sm:$0xff] %v8846_v25  ;;  %v569_v2 = vsub.f32 %v8490_v24, %v11156_v8  ;;  %v11159_v8 = vand.u32 4294901760, %v8557_v61  ;;  %v563_v43 = vand.u32 4294901760, %v562_v13  ;;  %v8911_v24 = vld [vmem:[%s10757_s1 + $0x130] sm:$0xff]  ;;  %7009 = vmatpush3.bf16.msra.mxu1 %v8846_v25  ;;  %v11170_v13 = vand.u32 4294901760, %v8538_v3 }
  0x4b   : > { %v8876_v28 = vpack.c.bf16 %v10836_v20, %v11154_v48  ;;  %v8894_v48 = vpack.c.bf16 %v556_v55, %v549_v59  ;;  %v11160_v20 = vand.u32 4294901760, %v8560_v11  ;;  %v8906_v51 = vpack.c.bf16 %v11163_v47, %v11162_v14  ;;  %11165 = vst [vmem:[#allocation69_spill] sm:$0xff] %v8911_v24  ;;  %v8926_v55 = vld [vmem:[%s10757_s1 + $0x138] sm:$0xff]  ;;  %v8940_v47 = vld [vmem:[%s10757_s1 + $0x1c0] sm:$0xff] }
  0x4c   : > { %v570_v61 = vand.u32 4294901760, %v569_v2  ;;  %v11167_v11 = vand.u32 4294901760, %v8838_v57  ;;  %11169 = vst [vmem:[#allocation71_spill] sm:$0xff] %v8926_v55  ;;  %v576_v2 = vsub.f32 %v8538_v3, %v11170_v13  ;;  %11172 = vst [vmem:[#allocation72_spill] sm:$0xff] %v8940_v47  ;;  %v11175_v13 = vand.u32 4294901760, %v8582_v53  ;;  %v9003_v57 = vld [vmem:[%s10757_s1 + $0x1d0] sm:$0xff] }
  0x4d   : > { %11155 = vst [vmem:[#allocation64_spill] sm:$0xff] %v8876_v28  ;;  %11158 = vst [vmem:[#allocation66_spill] sm:$0xff] %v8894_v48  ;;  %v8900_v10 = vpack.c.bf16 %v11160_v20, %v11159_v8  ;;  %7167 = vmatprep.subr.bf16.mxu0 %v8876_v28  ;;  %v11166_v20 = vand.u32 4294901760, %v8833_v42  ;;  %7011 = vmatprep.subr.bf16.mxu1 %v8894_v48  ;;  %v11171_v8 = vand.u32 4294901760, %v8548_v32  ;;  %v8945_v48 = vld [vmem:[%s10757_s1 + $0x1c8] sm:$0xff]  ;;  %v11178_v14 = vand.u32 4294901760, %v8864_v0 }
  0x4e   : > { %11164 = vst [vmem:[#allocation68_spill] sm:$0xff] %v8906_v51  ;;  %11173 = vst [vmem:[#allocation73_spill] sm:$0xff] %v8945_v48  ;;  %v8947_v25 = vpack.c.bf16 %v570_v61, %v563_v43  ;;  %7169 = vmatpush3.bf16.msra.mxu0 %v8906_v51  ;;  %v577_v42 = vand.u32 4294901760, %v576_v2  ;;  %v11181_v43 = vand.u32 4294901760, %v8886_v22  ;;  %v11182_v53 = vand.u32 4294901760, %v8891_v1 }
  0x4f   : > { %11161 = vst [vmem:[#allocation67_spill] sm:$0xff] %v8900_v10  ;;  %v8919_v59 = vpack.c.bf16 %v11167_v11, %v11166_v20  ;;  %v583_v20 = vsub.f32 %v8548_v32, %v11171_v8  ;;  %v11176_v8 = vand.u32 4294901760, %v8636_v37  ;;  %v11179_v11 = vand.u32 4294901760, %v8869_v4  ;;  %7013 = vmatpush3.bf16.msra.mxu1 %v8900_v10 }
  0x50   : > { %11174 = vst [vmem:[#allocation74_spill] sm:$0xff] %v8947_v25  ;;  %v8967_v61 = vpack.c.bf16 %v11182_v53, %v11181_v43  ;;  %v8983_v43 = vld [vmem:[%s10757_s1 + $0x140] sm:$0xff]  ;;  %v8988_v53 = vld [vmem:[%s10757_s1 + $0x148] sm:$0xff]  ;;  %7015 = vmatprep.subr.bf16.mxu1 %v8947_v25  ;;  %v11188_v37 = vand.u32 4294901760, %v8657_v33  ;;  %v11191_v25 = vand.u32 4294901760, %v8911_v24  ;;  %v9030_v33 = vld [vmem:[%s10757_s1 + $0x158] sm:$0xff] }
  0x51   : > { %11168 = vst [vmem:[#allocation70_spill] sm:$0xff] %v8919_v59  ;;  %v8953_v28 = vpack.c.bf16 %v11176_v8, %v11175_v13  ;;  %v8959_v18 = vpack.c.bf16 %v11179_v11, %v11178_v14  ;;  %v584_v32 = vand.u32 4294901760, %v583_v20  ;;  %7171 = vmatprep.subr.bf16.mxu0 %v8919_v59  ;;  %v11184_v14 = vand.u32 4294901760, %v8595_v34 }
  0x52   : > { %11183 = vst [vmem:[#allocation77_spill] sm:$0xff] %v8967_v61  ;;  %v11185_v13 = vand.u32 4294901760, %v8599_v62 }
  0x53   : > { %11177 = vst [vmem:[#allocation75_spill] sm:$0xff] %v8953_v28  ;;  %11180 = vst [vmem:[#allocation76_spill] sm:$0xff] %v8959_v18  ;;  %v590_v11 = vsub.f32 %v8595_v34, %v11184_v14  ;;  %v500_v14 = vand.u32 4294901760, %v8787_v52  ;;  %v8998_v8 = vpack.c.bf16 %v584_v32, %v577_v42  ;;  %v9008_v52 = vld [vmem:[%s10757_s1 + $0x1d8] sm:$0xff]  ;;  %v11192_v32 = vand.u32 4294901760, %v8926_v55  ;;  %7173 = vmatpush3.bf16.msra.mxu0 %v8959_v18  ;;  %v186_v55 = vld [vmem:[%s8632_s10 + $0x50] sm:$0xff] }
  0x54   : > { %v597_v2 = vsub.f32 %v8599_v62, %v11185_v13  ;;  %v11186_v13 = vand.u32 4294901760, %v8748_v36  ;;  %7017 = vmatpush3.bf16.msra.mxu1 %v8953_v28  ;;  %7175 = vmatprep.subr.bf16.mxu0 %v8967_v61  ;;  %v11202_v61 = vand.u32 4294901760, %v8696_v12 }
  0x55   : > { %11187 = vst [vmem:[#allocation78_spill] sm:$0xff] %v8998_v8  ;;  %v9020_v42 = vpack.c.bf16 %v11192_v32, %v11191_v25  ;;  %v591_v59 = vand.u32 4294901760, %v590_v11  ;;  %v11194_v25 = vand.u32 4294901760, %v8648_v44  ;;  %v187_v32 = vld [vmem:[%s8632_s10 + $0x58] sm:$0xff]  ;;  %7019 = vmatprep.subr.bf16.mxu1 %v8998_v8  ;;  %v11208_v8 = vand.u32 4294901760, %v8988_v53 }
  0x56   : > { %v8995_v20 = vsub.f32 %v8748_v36, %v11186_v13  ;;  %v11189_v13 = vand.u32 4294901760, %v8660_v30  ;;  %v598_v51 = vand.u32 4294901760, %v597_v2  ;;  %v9025_v36 = vld [vmem:[%s10757_s1 + $0x150] sm:$0xff]  ;;  %v11195_v2 = vand.u32 4294901760, %v8652_v29 }
  0x57   : > { %11193 = vst [vmem:[#allocation80_spill] sm:$0xff] %v9020_v42  ;;  %v604_v11 = vsub.f32 %v8648_v44, %v11194_v25  ;;  %v11197_v30 = vand.u32 4294901760, %v8940_v47  ;;  %v9068_v25 = vand.u32 4294901760, %v187_v32  ;;  %v9070_v44 = vand.u32 4294901760, %v186_v55  ;;  %7177 = vmatpush3.bf16.msra.mxu0 %v9020_v42 }
  0x58   : > { %v9014_v10 = vpack.c.bf16 %v11189_v13, %v11188_v37  ;;  %v611_v13 = vsub.f32 %v8652_v29, %v11195_v2  ;;  %v9045_v24 = vpack.c.bf16 %v598_v51, %v591_v59  ;;  %v11198_v37 = vand.u32 4294901760, %v8945_v48  ;;  %v9058_v2 = vld [vmem:[%s10757_s1 + $0x1e0] sm:$0xff]  ;;  %v9063_v51 = vld [vmem:[%s10757_s1 + $0x1e8] sm:$0xff] }
  0x59   : > { %11200 = vst [vmem:[#allocation83_spill] sm:$0xff] %v9063_v51  ;;  %v605_v59 = vand.u32 4294901760, %v604_v11  ;;  %11201 = vst [vmem:[#allocation84_spill] sm:$0xff] %v9070_v44  ;;  %v618_v48 = vsub.f32 %v8696_v12, %v11202_v61  ;;  %v11203_v47 = vand.u32 4294901760, %v8698_v49  ;;  %v11204_v11 = vand.u32 4294901760, %v8677_v15  ;;  %1077 = vmatprep.mubr.f32.mxu0 %v9068_v25  ;;  %v9129_v61 = vld [vmem:[%s10757_s1 + $0x1f0] sm:$0xff] }
  0x5a   : > { %11190 = vst [vmem:[#allocation79_spill] sm:$0xff] %v9014_v10  ;;  %11196 = vst [vmem:[#allocation81_spill] sm:$0xff] %v9045_v24  ;;  %v9051_v18 = vpack.c.bf16 %v11198_v37, %v11197_v30  ;;  %v612_v28 = vand.u32 4294901760, %v611_v13  ;;  %v11205_v13 = vand.u32 4294901760, %v8723_v60  ;;  %v11207_v37 = vand.u32 4294901760, %v8983_v43  ;;  %7021 = vmatpush3.bf16.msra.mxu1 %v9014_v10  ;;  %v9134_v10 = vld [vmem:[%s10757_s1 + $0x1f8] sm:$0xff]  ;;  %1079 = vmatmul.mubr.f32.gmra.mrb[2].mxu0 %v9070_v44 }
  0x5b   : > { %v625_v29 = vsub.f32 %v8698_v49, %v11203_v47  ;;  %v514_v47 = vand.u32 4294901760, %v8995_v20  ;;  %v11210_v15 = vand.u32 4294901760, %v9003_v57  ;;  %v11211_v60 = vand.u32 4294901760, %v9008_v52  ;;  %v9111_v20 = vld [vmem:[%s10757_s1 + $0x160] sm:$0xff]  ;;  %7023 = vmatprep.subr.bf16.mxu1 %v9045_v24  ;;  %v178_v24 = vld [vmem:[%s8632_s10 + $0x10] sm:$0xff] }
  0x5c   : > { %11199 = vst [vmem:[#allocation82_spill] sm:$0xff] %v9051_v18  ;;  %v9083_v30 = vpack.c.bf16 %v11205_v13, %v11204_v11  ;;  %v9089_v1 = vpack.c.bf16 %v11208_v8, %v11207_v37  ;;  %7179 = vmatprep.subr.bf16.mxu0 %v9051_v18  ;;  %v9103_v13 = vsub.f32 %v187_v32, %v9068_v25  ;;  %v9116_v37 = vld [vmem:[%s10757_s1 + $0x168] sm:$0xff]  ;;  %v11215_v32 = vand.u32 4294901760, %v8726_v35 }
  0x5d   : > { %v9100_v11 = vpack.c.bf16 %v11211_v60, %v11210_v15  ;;  %v9106_v8 = vsub.f32 %v186_v55, %v9070_v44  ;;  %v9119_v15 = vpack.c.bf16 %v612_v28, %v605_v59  ;;  %v619_v60 = vand.u32 4294901760, %v618_v48 }
  0x5e   : > { %11206 = vst [vmem:[#allocation85_spill] sm:$0xff] %v9083_v30  ;;  %11209 = vst [vmem:[#allocation86_spill] sm:$0xff] %v9089_v1  ;;  %v9123_v55 = vpack.c.bf16 %v500_v14, %v11215_v32  ;;  %v626_v12 = vand.u32 4294901760, %v625_v29  ;;  %v11217_v28 = vand.u32 4294901760, %v9025_v36  ;;  %v11218_v35 = vand.u32 4294901760, %v9030_v33  ;;  %v179_v32 = vld [vmem:[%s8632_s10 + $0x18] sm:$0xff]  ;;  %7181 = vmatpush3.bf16.msra.mxu0 %v9089_v1  ;;  %7025 = vmatpush3.bf16.msra.mxu1 %v9083_v30 }
  0x5f   : > { %11212 = vst [vmem:[#allocation87_spill] sm:$0xff] %v9100_v11  ;;  %11213 = vst [vmem:[#allocation88_spill] sm:$0xff] %v9103_v13  ;;  %v9146_v59 = vpack.c.bf16 %v8359_v17, %v8357_v16  ;;  %v11221_v18 = vand.u32 4294901760, %v9058_v2  ;;  %v11222_v42 = vand.u32 4294901760, %v9063_v51  ;;  %v9162_v16 = vpack.c.bf16 %v8373_v26, %v8368_v23  ;;  %v9167_v17 = vld [vmem:[%s10757_s1 + $0x170] sm:$0xff]  ;;  %v9172_v29 = vld [vmem:[%s10757_s1 + $0x178] sm:$0xff]  ;;  %7183 = vmatprep.subr.bf16.mxu0 %v9100_v11 }
  0x60   : > { %11214 = vst [vmem:[#allocation89_spill] sm:$0xff] %v9119_v15  ;;  %11216 = vst [vmem:[#allocation90_spill] sm:$0xff] %v9123_v55  ;;  %v9140_v14 = vpack.c.bf16 %v11218_v35, %v11217_v28  ;;  %v11226_v23 = vand.u32 4294901760, %v9106_v8  ;;  %7027 = vmatprep.subr.bf16.mxu1 %v9119_v15  ;;  %v9185_v1 = vpack.c.bf16 %v626_v12, %v619_v60  ;;  %v9187_v51 = vand.u32 4294901760, %v179_v32 }
  0x61   : > { %11220 = vst [vmem:[#allocation92_spill] sm:$0xff] %v9146_v59  ;;  %v9156_v28 = vpack.c.bf16 %v11222_v42, %v11221_v18  ;;  %11224 = vst [vmem:[#allocation94_spill] sm:$0xff] %v9162_v16  ;;  %v11225_v18 = vand.u32 4294901760, %v9103_v13  ;;  %v9191_v30 = vpack.c.bf16 %v8394_v38, %v8379_v31  ;;  %v9193_v11 = vand.u32 4294901760, %v178_v24 }
  0x62   : > { %11219 = vst [vmem:[#allocation91_spill] sm:$0xff] %v9140_v14  ;;  %v397_v26 = vsub.f32 %v9106_v8, %v11226_v23  ;;  %11227 = vst [vmem:[#allocation95_spill] sm:$0xff] %v9185_v1  ;;  %v10898_v23 = vand.u32 4294901760, %v9167_v17  ;;  %v10897_v48 = vand.u32 4294901760, %v9172_v29  ;;  %7185 = vmatpush3.bf16.msra.mxu0 %v9140_v14  ;;  %v11230_v35 = vand.u32 4294901760, %v9111_v20  ;;  %7029 = vmatpush3.bf16.msra.mxu1 %v9123_v55  ;;  %v11297_v14 = vld [vmem:[#allocation73_spill] sm:$0xff] }
  0x63   : > { %11223 = vst [vmem:[#allocation93_spill] sm:$0xff] %v9156_v28  ;;  %v391_v42 = vsub.f32 %v9103_v13, %v11225_v18  ;;  %11228 = vst [vmem:[#allocation96_spill] sm:$0xff] %v9187_v51  ;;  %v11231_v12 = vand.u32 4294901760, %v9116_v37  ;;  %v9205_v15 = vsub.f32 %v179_v32, %v9187_v51  ;;  %v9208_v31 = vsub.f32 %v178_v24, %v9193_v11 }
  0x64   : > { %11229 = vst [vmem:[#allocation97_spill] sm:$0xff] %v9191_v30  ;;  %v398_v13 = vand.u32 4294901760, %v397_v26  ;;  %v9212_v38 = vpack.c.bf16 %v8409_v46, %v8407_v45  ;;  %v9227_v24 = vpack.c.bf16 %v8436_v58, %v8432_v56  ;;  %7031 = vmatprep.subr.bf16.mxu1 %v9185_v1  ;;  %7187 = vmatprep.subr.bf16.mxu0 %v9156_v28 }
  0x65   : > { %v392_v18 = vand.u32 4294901760, %v391_v42  ;;  %v9202_v60 = vpack.c.bf16 %v11231_v12, %v11230_v35  ;;  %11233 = vst [vmem:[#allocation99_spill] sm:$0xff] %v9205_v15  ;;  %11234 = vst [vmem:[#allocation100_spill] sm:$0xff] %v9208_v31  ;;  %v11236_v42 = vand.u32 4294901760, %v8820_v63  ;;  %v11238_v35 = vand.u32 4294901760, %v9129_v61 }
  0x66   : > { %11235 = vst [vmem:[#allocation101_spill] sm:$0xff] %v9212_v38  ;;  %v11239_v12 = vand.u32 4294901760, %v9134_v10  ;;  %11241 = vst [vmem:[#allocation104_spill] sm:$0xff] %v9227_v24  ;;  %v10896_v45 = vand.u32 4294901760, %v9205_v15  ;;  %v10895_v46 = vand.u32 4294901760, %v9208_v31  ;;  %v11242_v63 = vand.u32 4294901760, %v8719_v54 }
  0x67   : > { %11232 = vst [vmem:[#allocation98_spill] sm:$0xff] %v9202_v60  ;;  %393 = vmatprep.mubr.f32.mxu1 %v392_v18  ;;  %v9217_v26 = vpack.c.bf16 %v514_v47, %v11236_v42  ;;  %v11243_v18 = vand.u32 4294901760, %v8735_v41  ;;  %v9248_v56 = vpack.c.bf16 %v10897_v48, %v10898_v23  ;;  %v9252_v58 = vpack.c.bf16 %v8461_v6, %v8459_v5 }
  0x68   : > { %v9223_v32 = vpack.c.bf16 %v11239_v12, %v11238_v35  ;;  %399 = vmatmul.mubr.f32.gmra.mrb[2].mxu1 %v398_v13  ;;  %v9235_v47 = vsub.f32 %v8719_v54, %v11242_v63  ;;  %7189 = vmatpush3.bf16.msra.mxu0 %v9202_v60  ;;  %v1294_v54 = vsub.f32 %v9205_v15, %v10896_v45  ;;  %v11246_v13 = vand.u32 4294901760, %v8767_v40 }
  0x69   : > { %11237 = vst [vmem:[#allocation102_spill] sm:$0xff] %v9217_v26  ;;  %v9240_v42 = vsub.f32 %v8735_v41, %v11243_v18  ;;  %629 = vmatprep.mubr.f32.mxu1 %v8680_v27  ;;  %11244 = vst [vmem:[#allocation105_spill] sm:$0xff] %v9248_v56  ;;  %v1300_v41 = vsub.f32 %v9208_v31, %v10895_v46  ;;  %v11247_v12 = vand.u32 4294901760, %v8772_v9  ;;  %7033 = vmatpush3.bf16.msra.mxu1 %v9217_v26  ;;  %v11268_v26 = vld [vmem:[#allocation31_spill] sm:$0xff] }
  0x6a   : > { %11240 = vst [vmem:[#allocation103_spill] sm:$0xff] %v9223_v32  ;;  %11245 = vst [vmem:[#allocation106_spill] sm:$0xff] %v9252_v58  ;;  %v9264_v35 = vsub.f32 %v8767_v40, %v11246_v13  ;;  %7191 = vmatprep.subr.bf16.mxu0 %v9223_v32  ;;  %v11248_v6 = vand.u32 4294901760, %v8784_v50  ;;  %v11249_v18 = vand.u32 4294901760, %v8802_v21  ;;  %v11250_v40 = vld [vmem:[#allocation20_spill] sm:$0xff]  ;;  %7035 = vmatprep.subr.bf16.mxu1 %v9146_v59  ;;  %v11253_v45 = vand.u32 4294901760, %v8807_v7 }
  0x6b   : > { %v9269_v5 = vsub.f32 %v8772_v9, %v11247_v12  ;;  %v9285_v13 = vpack.c.bf16 %v11250_v40, %v8485_v19  ;;  %v1295_v9 = vand.u32 4294901760, %v1294_v54  ;;  %v9290_v12 = vpack.c.bf16 %v9240_v42, %v9235_v47  ;;  %v11255_v19 = vld [vmem:[#allocation23_spill] sm:$0xff]  ;;  %v11256_v40 = vld [vmem:[#allocation24_spill] sm:$0xff]  ;;  %v11260_v59 = vld [vmem:[#allocation49_spill] sm:$0xff] }
  0x6c   : > { %v9276_v63 = vsub.f32 %v8784_v50, %v11248_v6  ;;  %v9281_v46 = vsub.f32 %v8802_v21, %v11249_v18  ;;  %v9295_v50 = vsub.f32 %v8807_v7, %v11253_v45  ;;  %v1301_v6 = vand.u32 4294901760, %v1300_v41  ;;  %v11258_v54 = vld [vmem:[#allocation27_spill] sm:$0xff]  ;;  %631 = vmatmul.mubr.f32.vlgmr.msra.gmra.mrb[4].mxu1 %v11260_v59  ;;  %7193 = vmatpush3.bf16.msra.mxu0 %v9248_v56  ;;  %v11262_v45 = vld [vmem:[#allocation60_spill] sm:$0xff] }
  0x6d   : > { %11251 = vst [vmem:[#allocation20_spill] sm:$0xff] %v9285_v13  ;;  %11252 = vst [vmem:[#allocation107_spill] sm:$0xff] %v9290_v12  ;;  %v11254_v21 = vand.u32 4294901760, %v8817_v39  ;;  %v9304_v48 = vpack.c.bf16 %v11256_v40, %v11255_v19  ;;  %v9308_v23 = vpack.c.bf16 %v11258_v54, %v8538_v3  ;;  %v9314_v7 = vpack.c.bf16 %v9269_v5, %v9264_v35  ;;  %v11267_v54 = vld [vmem:[#allocation30_spill] sm:$0xff] }
  0x6e   : > { %7037 = vmatpush3.bf16.msra.mxu1 %v9162_v16  ;;  %636 = vmatprep.mubr.f32.mxu1 %v9068_v25  ;;  %v9330_v3 = vpack.c.bf16 %v9281_v46, %v9276_v63  ;;  %v9334_v1 = vpack.c.bf16 %v11268_v26, %v11267_v54  ;;  %v11273_v16 = vld [vmem:[#allocation37_spill] sm:$0xff]  ;;  %v188_v26 = vld [vmem:[%s8632_s10 + $0x60] sm:$0xff] }
  0x6f   : > { %v9300_v18 = vsub.f32 %v8817_v39, %v11254_v21  ;;  %11257 = vst [vmem:[#allocation23_spill] sm:$0xff] %v9304_v48  ;;  %11259 = vst [vmem:[#allocation24_spill] sm:$0xff] %v9308_v23  ;;  %v11263_v39 = vand.u32 4294901760, %v11262_v45  ;;  %v11264_v21 = vld [vmem:[#allocation61_spill] sm:$0xff]  ;;  %1296 = vmatprep.mubr.f32.mxu0 %v1295_v9  ;;  %7039 = vmatprep.subr.bf16.mxu1 %v9191_v30  ;;  %v9391_v32 = vand.u32 4294901760, %v188_v26 }
  0x70   : > { %11261 = vst [vmem:[#allocation27_spill] sm:$0xff] %v9314_v7  ;;  %v11265_v19 = vand.u32 4294901760, %v11264_v21  ;;  %11266 = vst [vmem:[#allocation49_spill] sm:$0xff] %v9330_v3  ;;  %1302 = vmatmul.mubr.f32.vlgmr.msra.gmra.mrb[4].mxu0 %v1301_v6  ;;  %7227 = vmatprep.subr.bf16.mxu0 %v9290_v12  ;;  %v11277_v6 = vand.u32 4294901760, %v8869_v4 }
  0x71   : > { %v9319_v41 = vsub.f32 %v11262_v45, %v11263_v39  ;;  %11269 = vst [vmem:[#allocation60_spill] sm:$0xff] %v9334_v1  ;;  %v9339_v45 = vpack.c.bf16 %v8599_v62, %v8595_v34  ;;  %v189_v39 = vld [vmem:[%s8632_s10 + $0x68] sm:$0xff]  ;;  %638 = vmatmul.mubr.f32.gmra.mrb[6].mxu1 %v9070_v44  ;;  %7229 = vmatpush3.bf16.msra.mxu0 %v9314_v7  ;;  %v11276_v62 = vand.u32 4294901760, %v8864_v0  ;;  %v11279_v7 = vld [vmem:[#allocation65_spill] sm:$0xff] }
  0x72   : > { %v9324_v40 = vsub.f32 %v11264_v21, %v11265_v19  ;;  %v9345_v21 = vpack.c.bf16 %v9300_v18, %v9295_v50  ;;  %v11272_v19 = vld [vmem:[#allocation36_spill] sm:$0xff]  ;;  %v9366_v54 = vsub.f32 %v8869_v4, %v11277_v6  ;;  %7041 = vmatpush3.bf16.msra.mxu1 %v9212_v38  ;;  %7231 = vmatprep.subr.bf16.mxu0 %v9330_v3  ;;  %v11280_v12 = vand.u32 4294901760, %v11279_v7  ;;  %v11285_v3 = vld [vmem:[#allocation45_spill] sm:$0xff] }
  0x73   : > { %11270 = vst [vmem:[#allocation61_spill] sm:$0xff] %v9339_v45  ;;  %v9349_v55 = vpack.c.bf16 %v11273_v16, %v11272_v19  ;;  %v9361_v9 = vsub.f32 %v8864_v0, %v11276_v62  ;;  %v11278_v16 = vand.u32 4294901760, %v8886_v22  ;;  %v11281_v0 = vld [vmem:[#allocation39_spill] sm:$0xff]  ;;  %v11282_v62 = vld [vmem:[#allocation41_spill] sm:$0xff]  ;;  %v9384_v4 = vand.u32 4294901760, %v189_v39  ;;  %7043 = vmatprep.subr.bf16.mxu1 %v9227_v24  ;;  %v11284_v6 = vld [vmem:[#allocation44_spill] sm:$0xff] }
  0x74   : > { %11271 = vst [vmem:[#allocation30_spill] sm:$0xff] %v9345_v21  ;;  %v9356_v34 = vpack.c.bf16 %v9324_v40, %v9319_v41  ;;  %v9378_v30 = vsub.f32 %v11279_v7, %v11280_v12  ;;  %v9382_v56 = vpack.c.bf16 %v11282_v62, %v11281_v0  ;;  %v9389_v38 = vpack.c.bf16 %v11285_v3, %v11284_v6  ;;  %v11289_v12 = vld [vmem:[#allocation71_spill] sm:$0xff]  ;;  %v11291_v62 = vld [vmem:[#allocation48_spill] sm:$0xff] }
  0x75   : > { %11274 = vst [vmem:[#allocation31_spill] sm:$0xff] %v9349_v55  ;;  %v9373_v19 = vsub.f32 %v8886_v22, %v11278_v16  ;;  %v11287_v22 = vld [vmem:[#allocation69_spill] sm:$0xff]  ;;  %v11290_v7 = vand.u32 4294901760, %v11289_v12  ;;  %v9405_v28 = vpack.c.bf16 %v8698_v49, %v11291_v62  ;;  %v11293_v24 = vld [vmem:[#allocation47_spill] sm:$0xff]  ;;  %7233 = vmatpush3.bf16.msra.mxu0 %v9345_v21  ;;  %v9411_v3 = vpack.c.bf16 %v9366_v54, %v9361_v9  ;;  %v11295_v6 = vld [vmem:[#allocation72_spill] sm:$0xff] }
  0x76   : > { %11275 = vst [vmem:[#allocation36_spill] sm:$0xff] %v9356_v34  ;;  %11283 = vst [vmem:[#allocation37_spill] sm:$0xff] %v9382_v56  ;;  %v11288_v16 = vand.u32 4294901760, %v11287_v22  ;;  %773 = vmatprep.mubr.f32.mxu1 %v11293_v24  ;;  %v11299_v49 = vld [vmem:[#allocation53_spill] sm:$0xff]  ;;  %v11300_v62 = vld [vmem:[#allocation55_spill] sm:$0xff]  ;;  %7045 = vmatpush3.bf16.msra.mxu1 %v9252_v58  ;;  %v11310_v58 = vand.u32 4294901760, %v9008_v52 }
  0x77   : > { %11286 = vst [vmem:[#allocation65_spill] sm:$0xff] %v9389_v38  ;;  %v9401_v0 = vsub.f32 %v11289_v12, %v11290_v7  ;;  %11292 = vst [vmem:[#allocation39_spill] sm:$0xff] %v9405_v28  ;;  %v11298_v12 = vand.u32 4294901760, %v11297_v14  ;;  %v9425_v44 = vpack.c.bf16 %v11300_v62, %v11299_v49  ;;  %7235 = vmatprep.subr.bf16.mxu0 %v9356_v34  ;;  %7047 = vmatprep.subr.bf16.mxu1 %v9285_v13 }
  0x78   : > { %v9396_v60 = vsub.f32 %v11287_v22, %v11288_v16  ;;  %11294 = vst [vmem:[#allocation41_spill] sm:$0xff] %v9411_v3  ;;  %v11296_v22 = vand.u32 4294901760, %v11295_v6  ;;  %v9431_v21 = vpack.c.bf16 %v9378_v30, %v9373_v19 }
  0x79   : > { %v9421_v7 = vsub.f32 %v11297_v14, %v11298_v12  ;;  %11301 = vst [vmem:[#allocation44_spill] sm:$0xff] %v9425_v44  ;;  %v9438_v14 = vsub.f32 %v188_v26, %v9391_v32  ;;  %7237 = vmatpush3.bf16.msra.mxu0 %v9411_v3  ;;  %v11308_v26 = vand.u32 4294901760, %v8988_v53  ;;  %v11309_v12 = vand.u32 4294901760, %v9003_v57 }
  0x7a   : > { %v9416_v16 = vsub.f32 %v11295_v6, %v11296_v22  ;;  %11302 = vst [vmem:[#allocation45_spill] sm:$0xff] %v9431_v21  ;;  %v9434_v6 = vsub.f32 %v189_v39, %v9384_v4  ;;  %v9442_v22 = vpack.c.bf16 %v9401_v0, %v9396_v60  ;;  %v11307_v39 = vand.u32 4294901760, %v8983_v43  ;;  %7049 = vmatpush3.bf16.msra.mxu1 %v9304_v48 }
  0x7b   : > { %11304 = vst [vmem:[#allocation71_spill] sm:$0xff] %v9438_v14  ;;  %v9458_v34 = vsub.f32 %v8988_v53, %v11308_v26  ;;  %v10928_v13 = vand.u32 4294901760, %v9438_v14  ;;  %7239 = vmatprep.subr.bf16.mxu0 %v9431_v21  ;;  %v9466_v3 = vsub.f32 %v9003_v57, %v11309_v12  ;;  %7051 = vmatprep.subr.bf16.mxu1 %v9308_v23  ;;  %v11314_v12 = vand.u32 4294901760, %v9030_v33 }
  0x7c   : > { %11303 = vst [vmem:[#allocation69_spill] sm:$0xff] %v9434_v6  ;;  %11305 = vst [vmem:[#allocation48_spill] sm:$0xff] %v9442_v22  ;;  %v9448_v49 = vpack.c.bf16 %v9421_v7, %v9416_v16  ;;  %v9453_v62 = vsub.f32 %v8983_v43, %v11307_v39  ;;  %v9471_v43 = vsub.f32 %v9008_v52, %v11310_v58  ;;  %v11311_v39 = vand.u32 4294901760, %v9434_v6 }
  0x7d   : > { %v1315_v26 = vsub.f32 %v9438_v14, %v10928_v13  ;;  %7241 = vmatpush3.bf16.msra.mxu0 %v9442_v22  ;;  %v11313_v52 = vand.u32 4294901760, %v9025_v36  ;;  %v11316_v13 = vand.u32 4294901760, %v9058_v2 }
  0x7e   : > { %11306 = vst [vmem:[#allocation47_spill] sm:$0xff] %v9448_v49  ;;  %v1309_v53 = vsub.f32 %v9434_v6, %v11311_v39  ;;  %v9483_v57 = vpack.c.bf16 %v9458_v34, %v9453_v62  ;;  %v9493_v39 = vsub.f32 %v9030_v33, %v11314_v12  ;;  %7053 = vmatpush3.bf16.msra.mxu1 %v9334_v1 }
  0x7f   : > { %v9488_v58 = vsub.f32 %v9025_v36, %v11313_v52  ;;  %v1316_v23 = vand.u32 4294901760, %v1315_v26  ;;  %7243 = vmatprep.subr.bf16.mxu0 %v9448_v49  ;;  %v9504_v22 = vsub.f32 %v9058_v2, %v11316_v13  ;;  %v11317_v36 = vld [vmem:[#allocation83_spill] sm:$0xff]  ;;  %7055 = vmatprep.subr.bf16.mxu1 %v9339_v45  ;;  %v11320_v26 = vand.u32 4294901760, %v9111_v20 }
  0x80   : > { %v1310_v21 = vand.u32 4294901760, %v1309_v53  ;;  %11312 = vst [vmem:[#allocation72_spill] sm:$0xff] %v9483_v57  ;;  %v9499_v53 = vpack.c.bf16 %v9471_v43, %v9466_v3  ;;  %v11318_v52 = vand.u32 4294901760, %v11317_v36  ;;  %v11321_v13 = vand.u32 4294901760, %v9116_v37 }
  0x81   : > { %7245 = vmatpush3.bf16.msra.mxu0 %v9483_v57  ;;  %v9515_v33 = vpack.c.bf16 %v9493_v39, %v9488_v58  ;;  %v9520_v2 = vsub.f32 %v9111_v20, %v11320_v26  ;;  %v11326_v26 = vand.u32 4294901760, %v9167_v17 }
  0x82   : > { %11315 = vst [vmem:[#allocation73_spill] sm:$0xff] %v9499_v53  ;;  %v9509_v48 = vsub.f32 %v11317_v36, %v11318_v52  ;;  %1311 = vmatprep.mubr.f32.mxu0 %v1310_v21  ;;  %v9525_v12 = vsub.f32 %v9116_v37, %v11321_v13  ;;  %7057 = vmatpush3.bf16.msra.mxu1 %v9349_v55  ;;  %v11323_v21 = vand.u32 4294901760, %v9129_v61  ;;  %v11324_v36 = vand.u32 4294901760, %v9134_v10 }
  0x83   : > { %1317 = vmatmul.mubr.f32.gmra.mrb[6].mxu0 %v1316_v23  ;;  %11319 = vst [vmem:[#allocation53_spill] sm:$0xff] %v9515_v33  ;;  %7247 = vmatprep.subr.bf16.mxu0 %v9499_v53  ;;  %v9553_v13 = vsub.f32 %v9167_v17, %v11326_v26  ;;  %v1325_v17 = vand.u32 4294901760, %v9264_v35  ;;  %v1332_v26 = vand.u32 4294901760, %v9269_v5 }
  0x84   : > { %1691 = vmatprep.mubr.f32.mxu0 %v9205_v15  ;;  %v9532_v23 = vpack.c.bf16 %v9509_v48, %v9504_v22  ;;  %v9537_v20 = vsub.f32 %v9129_v61, %v11323_v21  ;;  %v9542_v37 = vsub.f32 %v9134_v10, %v11324_v36  ;;  %7059 = vmatprep.subr.bf16.mxu1 %v9382_v56  ;;  %v11327_v61 = vand.u32 4294901760, %v9172_v29  ;;  %v11331_v56 = vld [vmem:[#allocation6_spill] sm:$0xff] }
  0x85   : > { %7249 = vmatpush3.bf16.msra.mxu0 %v9515_v33  ;;  %v9548_v52 = vpack.c.bf16 %v9525_v12, %v9520_v2  ;;  %v1437_v36 = vand.u32 4294901760, %v9235_v47  ;;  %v1444_v33 = vand.u32 4294901760, %v9240_v42  ;;  %v9590_v1 = vpack.c.bf16 %v1332_v26, %v1325_v17 }
  0x86   : > { %11322 = vst [vmem:[#allocation55_spill] sm:$0xff] %v9532_v23  ;;  %v9558_v21 = vsub.f32 %v9172_v29, %v11327_v61  ;;  %7061 = vmatpush3.bf16.msra.mxu1 %v9389_v38  ;;  %7251 = vmatprep.subr.bf16.mxu0 %v9532_v23  ;;  %v9564_v10 = vpack.c.bf16 %v9542_v37, %v9537_v20  ;;  %v1451_v29 = vand.u32 4294901760, %v9276_v63  ;;  %v1458_v23 = vand.u32 4294901760, %v9281_v46 }
  0x87   : > { %11325 = vst [vmem:[#allocation83_spill] sm:$0xff] %v9548_v52  ;;  %7063 = vmatprep.subr.bf16.mxu1 %v9405_v28  ;;  %v1438_v53 = vsub.f32 %v9235_v47, %v1437_v36  ;;  %v1445_v57 = vsub.f32 %v9240_v42, %v1444_v33  ;;  %v9582_v49 = vpack.c.bf16 %v1444_v33, %v1437_v36  ;;  %v1339_v28 = vand.u32 4294901760, %v9295_v50  ;;  %v11333_v36 = vld [vmem:[#allocation52_spill] sm:$0xff] }
  0x88   : > { %11328 = vst [vmem:[#allocation108_spill] sm:$0xff] %v9564_v10  ;;  %v9575_v61 = vpack.c.bf16 %v9558_v21, %v9553_v13  ;;  %v1326_v38 = vsub.f32 %v9264_v35, %v1325_v17  ;;  %v1333_v47 = vsub.f32 %v9269_v5, %v1332_v26  ;;  %v1452_v42 = vsub.f32 %v9276_v63, %v1451_v29  ;;  %v11337_v5 = vld [vmem:[#allocation88_spill] sm:$0xff] }
  0x89   : > { %7253 = vmatpush3.bf16.msra.mxu0 %v9548_v52  ;;  %11330 = vst [vmem:[#allocation110_spill] sm:$0xff] %v9582_v49  ;;  %v1346_v52 = vand.u32 4294901760, %v9300_v18  ;;  %v1439_v55 = vand.u32 4294901760, %v1438_v53  ;;  %v1446_v45 = vand.u32 4294901760, %v1445_v57  ;;  %11332 = vst [vmem:[#allocation6_spill] sm:$0xff] %v9590_v1  ;;  %v1459_v33 = vsub.f32 %v9281_v46, %v1458_v23  ;;  %v11336_v57 = vld [vmem:[#allocation7_spill] sm:$0xff] }
  0x8a   : > { %11329 = vst [vmem:[#allocation109_spill] sm:$0xff] %v9575_v61  ;;  %7065 = vmatpush3.bf16.msra.mxu1 %v9425_v44  ;;  %7255 = vmatprep.subr.bf16.mxu0 %v9564_v10  ;;  %v1327_v44 = vand.u32 4294901760, %v1326_v38  ;;  %v9595_v10 = vpack.c.bf16 %v1458_v23, %v1451_v29  ;;  %v1334_v15 = vand.u32 4294901760, %v1333_v47  ;;  %v1453_v53 = vand.u32 4294901760, %v1452_v42  ;;  %v11338_v26 = vld [vmem:[#allocation8_spill] sm:$0xff] }
  0x8b   : > { %7067 = vmatprep.subr.bf16.mxu1 %v11331_v56  ;;  %v9597_v35 = vpack.c.bf16 %v1446_v45, %v1439_v55  ;;  %v1465_v63 = vand.u32 4294901760, %v9319_v41  ;;  %v1472_v38 = vand.u32 4294901760, %v9324_v40  ;;  %v1460_v17 = vand.u32 4294901760, %v1459_v33 }
  0x8c   : > { %11334 = vst [vmem:[#allocation52_spill] sm:$0xff] %v9595_v10  ;;  %v1340_v46 = vsub.f32 %v9295_v50, %v1339_v28  ;;  %v9606_v23 = vpack.c.bf16 %v1346_v52, %v1339_v28  ;;  %v9608_v55 = vpack.c.bf16 %v1334_v15, %v1327_v44  ;;  %v1347_v45 = vsub.f32 %v9300_v18, %v1346_v52  ;;  %v11342_v18 = vld [vmem:[#allocation9_spill] sm:$0xff] }
  0x8d   : > { %776 = vmatmul.mubr.f32.vlgmr.msra.gmra.mrb[8].mxu1 %v11333_v36  ;;  %7257 = vmatpush3.bf16.msra.mxu0 %v9575_v61  ;;  %11335 = vst [vmem:[#allocation111_spill] sm:$0xff] %v9597_v35  ;;  %v1353_v29 = vand.u32 4294901760, %v9361_v9  ;;  %v1360_v47 = vand.u32 4294901760, %v9366_v54  ;;  %v9614_v42 = vpack.c.bf16 %v1460_v17, %v1453_v53  ;;  %v1479_v28 = vand.u32 4294901760, %v9373_v19  ;;  %v11344_v17 = vld [vmem:[#allocation11_spill] sm:$0xff] }
  0x8e   : > { %7069 = vmatpush3.bf16.msra.mxu1 %v11336_v57  ;;  %782 = vmatprep.mubr.f32.mxu1 %v11337_v5  ;;  %11339 = vst [vmem:[#allocation7_spill] sm:$0xff] %v9606_v23  ;;  %11340 = vst [vmem:[#allocation88_spill] sm:$0xff] %v9608_v55  ;;  %v1341_v33 = vand.u32 4294901760, %v1340_v46  ;;  %v1486_v44 = vand.u32 4294901760, %v9378_v30  ;;  %v1348_v15 = vand.u32 4294901760, %v1347_v45  ;;  %v1466_v50 = vsub.f32 %v9319_v41, %v1465_v63 }
  0x8f   : > { %7071 = vmatprep.subr.bf16.mxu1 %v11338_v26  ;;  %7291 = vmatprep.subr.bf16.mxu0 %v9582_v49  ;;  %11341 = vst [vmem:[#allocation8_spill] sm:$0xff] %v9614_v42  ;;  %v9623_v52 = vpack.c.bf16 %v1472_v38, %v1465_v63  ;;  %v1473_v53 = vsub.f32 %v9324_v40, %v1472_v38  ;;  %v11345_v46 = vand.u32 4294901760, %v11293_v24  ;;  %v1367_v45 = vand.u32 4294901760, %v9396_v60 }
  0x90   : > { %1694 = vmatmul.mubr.f32.vlgmr.msra.gmra.mrb[8].mxu0 %v9208_v31  ;;  %v1467_v49 = vand.u32 4294901760, %v1466_v50  ;;  %v1374_v41 = vand.u32 4294901760, %v9401_v0  ;;  %v9635_v63 = vpack.c.bf16 %v1360_v47, %v1353_v29  ;;  %v9637_v40 = vpack.c.bf16 %v1486_v44, %v1479_v28  ;;  %v11359_v31 = vld [vmem:[#allocation22_spill] sm:$0xff] }
  0x91   : > { %785 = vmatmul.mubr.f32.gmra.mrb[10].mxu1 %v9106_v8  ;;  %7293 = vmatpush3.bf16.msra.mxu0 %v9590_v1  ;;  %11343 = vst [vmem:[#allocation9_spill] sm:$0xff] %v9623_v52  ;;  %v9629_v1 = vpack.c.bf16 %v1348_v15, %v1341_v33  ;;  %v1474_v61 = vand.u32 4294901760, %v1473_v53  ;;  %v1354_v38 = vsub.f32 %v9361_v9, %v1353_v29  ;;  %v11349_v33 = vld [vmem:[#allocation13_spill] sm:$0xff]  ;;  %v1493_v15 = vand.u32 4294901760, %v9416_v16 }
  0x92   : > { %7073 = vmatpush3.bf16.msra.mxu1 %v11342_v18  ;;  %7295 = vmatprep.subr.bf16.mxu0 %v9595_v10  ;;  %11347 = vst [vmem:[#allocation113_spill] sm:$0xff] %v9635_v63  ;;  %11348 = vst [vmem:[#allocation114_spill] sm:$0xff] %v9637_v40  ;;  %v1361_v24 = vsub.f32 %v9366_v54, %v1360_v47  ;;  %v1500_v50 = vand.u32 4294901760, %v9421_v7  ;;  %v1480_v53 = vsub.f32 %v9373_v19, %v1479_v28 }
  0x93   : > { %7075 = vmatprep.subr.bf16.mxu1 %v11344_v17  ;;  %889 = vmatprep.mubr.f32.mxu1 %v11345_v46  ;;  %11346 = vst [vmem:[#allocation112_spill] sm:$0xff] %v9629_v1  ;;  %v9645_v46 = vpack.c.bf16 %v1474_v61, %v1467_v49  ;;  %v1355_v10 = vand.u32 4294901760, %v1354_v38  ;;  %v9650_v29 = vpack.c.bf16 %v1374_v41, %v1367_v45  ;;  %v1381_v54 = vand.u32 4294901760, %v9453_v62  ;;  %v11354_v38 = vld [vmem:[#allocation17_spill] sm:$0xff]  ;;  %v11377_v1 = vld [vmem:[#allocation43_spill] sm:$0xff] }
  0x94   : > { %1700 = vmatprep.mubr.f32.mxu0 %v9434_v6  ;;  %v1362_v9 = vand.u32 4294901760, %v1361_v24  ;;  %v1481_v47 = vand.u32 4294901760, %v1480_v53  ;;  %v1388_v49 = vand.u32 4294901760, %v9458_v34  ;;  %v1507_v19 = vand.u32 4294901760, %v9466_v3 }
  0x95   : > { %7297 = vmatpush3.bf16.msra.mxu0 %v9606_v23  ;;  %11350 = vst [vmem:[#allocation115_spill] sm:$0xff] %v9645_v46  ;;  %v11351_v23 = vld [vmem:[#allocation15_spill] sm:$0xff]  ;;  %11352 = vst [vmem:[#allocation116_spill] sm:$0xff] %v9650_v29  ;;  %v1368_v28 = vsub.f32 %v9396_v60, %v1367_v45  ;;  %v9663_v24 = vpack.c.bf16 %v1500_v50, %v1493_v15  ;;  %v1514_v53 = vand.u32 4294901760, %v9471_v43  ;;  %v1402_v60 = vand.u32 4294901760, %v9493_v39 }
  0x96   : > { %7077 = vmatpush3.bf16.msra.mxu1 %v11349_v33  ;;  %7299 = vmatprep.subr.bf16.mxu0 %v9623_v52  ;;  %v1487_v52 = vsub.f32 %v9378_v30, %v1486_v44  ;;  %v9658_v61 = vpack.c.bf16 %v1362_v9, %v1355_v10  ;;  %v1375_v30 = vsub.f32 %v9401_v0, %v1374_v41  ;;  %v11356_v44 = vld [vmem:[#allocation19_spill] sm:$0xff]  ;;  %v1521_v0 = vand.u32 4294901760, %v9504_v22 }
  0x97   : > { %7079 = vmatprep.subr.bf16.mxu1 %v11351_v23  ;;  %1703 = vmatmul.mubr.f32.gmra.mrb[10].mxu0 %v9438_v14  ;;  %11355 = vst [vmem:[#allocation118_spill] sm:$0xff] %v9663_v24  ;;  %v1369_v6 = vand.u32 4294901760, %v1368_v28  ;;  %v1494_v10 = vsub.f32 %v9416_v16, %v1493_v15  ;;  %v9680_v16 = vpack.c.bf16 %v1514_v53, %v1507_v19 }
  0x98   : > { %1988 = vmatprep.mubr.f32.mxu0 %v9187_v51  ;;  %11353 = vst [vmem:[#allocation117_spill] sm:$0xff] %v9658_v61  ;;  %v1488_v14 = vand.u32 4294901760, %v1487_v52  ;;  %v1376_v9 = vand.u32 4294901760, %v1375_v30  ;;  %v9675_v52 = vpack.c.bf16 %v1388_v49, %v1381_v54  ;;  %v1382_v28 = vsub.f32 %v9453_v62, %v1381_v54  ;;  %v11365_v62 = vld [vmem:[#allocation29_spill] sm:$0xff] }
  0x99   : > { %7301 = vmatpush3.bf16.msra.mxu0 %v9635_v63  ;;  %v1395_v63 = vand.u32 4294901760, %v9488_v58  ;;  %v1495_v41 = vand.u32 4294901760, %v1494_v10  ;;  %11360 = vst [vmem:[#allocation121_spill] sm:$0xff] %v9680_v16  ;;  %v1389_v30 = vsub.f32 %v9458_v34, %v1388_v49  ;;  %v1515_v61 = vsub.f32 %v9471_v43, %v1514_v53  ;;  %v260_v43 = vld [vmem:[%s10757_s1 + $0x200] sm:$0xff] }
  0x9a   : > { %7081 = vmatpush3.bf16.msra.mxu1 %v11354_v38  ;;  %7303 = vmatprep.subr.bf16.mxu0 %v9637_v40  ;;  %v9671_v45 = vpack.c.bf16 %v1488_v14, %v1481_v47  ;;  %v1501_v40 = vsub.f32 %v9421_v7, %v1500_v50  ;;  %11358 = vst [vmem:[#allocation120_spill] sm:$0xff] %v9675_v52  ;;  %v1528_v14 = vand.u32 4294901760, %v9509_v48  ;;  %v11362_v7 = vld [vmem:[#allocation26_spill] sm:$0xff]  ;;  %v1409_v50 = vand.u32 4294901760, %v9520_v2 }
  0x9b   : > { %7083 = vmatprep.subr.bf16.mxu1 %v11356_v44  ;;  %v9683_v15 = vpack.c.bf16 %v1376_v9, %v1369_v6  ;;  %v9689_v10 = vpack.c.bf16 %v1402_v60, %v1395_v63  ;;  %v1416_v6 = vand.u32 4294901760, %v9525_v12  ;;  %v1383_v9 = vand.u32 4294901760, %v1382_v28 }
  0x9c   : > { %11357 = vst [vmem:[#allocation119_spill] sm:$0xff] %v9671_v45  ;;  %v1502_v47 = vand.u32 4294901760, %v1501_v40  ;;  %v1535_v40 = vand.u32 4294901760, %v9537_v20  ;;  %v9701_v34 = vpack.c.bf16 %v1528_v14, %v1521_v0  ;;  %v1542_v54 = vand.u32 4294901760, %v9542_v37 }
  0x9d   : > { %7305 = vmatpush3.bf16.msra.mxu0 %v9650_v29  ;;  %11361 = vst [vmem:[#allocation122_spill] sm:$0xff] %v9683_v15  ;;  %11363 = vst [vmem:[#allocation123_spill] sm:$0xff] %v9689_v10  ;;  %v180_v29 = vld [vmem:[%s8632_s10 + $0x20] sm:$0xff]  ;;  %v1390_v15 = vand.u32 4294901760, %v1389_v30  ;;  %v1423_v28 = vand.u32 4294901760, %v9553_v13  ;;  %v1430_v30 = vand.u32 4294901760, %v9558_v21 }
  0x9e   : > { %7085 = vmatpush3.bf16.msra.mxu1 %v11359_v31  ;;  %7307 = vmatprep.subr.bf16.mxu0 %v9663_v24  ;;  %v9692_v45 = vpack.c.bf16 %v1502_v47, %v1495_v41  ;;  %v1508_v24 = vsub.f32 %v9466_v3, %v1507_v19  ;;  %11366 = vst [vmem:[#allocation125_spill] sm:$0xff] %v9701_v34  ;;  %v1516_v3 = vand.u32 4294901760, %v1515_v61  ;;  %v11367_v19 = vld [vmem:[#allocation33_spill] sm:$0xff]  ;;  %v9708_v53 = vand.u32 4294901760, %v180_v29  ;;  %v261_v61 = vld [vmem:[%s10757_s1 + $0x208] sm:$0xff] }
  0x9f   : > { %7087 = vmatprep.subr.bf16.mxu1 %v11362_v7  ;;  %v9710_v41 = vpack.c.bf16 %v1390_v15, %v1383_v9  ;;  %v1396_v47 = vsub.f32 %v9488_v58, %v1395_v63  ;;  %v262_v58 = vld [vmem:[%s10757_s1 + $0x210] sm:$0xff]  ;;  %v263_v63 = vld [vmem:[%s10757_s1 + $0x218] sm:$0xff]  ;;  %v1522_v9 = vsub.f32 %v9504_v22, %v1521_v0 }
  0xa0   : > { %11364 = vst [vmem:[#allocation124_spill] sm:$0xff] %v9692_v45  ;;  %v1509_v49 = vand.u32 4294901760, %v1508_v24  ;;  %v9738_v45 = vsub.f32 %v180_v29, %v9708_v53  ;;  %v2120_v46 = vand.u32 4294901760, %v262_v58  ;;  %v2123_v22 = vand.u32 4294901760, %v263_v63  ;;  %v264_v29 = vld [vmem:[%s10757_s1 + $0x220] sm:$0xff] }
  0xa1   : > { %7309 = vmatpush3.bf16.msra.mxu0 %v9675_v52  ;;  %11368 = vst [vmem:[#allocation126_spill] sm:$0xff] %v9710_v41  ;;  %v9722_v52 = vpack.c.bf16 %v1416_v6, %v1409_v50  ;;  %v1397_v15 = vand.u32 4294901760, %v1396_v47  ;;  %v2117_v41 = vand.u32 4294901760, %v261_v61  ;;  %v1523_v51 = vand.u32 4294901760, %v1522_v9 }
  0xa2   : > { %7089 = vmatpush3.bf16.msra.mxu1 %v11365_v62  ;;  %7311 = vmatprep.subr.bf16.mxu0 %v9680_v16  ;;  %v9718_v24 = vpack.c.bf16 %v1516_v3, %v1509_v49  ;;  %v1403_v16 = vsub.f32 %v9493_v39, %v1402_v60  ;;  %v1529_v49 = vsub.f32 %v9509_v48, %v1528_v14  ;;  %v11371_v3 = vld [vmem:[#allocation35_spill] sm:$0xff]  ;;  %v2114_v60 = vand.u32 4294901760, %v260_v43 }
  0xa3   : > { %7091 = vmatprep.subr.bf16.mxu1 %v11367_v19  ;;  %11370 = vst [vmem:[#allocation128_spill] sm:$0xff] %v9722_v52  ;;  %v9734_v39 = vpack.c.bf16 %v1542_v54, %v1535_v40  ;;  %v1410_v48 = vsub.f32 %v9520_v2, %v1409_v50  ;;  %v9744_v14 = vpack.c.bf16 %v1430_v30, %v1423_v28 }
  0xa4   : > { %11369 = vst [vmem:[#allocation127_spill] sm:$0xff] %v9718_v24  ;;  %v11373_v24 = vld [vmem:[#allocation40_spill] sm:$0xff]  ;;  %v1530_v47 = vand.u32 4294901760, %v1529_v49  ;;  %v1543_v2 = vsub.f32 %v9542_v37, %v1542_v54  ;;  %v9757_v50 = vpack.c.bf16 %v2117_v41, %v2114_v60  ;;  %v9763_v9 = vpack.c.bf16 %v2123_v22, %v2120_v46 }
  0xa5   : > { %7313 = vmatpush3.bf16.msra.mxu0 %v9689_v10  ;;  %11372 = vst [vmem:[#allocation129_spill] sm:$0xff] %v9734_v39  ;;  %v1404_v10 = vand.u32 4294901760, %v1403_v16  ;;  %11375 = vst [vmem:[#allocation131_spill] sm:$0xff] %v9744_v14  ;;  %v1417_v16 = vsub.f32 %v9525_v12, %v1416_v6  ;;  %v9768_v37 = vsub.f32 %v260_v43, %v2114_v60 }
  0xa6   : > { %7093 = vmatpush3.bf16.msra.mxu1 %v11371_v3  ;;  %7315 = vmatprep.subr.bf16.mxu0 %v9701_v34  ;;  %v9746_v34 = vpack.c.bf16 %v1530_v47, %v1523_v51  ;;  %v265_v51 = vld [vmem:[%s10757_s1 + $0x228] sm:$0xff]  ;;  %v1544_v47 = vand.u32 4294901760, %v1543_v2  ;;  %v1424_v54 = vsub.f32 %v9553_v13, %v1423_v28  ;;  %v1431_v43 = vsub.f32 %v9558_v21, %v1430_v30  ;;  %v267_v13 = vld [vmem:[%s10757_s1 + $0x238] sm:$0xff] }
  0xa7   : > { %7095 = vmatprep.subr.bf16.mxu1 %v11373_v24  ;;  %v9740_v0 = vpack.c.bf16 %v1404_v10, %v1397_v15  ;;  %v1411_v10 = vand.u32 4294901760, %v1410_v48  ;;  %v1536_v15 = vsub.f32 %v9537_v20, %v1535_v40  ;;  %v1418_v6 = vand.u32 4294901760, %v1417_v16 }
  0xa8   : > { %11376 = vst [vmem:[#allocation132_spill] sm:$0xff] %v9746_v34  ;;  %v11378_v48 = vand.u32 4294901760, %v11333_v36  ;;  %v2126_v20 = vand.u32 4294901760, %v264_v29  ;;  %v11380_v16 = vand.u32 4294901760, %v11337_v5  ;;  %v2129_v12 = vand.u32 4294901760, %v265_v51  ;;  %v266_v36 = vld [vmem:[%s10757_s1 + $0x230] sm:$0xff] }
  0xa9   : > { %11374 = vst [vmem:[#allocation130_spill] sm:$0xff] %v9740_v0  ;;  %7317 = vmatpush3.bf16.msra.mxu0 %v9722_v52  ;;  %v1537_v49 = vand.u32 4294901760, %v1536_v15  ;;  %v9770_v40 = vpack.c.bf16 %v1418_v6, %v1411_v10  ;;  %v9779_v15 = vsub.f32 %v261_v61, %v2117_v41  ;;  %v11382_v5 = vand.u32 4294901760, %v9738_v45 }
  0xaa   : > { %7097 = vmatpush3.bf16.msra.mxu1 %v11377_v1  ;;  %7319 = vmatprep.subr.bf16.mxu0 %v9734_v39  ;;  %v9792_v60 = vsub.f32 %v262_v58, %v2120_v46  ;;  %v9794_v41 = vsub.f32 %v263_v63, %v2123_v22  ;;  %v1425_v61 = vand.u32 4294901760, %v1424_v54  ;;  %v9797_v21 = vsub.f32 %v264_v29, %v2126_v20  ;;  %v269_v29 = vld [vmem:[%s10757_s1 + $0x248] sm:$0xff] }
  0xab   : > { %7131 = vmatprep.subr.bf16.mxu1 %v11331_v56  ;;  %11379 = vst [vmem:[#allocation43_spill] sm:$0xff] %v9770_v40  ;;  %v9781_v2 = vpack.c.bf16 %v1544_v47, %v1537_v49  ;;  %v2197_v28 = vsub.f32 %v9738_v45, %v11382_v5  ;;  %v9799_v30 = vsub.f32 %v265_v51, %v2129_v12  ;;  %v1432_v10 = vand.u32 4294901760, %v1431_v43 }
  0xac   : > { %v11383_v6 = vand.u32 4294901760, %v9106_v8  ;;  %v2132_v49 = vand.u32 4294901760, %v266_v36  ;;  %v9806_v46 = vpack.c.bf16 %v2129_v12, %v2126_v20  ;;  %v2135_v58 = vand.u32 4294901760, %v267_v13  ;;  %v268_v8 = vld [vmem:[%s10757_s1 + $0x240] sm:$0xff] }
  0xad   : > { %893 = vmatmul.mubr.f32.vlgmr.msra.gmra.mrb[12].mxu1 %v11378_v48  ;;  %7321 = vmatpush3.bf16.msra.mxu0 %v9744_v14  ;;  %11381 = vst [vmem:[#allocation133_spill] sm:$0xff] %v9781_v2  ;;  %v10978_v63 = vand.u32 4294901760, %v9768_v37  ;;  %v9809_v22 = vpack.c.bf16 %v1432_v10, %v1425_v61  ;;  %v2198_v51 = vand.u32 4294901760, %v2197_v28  ;;  %v10977_v12 = vand.u32 4294901760, %v9779_v15  ;;  %v270_v10 = vld [vmem:[%s10757_s1 + $0x250] sm:$0xff] }
  0xae   : > { %7133 = vmatpush3.bf16.msra.mxu1 %v11336_v57  ;;  %900 = vmatprep.mubr.f32.mxu1 %v11380_v16  ;;  %v10976_v47 = vand.u32 4294901760, %v9792_v60  ;;  %v10975_v48 = vand.u32 4294901760, %v9794_v41  ;;  %v10974_v20 = vand.u32 4294901760, %v9797_v21  ;;  %v10973_v54 = vand.u32 4294901760, %v9799_v30 }
  0xaf   : > { %7135 = vmatprep.subr.bf16.mxu1 %v11338_v26  ;;  %7355 = vmatprep.subr.bf16.mxu0 %v9757_v50  ;;  %11384 = vst [vmem:[#allocation134_spill] sm:$0xff] %v9809_v22  ;;  %v9825_v16 = vsub.f32 %v266_v36, %v2132_v49  ;;  %v9827_v43 = vsub.f32 %v267_v13, %v2135_v58  ;;  %v2138_v13 = vand.u32 4294901760, %v268_v8  ;;  %v2141_v28 = vand.u32 4294901760, %v269_v29 }
  0xb0   : > { %1990 = vmatmul.mubr.f32.vlgmr.msra.gmra.mrb[12].mxu0 %v9193_v11  ;;  %v9840_v5 = vpack.c.bf16 %v10975_v48, %v10976_v47  ;;  %v9844_v36 = vpack.c.bf16 %v2135_v58, %v2132_v49  ;;  %v9850_v61 = vpack.c.bf16 %v10973_v54, %v10974_v20  ;;  %v190_v54 = vld [vmem:[%s8632_s10 + $0x70] sm:$0xff] }
  0xb1   : > { %904 = vmatmul.mubr.f32.gmra.mrb[14].mxu1 %v11383_v6  ;;  %7357 = vmatpush3.bf16.msra.mxu0 %v9757_v50  ;;  %v271_v6 = vld [vmem:[%s10757_s1 + $0x258] sm:$0xff]  ;;  %v10981_v49 = vand.u32 4294901760, %v9825_v16  ;;  %v10980_v58 = vand.u32 4294901760, %v9827_v43  ;;  %v9864_v20 = vsub.f32 %v268_v8, %v2138_v13  ;;  %v9866_v48 = vsub.f32 %v269_v29, %v2141_v28  ;;  %v272_v8 = vld [vmem:[%s10757_s1 + $0x260] sm:$0xff]  ;;  %v273_v29 = vld [vmem:[%s10757_s1 + $0x268] sm:$0xff] }
  0xb2   : > { %7137 = vmatpush3.bf16.msra.mxu1 %v11342_v18  ;;  %7359 = vmatprep.subr.bf16.mxu0 %v9763_v9  ;;  %11386 = vst [vmem:[#allocation136_spill] sm:$0xff] %v9840_v5  ;;  %11387 = vst [vmem:[#allocation137_spill] sm:$0xff] %v9844_v36  ;;  %v9870_v47 = vpack.c.bf16 %v2141_v28, %v2138_v13  ;;  %v9885_v13 = vand.u32 4294901760, %v190_v54  ;;  %v2150_v52 = vand.u32 4294901760, %v272_v8  ;;  %v274_v28 = vld [vmem:[%s10757_s1 + $0x270] sm:$0xff] }
  0xb3   : > { %7139 = vmatprep.subr.bf16.mxu1 %v11344_v17  ;;  %1181 = vmatprep.mubr.f32.mxu1 %v8680_v27  ;;  %v9834_v27 = vpack.c.bf16 %v10977_v12, %v10978_v63  ;;  %11388 = vst [vmem:[#allocation138_spill] sm:$0xff] %v9850_v61  ;;  %v2144_v12 = vand.u32 4294901760, %v270_v10  ;;  %v2147_v63 = vand.u32 4294901760, %v271_v6  ;;  %v10990_v14 = vand.u32 4294901760, %v9866_v48 }
  0xb4   : > { %1995 = vmatprep.mubr.f32.mxu0 %v9384_v4  ;;  %11389 = vst [vmem:[#allocation139_spill] sm:$0xff] %v9870_v47 }
  0xb5   : > { %7361 = vmatpush3.bf16.msra.mxu0 %v9763_v9  ;;  %11385 = vst [vmem:[#allocation135_spill] sm:$0xff] %v9834_v27  ;;  %v9896_v39 = vpack.c.bf16 %v2147_v63, %v2144_v12 }
  0xb6   : > { %7141 = vmatpush3.bf16.msra.mxu1 %v11349_v33  ;;  %7363 = vmatprep.subr.bf16.mxu0 %v9806_v46 }
  0xb7   : > { %7143 = vmatprep.subr.bf16.mxu1 %v11351_v23  ;;  %1997 = vmatmul.mubr.f32.gmra.mrb[14].mxu0 %v9391_v32  ;;  %11391 = vst [vmem:[#allocation141_spill] sm:$0xff] %v9896_v39 }
  0xb8   : > { %6582 = vmatprep.mubr.f32.mxu0 %v2198_v51  ;;  %v9876_v51 = vpack.c.bf16 %v10980_v58, %v10981_v49  ;;  %v9890_v58 = vsub.f32 %v270_v10, %v2144_v12  ;;  %v9892_v49 = vsub.f32 %v271_v6, %v2147_v63  ;;  %v275_v10 = vld [vmem:[%s10757_s1 + $0x278] sm:$0xff]  ;;  %v11392_v6 = vand.u32 4294901760, %v9864_v20 }
  0xb9   : > { %7365 = vmatpush3.bf16.msra.mxu0 %v9806_v46  ;;  %v9912_v63 = vsub.f32 %v190_v54, %v9885_v13  ;;  %v11395_v54 = vand.u32 4294901760, %v9768_v37 }
  0xba   : > { %7145 = vmatpush3.bf16.msra.mxu1 %v11354_v38  ;;  %7367 = vmatprep.subr.bf16.mxu0 %v9844_v36  ;;  %11390 = vst [vmem:[#allocation140_spill] sm:$0xff] %v9876_v51  ;;  %v9917_v51 = vsub.f32 %v272_v8, %v2150_v52 }
  0xbb   : > { %7147 = vmatprep.subr.bf16.mxu1 %v11356_v44  ;;  %v2153_v44 = vand.u32 4294901760, %v273_v29  ;;  %v2218_v12 = vsub.f32 %v9768_v37, %v11395_v54 }
  0xbd   : > { %7369 = vmatpush3.bf16.msra.mxu0 %v9844_v36  ;;  %v9919_v38 = vsub.f32 %v273_v29, %v2153_v44  ;;  %v9923_v23 = vpack.c.bf16 %v2153_v44, %v2150_v52  ;;  %v11397_v29 = vand.u32 4294901760, %v9890_v58  ;;  %v2219_v44 = vand.u32 4294901760, %v2218_v12 }
  0xbe   : > { %7149 = vmatpush3.bf16.msra.mxu1 %v11359_v31  ;;  %7371 = vmatprep.subr.bf16.mxu0 %v9870_v47  ;;  %v9909_v31 = vpack.c.bf16 %v10990_v14, %v11392_v6  ;;  %v2156_v6 = vand.u32 4294901760, %v274_v28  ;;  %v2159_v14 = vand.u32 4294901760, %v275_v10 }
  0xbf   : > { %7151 = vmatprep.subr.bf16.mxu1 %v11362_v7  ;;  %11394 = vst [vmem:[#allocation143_spill] sm:$0xff] %v9923_v23  ;;  %v11396_v7 = vand.u32 4294901760, %v9779_v15 }
  0xc0   : > { %11393 = vst [vmem:[#allocation142_spill] sm:$0xff] %v9909_v31  ;;  %v9939_v52 = vsub.f32 %v274_v28, %v2156_v6  ;;  %v9941_v61 = vsub.f32 %v275_v10, %v2159_v14  ;;  %v11402_v28 = vand.u32 4294901760, %v9794_v41 }
  0xc1   : > { %7373 = vmatpush3.bf16.msra.mxu0 %v9870_v47  ;;  %v2225_v8 = vsub.f32 %v9779_v15, %v11396_v7  ;;  %v9948_v7 = vpack.c.bf16 %v2159_v14, %v2156_v6  ;;  %v11406_v14 = vand.u32 4294901760, %v9912_v63 }
  0xc2   : > { %7153 = vmatpush3.bf16.msra.mxu1 %v11365_v62  ;;  %7375 = vmatprep.subr.bf16.mxu0 %v9896_v39  ;;  %v11398_v62 = vand.u32 4294901760, %v9892_v49  ;;  %v2239_v10 = vsub.f32 %v9794_v41, %v11402_v28  ;;  %v2322_v33 = vand.u32 4294901760, %v9941_v61  ;;  %v11407_v28 = vand.u32 4294901760, %v9797_v21 }
  0xc3   : > { %7155 = vmatprep.subr.bf16.mxu1 %v11367_v19  ;;  %11400 = vst [vmem:[#allocation145_spill] sm:$0xff] %v9948_v7  ;;  %v2226_v54 = vand.u32 4294901760, %v2225_v8  ;;  %v11403_v19 = vand.u32 4294901760, %v9917_v51  ;;  %v2207_v6 = vsub.f32 %v9912_v63, %v11406_v14  ;;  %v11408_v8 = vand.u32 4294901760, %v9799_v30 }
  0xc4   : > { %v9936_v31 = vpack.c.bf16 %v11398_v62, %v11397_v29  ;;  %v11401_v62 = vand.u32 4294901760, %v9792_v60  ;;  %v2246_v12 = vsub.f32 %v9797_v21, %v11407_v28 }
  0xc5   : > { %7377 = vmatpush3.bf16.msra.mxu0 %v9896_v39  ;;  %v2208_v17 = vand.u32 4294901760, %v2207_v6 }
  0xc6   : > { %11399 = vst [vmem:[#allocation144_spill] sm:$0xff] %v9936_v31  ;;  %7157 = vmatpush3.bf16.msra.mxu1 %v11371_v3  ;;  %7379 = vmatprep.subr.bf16.mxu0 %v9923_v23  ;;  %v2232_v29 = vsub.f32 %v9792_v60, %v11401_v62  ;;  %v11404_v3 = vand.u32 4294901760, %v9919_v38  ;;  %v2315_v62 = vand.u32 4294901760, %v9939_v52  ;;  %v2247_v28 = vand.u32 4294901760, %v2246_v12 }
  0xc7   : > { %7159 = vmatprep.subr.bf16.mxu1 %v11373_v24  ;;  %v2253_v24 = vsub.f32 %v9799_v30, %v11408_v8 }
  0xc8   : > { %v9961_v31 = vpack.c.bf16 %v11404_v3, %v11403_v19  ;;  %v2233_v19 = vand.u32 4294901760, %v2232_v29  ;;  %v2240_v3 = vand.u32 4294901760, %v2239_v10  ;;  %v9977_v14 = vpack.c.bf16 %v2322_v33, %v2315_v62 }
  0xc9   : > { %7381 = vmatpush3.bf16.msra.mxu0 %v9923_v23  ;;  %v2254_v5 = vand.u32 4294901760, %v2253_v24  ;;  %v11412_v29 = vand.u32 4294901760, %v9825_v16  ;;  %v11416_v24 = vld [vmem:[#allocation112_spill] sm:$0xff] }
  0xca   : > { %11405 = vst [vmem:[#allocation146_spill] sm:$0xff] %v9961_v31  ;;  %7161 = vmatpush3.bf16.msra.mxu1 %v11377_v1  ;;  %7383 = vmatprep.subr.bf16.mxu0 %v9948_v7  ;;  %11409 = vst [vmem:[#allocation147_spill] sm:$0xff] %v9977_v14  ;;  %v9980_v31 = vpack.c.bf16 %v2226_v54, %v2219_v44  ;;  %v9986_v8 = vpack.c.bf16 %v2240_v3, %v2233_v19  ;;  %v11413_v44 = vand.u32 4294901760, %v9827_v43 }
  0xcb   : > { %7195 = vmatprep.subr.bf16.mxu1 %v9597_v35  ;;  %v2260_v10 = vsub.f32 %v9825_v16, %v11412_v29  ;;  %v11417_v19 = vand.u32 4294901760, %v9864_v20  ;;  %v11418_v29 = vand.u32 4294901760, %v9866_v48 }
  0xcc   : > { %11410 = vst [vmem:[#allocation148_spill] sm:$0xff] %v9980_v31  ;;  %11411 = vst [vmem:[#allocation149_spill] sm:$0xff] %v9986_v8  ;;  %v2267_v54 = vsub.f32 %v9827_v43, %v11413_v44  ;;  %v11419_v44 = vld [vmem:[#allocation115_spill] sm:$0xff] }
  0xcd   : > { %1183 = vmatmul.mubr.f32.vlgmr.msra.gmra.mrb[16].mxu1 %v11260_v59  ;;  %7385 = vmatpush3.bf16.msra.mxu0 %v9948_v7  ;;  %v11414_v59 = vld [vmem:[#allocation84_spill] sm:$0xff]  ;;  %v2261_v6 = vand.u32 4294901760, %v2260_v10  ;;  %v2274_v3 = vsub.f32 %v9864_v20, %v11417_v19  ;;  %v11422_v10 = vand.u32 4294901760, %v9892_v49  ;;  %v11423_v19 = vld [vmem:[#allocation117_spill] sm:$0xff] }
  0xce   : > { %7197 = vmatpush3.bf16.msra.mxu1 %v9608_v55  ;;  %1188 = vmatprep.mubr.f32.mxu1 %v9068_v25  ;;  %v9998_v25 = vpack.c.bf16 %v2254_v5, %v2247_v28  ;;  %v2268_v12 = vand.u32 4294901760, %v2267_v54  ;;  %v11421_v5 = vand.u32 4294901760, %v9890_v58 }
  0xcf   : > { %7199 = vmatprep.subr.bf16.mxu1 %v9614_v42  ;;  %7387 = vmatprep.subr.bf16.mxu0 %v9980_v31  ;;  %v2295_v54 = vsub.f32 %v9892_v49, %v11422_v10  ;;  %v11425_v42 = vld [vmem:[#allocation119_spill] sm:$0xff]  ;;  %v11428_v10 = vand.u32 4294901760, %v9917_v51 }
  0xd0   : > { %6583 = vmatmul.mubr.f32.vlgmr.msra.gmra.mrb[16].mxu0 %v2208_v17  ;;  %11415 = vst [vmem:[#allocation84_spill] sm:$0xff] %v9998_v25  ;;  %v2281_v17 = vsub.f32 %v9866_v48, %v11418_v29  ;;  %v2288_v28 = vsub.f32 %v9890_v58, %v11421_v5  ;;  %v10020_v29 = vpack.c.bf16 %v2268_v12, %v2261_v6  ;;  %v11429_v6 = vand.u32 4294901760, %v9919_v38 }
  0xd1   : > { %1190 = vmatmul.mubr.f32.gmra.mrb[18].mxu1 %v11414_v59  ;;  %7389 = vmatpush3.bf16.msra.mxu0 %v9980_v31  ;;  %v11420_v59 = vld [vmem:[#allocation96_spill] sm:$0xff]  ;;  %v2296_v35 = vand.u32 4294901760, %v2295_v54  ;;  %v2316_v54 = vsub.f32 %v9939_v52, %v2315_v62  ;;  %v11436_v62 = vld [vmem:[#allocation58_spill] sm:$0xff] }
  0xd2   : > { %7201 = vmatpush3.bf16.msra.mxu1 %v11416_v24  ;;  %7391 = vmatprep.subr.bf16.mxu0 %v9986_v8  ;;  %11424 = vst [vmem:[#allocation96_spill] sm:$0xff] %v10020_v29  ;;  %v2282_v24 = vand.u32 4294901760, %v2281_v17  ;;  %v2289_v55 = vand.u32 4294901760, %v2288_v28  ;;  %v2309_v12 = vsub.f32 %v9919_v38, %v11429_v6  ;;  %v11432_v28 = vld [vmem:[#allocation126_spill] sm:$0xff] }
  0xd3   : > { %7203 = vmatprep.subr.bf16.mxu1 %v11419_v44  ;;  %1547 = vmatprep.mubr.f32.mxu1 %v11420_v59  ;;  %v2275_v44 = vand.u32 4294901760, %v2274_v3  ;;  %v11430_v3 = vld [vmem:[#allocation124_spill] sm:$0xff] }
  0xd4   : > { %6617 = vmatprep.mubr.f32.mxu0 %v9708_v53  ;;  %v10036_v17 = vpack.c.bf16 %v2296_v35, %v2289_v55  ;;  %v2317_v55 = vand.u32 4294901760, %v2316_v54 }
  0xd5   : > { %7393 = vmatpush3.bf16.msra.mxu0 %v9986_v8  ;;  %v11426_v8 = vld [vmem:[#allocation122_spill] sm:$0xff]  ;;  %v10026_v5 = vpack.c.bf16 %v2282_v24, %v2275_v44  ;;  %v2310_v44 = vand.u32 4294901760, %v2309_v12  ;;  %v11438_v12 = vld [vmem:[#allocation63_spill] sm:$0xff] }
  0xd6   : > { %7205 = vmatpush3.bf16.msra.mxu1 %v11423_v19  ;;  %7395 = vmatprep.subr.bf16.mxu0 %v9998_v25  ;;  %v2302_v19 = vsub.f32 %v9917_v51, %v11428_v10  ;;  %11431 = vst [vmem:[#allocation151_spill] sm:$0xff] %v10036_v17  ;;  %v2323_v10 = vsub.f32 %v9941_v61, %v2322_v33 }
  0xd7   : > { %7207 = vmatprep.subr.bf16.mxu1 %v11425_v42  ;;  %11427 = vst [vmem:[#allocation150_spill] sm:$0xff] %v10026_v5  ;;  %v11478_v42 = vld [vmem:[#allocation22_spill] sm:$0xff] }
  0xd8   : > { %v2303_v24 = vand.u32 4294901760, %v2302_v19  ;;  %v2324_v6 = vand.u32 4294901760, %v2323_v10  ;;  %v10061_v19 = vpack.c.bf16 %v9779_v15, %v9768_v37  ;;  %v11441_v37 = vld [vmem:[#allocation68_spill] sm:$0xff]  ;;  %v10080_v15 = vpack.c.bf16 %v9799_v30, %v9797_v21 }
  0xd9   : > { %7397 = vmatpush3.bf16.msra.mxu0 %v9998_v25  ;;  %v11446_v10 = vld [vmem:[#allocation76_spill] sm:$0xff]  ;;  %v10099_v30 = vpack.c.bf16 %v9866_v48, %v9864_v20  ;;  %v10115_v48 = vpack.c.bf16 %v9919_v38, %v9917_v51  ;;  %v11457_v20 = vld [vmem:[#allocation93_spill] sm:$0xff] }
  0xda   : > { %7209 = vmatpush3.bf16.msra.mxu1 %v11426_v8  ;;  %7399 = vmatprep.subr.bf16.mxu0 %v10020_v29  ;;  %v11433_v8 = vld [vmem:[#allocation127_spill] sm:$0xff]  ;;  %v10046_v35 = vpack.c.bf16 %v2310_v44, %v2303_v24  ;;  %v10052_v33 = vpack.c.bf16 %v2324_v6, %v2317_v55  ;;  %11437 = vst [vmem:[#allocation58_spill] sm:$0xff] %v10061_v19  ;;  %v11440_v44 = vld [vmem:[#allocation64_spill] sm:$0xff]  ;;  %v11448_v6 = vld [vmem:[#allocation77_spill] sm:$0xff] }
  0xdb   : > { %7211 = vmatprep.subr.bf16.mxu1 %v11430_v3  ;;  %v10069_v24 = vpack.c.bf16 %v9794_v41, %v9792_v60  ;;  %11442 = vst [vmem:[#allocation64_spill] sm:$0xff] %v10080_v15  ;;  %v11443_v60 = vld [vmem:[#allocation70_spill] sm:$0xff]  ;;  %v11444_v41 = vld [vmem:[#allocation99_spill] sm:$0xff]  ;;  %v10091_v55 = vpack.c.bf16 %v9827_v43, %v9825_v16  ;;  %v11449_v21 = vld [vmem:[#allocation80_spill] sm:$0xff]  ;;  %v10107_v16 = vpack.c.bf16 %v9892_v49, %v9890_v58 }
  0xdc   : > { %11434 = vst [vmem:[#allocation152_spill] sm:$0xff] %v10046_v35  ;;  %11435 = vst [vmem:[#allocation153_spill] sm:$0xff] %v10052_v33  ;;  %v11445_v54 = vand.u32 4294901760, %v11444_v41  ;;  %v11451_v41 = vld [vmem:[#allocation82_spill] sm:$0xff]  ;;  %v11454_v43 = vld [vmem:[#allocation87_spill] sm:$0xff]  ;;  %v10123_v49 = vpack.c.bf16 %v9941_v61, %v9939_v52 }
  0xdd   : > { %7401 = vmatpush3.bf16.msra.mxu0 %v10020_v29  ;;  %11439 = vst [vmem:[#allocation63_spill] sm:$0xff] %v10069_v24  ;;  %11447 = vst [vmem:[#allocation68_spill] sm:$0xff] %v10091_v55  ;;  %v11460_v58 = vld [vmem:[#allocation103_spill] sm:$0xff]  ;;  %v11462_v38 = vld [vmem:[#allocation100_spill] sm:$0xff] }
  0xde   : > { %7213 = vmatpush3.bf16.msra.mxu1 %v11432_v28  ;;  %7403 = vmatprep.subr.bf16.mxu0 %v10026_v5  ;;  %11450 = vst [vmem:[#allocation70_spill] sm:$0xff] %v10099_v30  ;;  %11453 = vst [vmem:[#allocation99_spill] sm:$0xff] %v10107_v16  ;;  %v11463_v51 = vand.u32 4294901760, %v11462_v38  ;;  %v11466_v52 = vld [vmem:[#allocation71_spill] sm:$0xff]  ;;  %v11483_v29 = vld [vmem:[#allocation33_spill] sm:$0xff] }
  0xdf   : > { %7215 = vmatprep.subr.bf16.mxu1 %v11433_v8  ;;  %11456 = vst [vmem:[#allocation76_spill] sm:$0xff] %v10115_v48  ;;  %11459 = vst [vmem:[#allocation77_spill] sm:$0xff] %v10123_v49  ;;  %v11476_v8 = vld [vmem:[#allocation140_spill] sm:$0xff] }
  0xe1   : > { %7405 = vmatpush3.bf16.msra.mxu0 %v10026_v5 }
  0xe2   : > { %7217 = vmatpush3.bf16.msra.mxu1 %v9740_v0  ;;  %7407 = vmatprep.subr.bf16.mxu0 %v10036_v17 }
  0xe3   : > { %7219 = vmatprep.subr.bf16.mxu1 %v9746_v34  ;;  %v11464_v34 = vld [vmem:[#allocation69_spill] sm:$0xff] }
  0xe4   : > { %v11465_v61 = vand.u32 4294901760, %v11464_v34  ;;  %v11468_v34 = vand.u32 4294901760, %v9738_v45 }
  0xe5   : > { %7409 = vmatpush3.bf16.msra.mxu0 %v10036_v17  ;;  %v11482_v17 = vld [vmem:[#allocation144_spill] sm:$0xff] }
  0xe6   : > { %7221 = vmatpush3.bf16.msra.mxu1 %v9770_v40  ;;  %7411 = vmatprep.subr.bf16.mxu0 %v10046_v35  ;;  %v11461_v40 = vld [vmem:[#allocation105_spill] sm:$0xff] }
  0xe7   : > { %7223 = vmatprep.subr.bf16.mxu1 %v9781_v2  ;;  %v11458_v2 = vld [vmem:[#allocation98_spill] sm:$0xff] }
  0xe9   : > { %7413 = vmatpush3.bf16.msra.mxu0 %v10046_v35 }
  0xea   : > { %7225 = vmatpush3.bf16.msra.mxu1 %v9809_v22  ;;  %7415 = vmatprep.subr.bf16.mxu0 %v10052_v33  ;;  %v11455_v22 = vld [vmem:[#allocation91_spill] sm:$0xff] }
  0xeb   : > { %7259 = vmatprep.subr.bf16.mxu1 %v11436_v62 }
  0xed   : > { %1549 = vmatmul.mubr.f32.vlgmr.msra.gmra.mrb[20].mxu1 %v9193_v11  ;;  %7417 = vmatpush3.bf16.msra.mxu0 %v10052_v33 }
  0xee   : > { %7261 = vmatpush3.bf16.msra.mxu1 %v11438_v12  ;;  %1554 = vmatprep.mubr.f32.mxu1 %v9384_v4 }
  0xef   : > { %7263 = vmatprep.subr.bf16.mxu1 %v11440_v44  ;;  %7419 = vmatprep.subr.bf16.mxu0 %v10061_v19 }
  0xf0   : > { %6618 = vmatmul.mubr.f32.vlgmr.msra.gmra.mrb[16].mxu0 %v9885_v13 }
  0xf1   : > { %1556 = vmatmul.mubr.f32.gmra.mrb[22].mxu1 %v9391_v32  ;;  %7421 = vmatpush3.bf16.msra.mxu0 %v10061_v19 }
  0xf2   : > { %7265 = vmatpush3.bf16.msra.mxu1 %v11441_v37  ;;  %7423 = vmatprep.subr.bf16.mxu0 %v10069_v24 }
  0xf3   : > { %7267 = vmatprep.subr.bf16.mxu1 %v11443_v60  ;;  %1807 = vmatprep.mubr.f32.mxu1 %v11445_v54  ;;  %v11452_v54 = vld [vmem:[#allocation86_spill] sm:$0xff] }
  0xf4   : > { %6652 = vmatprep.mubr.f32.mxu0 %v9738_v45 }
  0xf5   : > { %7425 = vmatpush3.bf16.msra.mxu0 %v10069_v24  ;;  %v11480_v24 = vld [vmem:[#allocation26_spill] sm:$0xff] }
  0xf6   : > { %7269 = vmatpush3.bf16.msra.mxu1 %v11446_v10  ;;  %7427 = vmatprep.subr.bf16.mxu0 %v10080_v15 }
  0xf7   : > { %7271 = vmatprep.subr.bf16.mxu1 %v11448_v6 }
  0xf9   : > { %7429 = vmatpush3.bf16.msra.mxu0 %v10080_v15  ;;  %v11479_v15 = vld [vmem:[#allocation142_spill] sm:$0xff] }
  0xfa   : > { %7273 = vmatpush3.bf16.msra.mxu1 %v11449_v21  ;;  %7431 = vmatprep.subr.bf16.mxu0 %v10091_v55 }
  0xfb   : > { %7275 = vmatprep.subr.bf16.mxu1 %v11451_v41 }
  0xfd   : > { %7433 = vmatpush3.bf16.msra.mxu0 %v10091_v55 }
  0xfe   : > { %7277 = vmatpush3.bf16.msra.mxu1 %v11452_v54  ;;  %7435 = vmatprep.subr.bf16.mxu0 %v10099_v30 }
  0xff   : > { %7279 = vmatprep.subr.bf16.mxu1 %v11454_v43 }
 0x101   : > { %7437 = vmatpush3.bf16.msra.mxu0 %v10099_v30 }
 0x102   : > { %7281 = vmatpush3.bf16.msra.mxu1 %v11455_v22  ;;  %7439 = vmatprep.subr.bf16.mxu0 %v10107_v16 }
 0x103   : > { %7283 = vmatprep.subr.bf16.mxu1 %v11457_v20 }
 0x105   : > { %7441 = vmatpush3.bf16.msra.mxu0 %v10107_v16  ;;  %v192_v16 = vld [vmem:[%s8632_s10 + $0x80] sm:$0xff] }
 0x106   : > { %7285 = vmatpush3.bf16.msra.mxu1 %v11458_v2  ;;  %7443 = vmatprep.subr.bf16.mxu0 %v10115_v48  ;;  %v10215_v28 = vand.u32 4294901760, %v192_v16 }
 0x107   : > { %7287 = vmatprep.subr.bf16.mxu1 %v11460_v58 }
 0x108   : > { %v10227_v19 = vsub.f32 %v192_v16, %v10215_v28  ;;  %v11486_v16 = vld [vmem:[#allocation40_spill] sm:$0xff] }
 0x109   : > { %7445 = vmatpush3.bf16.msra.mxu0 %v10115_v48  ;;  %v11467_v48 = vand.u32 4294901760, %v11466_v52 }
 0x10a   : > { %7289 = vmatpush3.bf16.msra.mxu1 %v11461_v40  ;;  %7447 = vmatprep.subr.bf16.mxu0 %v10123_v49 }
 0x10b   : > { %7323 = vmatprep.subr.bf16.mxu1 %v11436_v62 }
 0x10d   : > { %1811 = vmatmul.mubr.f32.vlgmr.msra.gmra.mrb[24].mxu1 %v11463_v51  ;;  %7449 = vmatpush3.bf16.msra.mxu0 %v10123_v49 }
 0x10e   : > { %7325 = vmatpush3.bf16.msra.mxu1 %v11438_v12  ;;  %1818 = vmatprep.mubr.f32.mxu1 %v11465_v61 }
 0x10f   : > { %7327 = vmatprep.subr.bf16.mxu1 %v11440_v44  ;;  %7451 = vmatprep.subr.bf16.mxu0 %v9757_v50 }
 0x110   : > { %6653 = vmatmul.mubr.f32.vlgmr.msra.gmra.mrb[16].mxu0 %v9912_v63 }
 0x111   : > { %1822 = vmatmul.mubr.f32.gmra.mrb[26].mxu1 %v11467_v48  ;;  %7453 = vmatpush3.bf16.msra.mxu0 %v9757_v50 }
 0x112   : > { %7329 = vmatpush3.bf16.msra.mxu1 %v11441_v37  ;;  %7455 = vmatprep.subr.bf16.mxu0 %v9763_v9 }
 0x113   : > { %7331 = vmatprep.subr.bf16.mxu1 %v11443_v60  ;;  %2099 = vmatprep.mubr.f32.mxu1 %v11420_v59  ;;  %v182_v59 = vld [vmem:[%s8632_s10 + $0x30] sm:$0xff] }
 0x114   : > { %6687 = vmatprep.mubr.f32.mxu0 %v11468_v34  ;;  %v10161_v45 = vand.u32 4294901760, %v182_v59 }
 0x115   : > { %7457 = vmatpush3.bf16.msra.mxu0 %v9763_v9 }
 0x116   : > { %7333 = vmatpush3.bf16.msra.mxu1 %v11446_v10  ;;  %7459 = vmatprep.subr.bf16.mxu0 %v9806_v46  ;;  %v10170_v52 = vsub.f32 %v182_v59, %v10161_v45 }
 0x117   : > { %7335 = vmatprep.subr.bf16.mxu1 %v11448_v6  ;;  %v5454_v48 = vpop.f32.mrb[0].mxu1 }
 0x118   : > { %v5455_v38 = vpop.f32.mrb[1].mxu1 }
 0x119   : > { %7461 = vmatpush3.bf16.msra.mxu0 %v9806_v46  ;;  %v10165_v51 = vadd.f32 %v5455_v38, %v5454_v48  ;;  %v11015_v48 = vand.u32 4294901760, %v10170_v52 }
 0x11a   : > { %7337 = vmatpush3.bf16.msra.mxu1 %v11449_v21  ;;  %7463 = vmatprep.subr.bf16.mxu0 %v9844_v36 }
 0x11b   : > { %7339 = vmatprep.subr.bf16.mxu1 %v11451_v41  ;;  %v5606_v61 = vpop.f32.mrb[0].mxu0  ;;  %v2896_v59 = vsub.f32 %v10170_v52, %v11015_v48 }
 0x11c   : > { %v5607_v34 = vpop.f32.mrb[1].mxu0 }
 0x11d   : > { %7465 = vmatpush3.bf16.msra.mxu0 %v9844_v36  ;;  %v10172_v49 = vadd.f32 %v5607_v34, %v5606_v61  ;;  %v2897_v38 = vand.u32 4294901760, %v2896_v59  ;;  %v11469_v61 = vand.u32 4294901760, %v9912_v63  ;;  %v11471_v34 = vld [vmem:[#allocation11_spill] sm:$0xff]  ;;  %v11472_v59 = vld [vmem:[#allocation13_spill] sm:$0xff] }
 0x11e   : > { %7341 = vmatpush3.bf16.msra.mxu1 %v11452_v54  ;;  %7467 = vmatprep.subr.bf16.mxu0 %v9870_v47 }
 0x11f   : > { %7343 = vmatprep.subr.bf16.mxu1 %v11454_v43 }
 0x121   : > { %7469 = vmatpush3.bf16.msra.mxu0 %v9870_v47 }
 0x122   : > { %7345 = vmatpush3.bf16.msra.mxu1 %v11455_v22  ;;  %7471 = vmatprep.subr.bf16.mxu0 %v9896_v39 }
 0x123   : > { %7347 = vmatprep.subr.bf16.mxu1 %v11457_v20 }
 0x125   : > { %7473 = vmatpush3.bf16.msra.mxu0 %v9896_v39 }
 0x126   : > { %7349 = vmatpush3.bf16.msra.mxu1 %v11458_v2  ;;  %7475 = vmatprep.subr.bf16.mxu0 %v9923_v23 }
 0x127   : > { %7351 = vmatprep.subr.bf16.mxu1 %v11460_v58 }
 0x129   : > { %7477 = vmatpush3.bf16.msra.mxu0 %v9923_v23 }
 0x12a   : > { %7353 = vmatpush3.bf16.msra.mxu1 %v11461_v40  ;;  %7479 = vmatprep.subr.bf16.mxu0 %v9948_v7 }
 0x12b   : > { %7547 = vmatprep.subr.bf16.mxu1 %v11331_v56 }
 0x12d   : > { %2101 = vmatmul.mubr.f32.vlgmr.msra.gmra.mrb[28].mxu1 %v9193_v11  ;;  %7481 = vmatpush3.bf16.msra.mxu0 %v9948_v7  ;;  %v11470_v11 = vld [vmem:[#allocation136_spill] sm:$0xff] }
 0x12e   : > { %7549 = vmatpush3.bf16.msra.mxu1 %v11336_v57  ;;  %2106 = vmatprep.mubr.f32.mxu1 %v9384_v4  ;;  %v5609_v4 = vpop.f32.mrb[2].mxu0 }
 0x12f   : > { %7483 = vmatprep.subr.bf16.mxu0 %v9834_v27  ;;  %7551 = vmatprep.subr.bf16.mxu1 %v11338_v26  ;;  %v5610_v48 = vpop.f32.mrb[3].mxu0 }
 0x130   : > { %6688 = vmatmul.mubr.f32.vlgmr.msra.gmra.mrb[16].mxu0 %v11469_v61  ;;  %v10201_v63 = vadd.f32 %v5610_v48, %v5609_v4  ;;  %v181_v61 = vld [vmem:[%s8632_s10 + $0x28] sm:$0xff] }
 0x131   : > { %2108 = vmatmul.mubr.f32.gmra.mrb[30].mxu1 %v9391_v32  ;;  %7485 = vmatpush3.bf16.msra.mxu0 %v9834_v27  ;;  %v11473_v32 = vld [vmem:[#allocation138_spill] sm:$0xff]  ;;  %v11474_v27 = vld [vmem:[#allocation15_spill] sm:$0xff]  ;;  %v10209_v0 = vand.u32 4294901760, %v181_v61 }
 0x132   : > { %7553 = vmatpush3.bf16.msra.mxu1 %v11342_v18  ;;  %7487 = vmatprep.subr.bf16.mxu0 %v11470_v11  ;;  %v11477_v48 = vld [vmem:[#allocation19_spill] sm:$0xff] }
 0x133   : > { %7555 = vmatprep.subr.bf16.mxu1 %v11471_v34  ;;  %2898 = vmatprep.mubr.f32.mxu1 %v2897_v38  ;;  %v11475_v38 = vld [vmem:[#allocation17_spill] sm:$0xff]  ;;  %v10219_v55 = vsub.f32 %v181_v61, %v10209_v0 }
 0x134   : > { %6722 = vmatprep.mubr.f32.mxu0 %v9708_v53 }
 0x135   : > { %7489 = vmatpush3.bf16.msra.mxu0 %v11470_v11  ;;  %v191_v11 = vld [vmem:[%s8632_s10 + $0x78] sm:$0xff] }
 0x136   : > { %7557 = vmatpush3.bf16.msra.mxu1 %v11472_v59  ;;  %7491 = vmatprep.subr.bf16.mxu0 %v11473_v32 }
 0x137   : > { %7559 = vmatprep.subr.bf16.mxu1 %v11474_v27 }
 0x139   : > { %7493 = vmatpush3.bf16.msra.mxu0 %v11473_v32  ;;  %v10221_v32 = vand.u32 4294901760, %v191_v11 }
 0x13a   : > { %7561 = vmatpush3.bf16.msra.mxu1 %v11475_v38  ;;  %7495 = vmatprep.subr.bf16.mxu0 %v11476_v8 }
 0x13b   : > { %v5457_v30 = vpop.f32.mrb[2].mxu1  ;;  %7563 = vmatprep.subr.bf16.mxu1 %v11477_v48  ;;  %v10232_v61 = vsub.f32 %v191_v11, %v10221_v32 }
 0x13c   : > { %v5458_v4 = vpop.f32.mrb[3].mxu1 }
 0x13d   : > { %v5459_v3 = vadd.f32 %v5458_v4, %v5457_v30  ;;  %7497 = vmatpush3.bf16.msra.mxu0 %v11476_v8  ;;  %v11049_v30 = vand.u32 4294901760, %v10219_v55  ;;  %v11481_v8 = vld [vmem:[#allocation29_spill] sm:$0xff] }
 0x13e   : > { %7565 = vmatpush3.bf16.msra.mxu1 %v11478_v42  ;;  %7499 = vmatprep.subr.bf16.mxu0 %v11479_v15 }
 0x13f   : > { %7567 = vmatprep.subr.bf16.mxu1 %v11480_v24  ;;  %v5492_v33 = vpop.f32.mrb[4].mxu1 }
 0x140   : > { %v5493_v35 = vpop.f32.mrb[5].mxu1 }
 0x141   : > { %7501 = vmatpush3.bf16.msra.mxu0 %v11479_v15  ;;  %v5494_v4 = vadd.f32 %v5493_v35, %v5492_v33  ;;  %v2902_v35 = vsub.f32 %v10219_v55, %v11049_v30  ;;  %v11051_v33 = vand.u32 4294901760, %v10232_v61 }
 0x142   : > { %7569 = vmatpush3.bf16.msra.mxu1 %v11481_v8  ;;  %7503 = vmatprep.subr.bf16.mxu0 %v11482_v17  ;;  %v11484_v8 = vld [vmem:[#allocation35_spill] sm:$0xff] }
 0x143   : > { %v5682_v5 = vpop.f32.mrb[4].mxu0  ;;  %7571 = vmatprep.subr.bf16.mxu1 %v11483_v29  ;;  %v633_v25 = vadd.f32 %v5494_v4, %v10165_v51  ;;  %v11485_v29 = vld [vmem:[#allocation146_spill] sm:$0xff]  ;;  %v11487_v51 = vand.u32 4294901760, %v10227_v19  ;;  %v2903_v4 = vand.u32 4294901760, %v2902_v35  ;;  %v2917_v30 = vsub.f32 %v10232_v61, %v11051_v33 }
 0x144   : > { %v5495_v31 = vpop.f32.mrb[6].mxu1  ;;  %v5683_v24 = vpop.f32.mrb[5].mxu0  ;;  %v11491_v35 = vld [vmem:[#allocation62_spill] sm:$0xff] }
 0x145   : > { %v5496_v15 = vpop.f32.mrb[7].mxu1  ;;  %v10239_v42 = vadd.f32 %v5683_v24, %v5682_v5  ;;  %7505 = vmatpush3.bf16.msra.mxu0 %v11482_v17  ;;  %v2911_v5 = vsub.f32 %v10227_v19, %v11487_v51  ;;  %v2918_v17 = vand.u32 4294901760, %v2917_v30  ;;  %v11489_v51 = vld [vmem:[#allocation56_spill] sm:$0xff] }
 0x146   : > { %v5497_v11 = vadd.f32 %v5496_v15, %v5495_v31  ;;  %7573 = vmatpush3.bf16.msra.mxu1 %v11484_v8  ;;  %7507 = vmatprep.subr.bf16.mxu0 %v11485_v29  ;;  %v11488_v31 = vld [vmem:[#allocation51_spill] sm:$0xff] }
 0x147   : > { %7575 = vmatprep.subr.bf16.mxu1 %v11486_v16  ;;  %v2912_v15 = vand.u32 4294901760, %v2911_v5 }
 0x148   : > { %v640_v24 = vadd.f32 %v5497_v11, %v5459_v3  ;;  %v11490_v3 = vld [vmem:[#allocation59_spill] sm:$0xff]  ;;  %v11492_v11 = vld [vmem:[#allocation66_spill] sm:$0xff] }
 0x149   : > { %7509 = vmatpush3.bf16.msra.mxu0 %v11485_v29 }
 0x14a   : > { %7577 = vmatpush3.bf16.msra.mxu1 %v11377_v1  ;;  %7511 = vmatprep.subr.bf16.mxu0 %v9977_v14 }
 0x14b   : > { %7579 = vmatprep.subr.bf16.mxu1 %v11488_v31  ;;  %v11493_v31 = vld [vmem:[#allocation67_spill] sm:$0xff] }
 0x14d   : > { %7513 = vmatpush3.bf16.msra.mxu0 %v9977_v14  ;;  %2904 = vmatmul.mubr.f32.vlgmr.msra.gmra.mrb[32].mxu1 %v2903_v4 }
 0x14e   : > { %7581 = vmatpush3.bf16.msra.mxu1 %v11489_v51  ;;  %7515 = vmatprep.subr.bf16.mxu0 %v9757_v50  ;;  %v11496_v51 = vld [vmem:[#allocation78_spill] sm:$0xff] }
 0x14f   : > { %7583 = vmatprep.subr.bf16.mxu1 %v11490_v3  ;;  %2913 = vmatprep.mubr.f32.mxu1 %v2912_v15  ;;  %v11495_v15 = vld [vmem:[#allocation75_spill] sm:$0xff] }
 0x150   : > { %6723 = vmatmul.mubr.f32.vlgmr.msra.gmra.mrb[16].mxu0 %v9885_v13  ;;  %v11497_v3 = vld [vmem:[#allocation79_spill] sm:$0xff] }
 0x151   : > { %7517 = vmatpush3.bf16.msra.mxu0 %v9757_v50  ;;  %2919 = vmatmul.mubr.f32.gmra.mrb[34].mxu1 %v2918_v17  ;;  %v11494_v17 = vld [vmem:[#allocation74_spill] sm:$0xff] }
 0x152   : > { %7585 = vmatpush3.bf16.msra.mxu1 %v11491_v35  ;;  %7519 = vmatprep.subr.bf16.mxu0 %v9763_v9  ;;  %v11498_v35 = vld [vmem:[#allocation81_spill] sm:$0xff] }
 0x153   : > { %7587 = vmatprep.subr.bf16.mxu1 %v11492_v11  ;;  %3149 = vmatprep.mubr.f32.mxu1 %v10161_v45 }
 0x154   : > { %6757 = vmatprep.mubr.f32.mxu0 %v9708_v53  ;;  %v184_v53 = vld [vmem:[%s8632_s10 + $0x40] sm:$0xff] }
 0x155   : > { %7521 = vmatpush3.bf16.msra.mxu0 %v9763_v9 }
 0x156   : > { %v5685_v30 = vpop.f32.mrb[6].mxu0  ;;  %7589 = vmatpush3.bf16.msra.mxu1 %v11493_v31  ;;  %7523 = vmatprep.subr.bf16.mxu0 %v9806_v46 }
 0x157   : > { %v5686_v5 = vpop.f32.mrb[7].mxu0  ;;  %7591 = vmatprep.subr.bf16.mxu1 %v11494_v17  ;;  %v11499_v17 = vld [vmem:[#allocation85_spill] sm:$0xff] }
 0x158   : > { %v10271_v4 = vadd.f32 %v5686_v5, %v5685_v30  ;;  %v10285_v30 = vand.u32 4294901760, %v184_v53 }
 0x159   : > { %7525 = vmatpush3.bf16.msra.mxu0 %v9806_v46 }
 0x15a   : > { %7593 = vmatpush3.bf16.msra.mxu1 %v11495_v15  ;;  %7527 = vmatprep.subr.bf16.mxu0 %v9844_v36 }
 0x15b   : > { %7595 = vmatprep.subr.bf16.mxu1 %v11496_v51  ;;  %v11500_v51 = vld [vmem:[#allocation89_spill] sm:$0xff] }
 0x15d   : > { %7529 = vmatpush3.bf16.msra.mxu0 %v9844_v36 }
 0x15e   : > { %7597 = vmatpush3.bf16.msra.mxu1 %v11497_v3  ;;  %7531 = vmatprep.subr.bf16.mxu0 %v9870_v47 }
 0x15f   : > { %7599 = vmatprep.subr.bf16.mxu1 %v11498_v35  ;;  %v10294_v35 = vsub.f32 %v184_v53, %v10285_v30  ;;  %v11503_v53 = vld [vmem:[#allocation102_spill] sm:$0xff] }
 0x160   : > { %v5530_v11 = vpop.f32.mrb[8].mxu1 }
 0x161   : > { %v5531_v5 = vpop.f32.mrb[9].mxu1  ;;  %7533 = vmatpush3.bf16.msra.mxu0 %v9870_v47 }
 0x162   : > { %v5532_v31 = vadd.f32 %v5531_v5, %v5530_v11  ;;  %7601 = vmatpush3.bf16.msra.mxu1 %v11499_v17  ;;  %7535 = vmatprep.subr.bf16.mxu0 %v9896_v39  ;;  %v11501_v5 = vld [vmem:[#allocation90_spill] sm:$0xff]  ;;  %v11502_v17 = vld [vmem:[#allocation95_spill] sm:$0xff] }
 0x163   : > { %v5758_v15 = vpop.f32.mrb[8].mxu0  ;;  %7603 = vmatprep.subr.bf16.mxu1 %v11500_v51 }
 0x164   : > { %v10291_v33 = vadd.f32 %v5532_v31, %v633_v25  ;;  %v5533_v3 = vpop.f32.mrb[10].mxu1  ;;  %v5759_v14 = vpop.f32.mrb[9].mxu0  ;;  %v11057_v25 = vand.u32 4294901760, %v10294_v35  ;;  %v11504_v31 = vld [vmem:[#allocation92_spill] sm:$0xff] }
 0x165   : > { %v5534_v29 = vpop.f32.mrb[11].mxu1  ;;  %v10296_v36 = vadd.f32 %v5759_v14, %v5758_v15  ;;  %7537 = vmatpush3.bf16.msra.mxu0 %v9896_v39 }
 0x166   : > { %v5535_v11 = vadd.f32 %v5534_v29, %v5533_v3  ;;  %7605 = vmatpush3.bf16.msra.mxu1 %v11501_v5  ;;  %7539 = vmatprep.subr.bf16.mxu0 %v9923_v23  ;;  %v3814_v3 = vsub.f32 %v10294_v35, %v11057_v25 }
 0x167   : > { %7607 = vmatprep.subr.bf16.mxu1 %v11502_v17  ;;  %v11507_v17 = vld [vmem:[#allocation101_spill] sm:$0xff] }
 0x168   : > { %v10302_v51 = vadd.f32 %v5535_v11, %v640_v24  ;;  %v11505_v24 = vld [vmem:[#allocation94_spill] sm:$0xff]  ;;  %v11506_v11 = vld [vmem:[#allocation97_spill] sm:$0xff]  ;;  %v3815_v5 = vand.u32 4294901760, %v3814_v3  ;;  %v11512_v3 = vld [vmem:[#allocation24_spill] sm:$0xff] }
 0x169   : > { %7541 = vmatpush3.bf16.msra.mxu0 %v9923_v23  ;;  %v11516_v23 = vld [vmem:[#allocation37_spill] sm:$0xff] }
 0x16a   : > { %7609 = vmatpush3.bf16.msra.mxu1 %v11503_v53  ;;  %7543 = vmatprep.subr.bf16.mxu0 %v9948_v7  ;;  %v5761_v14 = vpop.f32.mrb[10].mxu0  ;;  %v11508_v53 = vld [vmem:[#allocation104_spill] sm:$0xff] }
 0x16b   : > { %7611 = vmatprep.subr.bf16.mxu1 %v11504_v31  ;;  %v5762_v29 = vpop.f32.mrb[11].mxu0  ;;  %v183_v31 = vld [vmem:[%s8632_s10 + $0x38] sm:$0xff] }
 0x16c   : > { %v10309_v15 = vadd.f32 %v5762_v29, %v5761_v14  ;;  %v11509_v14 = vld [vmem:[#allocation106_spill] sm:$0xff]  ;;  %v11511_v29 = vld [vmem:[#allocation23_spill] sm:$0xff] }
 0x16d   : > { %3151 = vmatmul.mubr.f32.vlgmr.msra.gmra.mrb[36].mxu1 %v10209_v0  ;;  %7545 = vmatpush3.bf16.msra.mxu0 %v9948_v7  ;;  %v11515_v7 = vld [vmem:[#allocation31_spill] sm:$0xff] }
 0x16e   : > { %7613 = vmatpush3.bf16.msra.mxu1 %v11505_v24  ;;  %3156 = vmatprep.mubr.f32.mxu1 %v10215_v28  ;;  %v10336_v24 = vand.u32 4294901760, %v183_v31 }
 0x16f   : > { %7615 = vmatprep.subr.bf16.mxu1 %v11506_v11  ;;  %7739 = vmatprep.subr.bf16.mxu0 %v11436_v62  ;;  %v194_v11 = vld [vmem:[%s8632_s10 + $0x90] sm:$0xff] }
 0x170   : > { %6758 = vmatmul.mubr.f32.vlgmr.msra.gmra.mrb[16].mxu0 %v9885_v13  ;;  %v11510_v13 = vld [vmem:[#allocation20_spill] sm:$0xff] }
 0x171   : > { %3158 = vmatmul.mubr.f32.gmra.mrb[38].mxu1 %v10221_v32  ;;  %7741 = vmatpush3.bf16.msra.mxu0 %v11438_v12 }
 0x172   : > { %7617 = vmatpush3.bf16.msra.mxu1 %v11507_v17  ;;  %7743 = vmatprep.subr.bf16.mxu0 %v11440_v44  ;;  %v11514_v17 = vld [vmem:[#allocation61_spill] sm:$0xff] }
 0x173   : > { %7619 = vmatprep.subr.bf16.mxu1 %v11508_v53  ;;  %3293 = vmatprep.mubr.f32.mxu1 %v10170_v52 }
 0x174   : > { %3816 = vmatprep.mubr.f32.mxu0 %v3815_v5  ;;  %v11513_v5 = vld [vmem:[#allocation60_spill] sm:$0xff] }
 0x175   : > { %7745 = vmatpush3.bf16.msra.mxu0 %v11441_v37 }
 0x176   : > { %7621 = vmatpush3.bf16.msra.mxu1 %v11509_v14  ;;  %7747 = vmatprep.subr.bf16.mxu0 %v11443_v60  ;;  %v10344_v14 = vsub.f32 %v183_v31, %v10336_v24 }
 0x177   : > { %7623 = vmatprep.subr.bf16.mxu1 %v11510_v13  ;;  %v10346_v13 = vand.u32 4294901760, %v194_v11 }
 0x179   : > { %7749 = vmatpush3.bf16.msra.mxu0 %v11446_v10 }
 0x17a   : > { %7625 = vmatpush3.bf16.msra.mxu1 %v11511_v29  ;;  %7751 = vmatprep.subr.bf16.mxu0 %v11448_v6  ;;  %v193_v29 = vld [vmem:[%s8632_s10 + $0x88] sm:$0xff] }
 0x17b   : > { %7627 = vmatprep.subr.bf16.mxu1 %v11512_v3  ;;  %v10353_v39 = vand.u32 4294901760, %v193_v29 }
 0x17d   : > { %7753 = vmatpush3.bf16.msra.mxu0 %v11449_v21  ;;  %v10358_v21 = vsub.f32 %v194_v11, %v10346_v13 }
 0x17e   : > { %7629 = vmatpush3.bf16.msra.mxu1 %v11513_v5  ;;  %7755 = vmatprep.subr.bf16.mxu0 %v11451_v41  ;;  %v11071_v41 = vand.u32 4294901760, %v10344_v14 }
 0x17f   : > { %7631 = vmatprep.subr.bf16.mxu1 %v11514_v17 }
 0x180   : > { %v5568_v53 = vpop.f32.mrb[12].mxu1 }
 0x181   : > { %v5569_v25 = vpop.f32.mrb[13].mxu1  ;;  %7757 = vmatpush3.bf16.msra.mxu0 %v11452_v54 }
 0x182   : > { %v5570_v3 = vadd.f32 %v5569_v25, %v5568_v53  ;;  %7633 = vmatpush3.bf16.msra.mxu1 %v11515_v7  ;;  %7759 = vmatprep.subr.bf16.mxu0 %v11454_v43  ;;  %v11517_v53 = vld [vmem:[#allocation65_spill] sm:$0xff] }
 0x183   : > { %v5834_v5 = vpop.f32.mrb[12].mxu0  ;;  %7635 = vmatprep.subr.bf16.mxu1 %v11516_v23 }
 0x184   : > { %v895_v17 = vadd.f32 %v5570_v3, %v10291_v33  ;;  %v5571_v31 = vpop.f32.mrb[14].mxu1  ;;  %v5835_v47 = vpop.f32.mrb[13].mxu0  ;;  %v11518_v33 = vld [vmem:[#allocation39_spill] sm:$0xff]  ;;  %v10368_v3 = vsub.f32 %v193_v29, %v10353_v39 }
 0x185   : > { %v5572_v54 = vpop.f32.mrb[15].mxu1  ;;  %v10360_v25 = vadd.f32 %v5835_v47, %v5834_v5  ;;  %7761 = vmatpush3.bf16.msra.mxu0 %v11455_v22  ;;  %v3820_v47 = vsub.f32 %v10344_v14, %v11071_v41  ;;  %v11070_v5 = vand.u32 4294901760, %v10358_v21 }
 0x186   : > { %v5573_v7 = vadd.f32 %v5572_v54, %v5571_v31  ;;  %7637 = vmatpush3.bf16.msra.mxu1 %v11517_v53  ;;  %7763 = vmatprep.subr.bf16.mxu0 %v11457_v20  ;;  %v1074_v23 = vadd.f32 %v10172_v49, %v895_v17  ;;  %v11519_v54 = vld [vmem:[#allocation44_spill] sm:$0xff] }
 0x187   : > { %7639 = vmatprep.subr.bf16.mxu1 %v11518_v33  ;;  %v3821_v31 = vand.u32 4294901760, %v3820_v47  ;;  %v3829_v53 = vsub.f32 %v10358_v21, %v11070_v5  ;;  %v11521_v47 = vld [vmem:[#allocation27_spill] sm:$0xff] }
 0x188   : > { %v906_v11 = vadd.f32 %v5573_v7, %v10302_v51  ;;  %v11069_v51 = vand.u32 4294901760, %v10368_v3 }
 0x189   : > { %7765 = vmatpush3.bf16.msra.mxu0 %v11458_v2 }
 0x18a   : > { %7641 = vmatpush3.bf16.msra.mxu1 %v11519_v54  ;;  %7767 = vmatprep.subr.bf16.mxu0 %v11460_v58  ;;  %v5837_v49 = vpop.f32.mrb[14].mxu0  ;;  %v1081_v17 = vadd.f32 %v10201_v63, %v906_v11  ;;  %v11520_v63 = vld [vmem:[#allocation107_spill] sm:$0xff]  ;;  %v3835_v33 = vsub.f32 %v10368_v3, %v11069_v51  ;;  %v3830_v11 = vand.u32 4294901760, %v3829_v53  ;;  %v11522_v54 = vld [vmem:[#allocation49_spill] sm:$0xff] }
 0x18b   : > { %7643 = vmatprep.subr.bf16.mxu1 %v11331_v56  ;;  %v5838_v29 = vpop.f32.mrb[15].mxu0  ;;  %v11526_v53 = vld [vmem:[#allocation41_spill] sm:$0xff] }
 0x18c   : > { %v10381_v7 = vadd.f32 %v5838_v29, %v5837_v49  ;;  %v11523_v49 = vand.u32 4294901760, %v10170_v52  ;;  %v3836_v29 = vand.u32 4294901760, %v3835_v33  ;;  %v11528_v52 = vld [vmem:[#allocation48_spill] sm:$0xff]  ;;  %v11529_v33 = vld [vmem:[#allocation22_spill] sm:$0xff]  ;;  %v11534_v51 = vld [vmem:[#allocation73_spill] sm:$0xff] }
 0x18d   : > { %3296 = vmatmul.mubr.f32.vlgmr.msra.gmra.mrb[40].mxu1 %v10219_v55  ;;  %7769 = vmatpush3.bf16.msra.mxu0 %v11461_v40  ;;  %v11536_v40 = vld [vmem:[#allocation53_spill] sm:$0xff] }
 0x18e   : > { %7645 = vmatpush3.bf16.msra.mxu1 %v11336_v57  ;;  %3302 = vmatprep.mubr.f32.mxu1 %v10227_v19 }
 0x18f   : > { %7647 = vmatprep.subr.bf16.mxu1 %v11338_v26  ;;  %7803 = vmatprep.subr.bf16.mxu0 %v11520_v63  ;;  %v11524_v63 = vld [vmem:[#allocation30_spill] sm:$0xff] }
 0x190   : > { %3822 = vmatmul.mubr.f32.vlgmr.msra.gmra.mrb[18].mxu0 %v3821_v31  ;;  %v11525_v31 = vld [vmem:[#allocation36_spill] sm:$0xff] }
 0x191   : > { %3305 = vmatmul.mubr.f32.gmra.mrb[42].mxu1 %v10232_v61  ;;  %7805 = vmatpush3.bf16.msra.mxu0 %v11521_v47  ;;  %v11527_v47 = vld [vmem:[#allocation45_spill] sm:$0xff] }
 0x192   : > { %7649 = vmatpush3.bf16.msra.mxu1 %v11342_v18  ;;  %7807 = vmatprep.subr.bf16.mxu0 %v11522_v54  ;;  %v11531_v54 = vld [vmem:[#allocation26_spill] sm:$0xff] }
 0x193   : > { %7651 = vmatprep.subr.bf16.mxu1 %v11471_v34  ;;  %3409 = vmatprep.mubr.f32.mxu1 %v11523_v49 }
 0x194   : > { %3831 = vmatprep.mubr.f32.mxu0 %v3830_v11  ;;  %v11530_v11 = vld [vmem:[#allocation47_spill] sm:$0xff] }
 0x195   : > { %7809 = vmatpush3.bf16.msra.mxu0 %v11524_v63  ;;  %v11532_v63 = vld [vmem:[#allocation72_spill] sm:$0xff] }
 0x196   : > { %7653 = vmatpush3.bf16.msra.mxu1 %v11472_v59  ;;  %7811 = vmatprep.subr.bf16.mxu0 %v11525_v31 }
 0x197   : > { %7655 = vmatprep.subr.bf16.mxu1 %v11474_v27  ;;  %3837 = vmatmul.mubr.f32.gmra.mrb[20].mxu0 %v3836_v29 }
 0x198   : > { %4211 = vmatprep.mubr.f32.mxu0 %v10294_v35 }
 0x199   : > { %7813 = vmatpush3.bf16.msra.mxu0 %v11526_v53  ;;  %v11533_v53 = vld [vmem:[#allocation29_spill] sm:$0xff] }
 0x19a   : > { %7657 = vmatpush3.bf16.msra.mxu1 %v11475_v38  ;;  %7815 = vmatprep.subr.bf16.mxu0 %v11527_v47  ;;  %v11535_v47 = vld [vmem:[#allocation33_spill] sm:$0xff] }
 0x19b   : > { %7659 = vmatprep.subr.bf16.mxu1 %v11477_v48 }
 0x19d   : > { %7817 = vmatpush3.bf16.msra.mxu0 %v11528_v52 }
 0x19e   : > { %7661 = vmatpush3.bf16.msra.mxu1 %v11529_v33  ;;  %7819 = vmatprep.subr.bf16.mxu0 %v11530_v11  ;;  %v11537_v11 = vld [vmem:[#allocation55_spill] sm:$0xff] }
 0x19f   : > { %7663 = vmatprep.subr.bf16.mxu1 %v11531_v54 }
 0x1a0   : > { %v5644_v49 = vpop.f32.mrb[16].mxu1 }
 0x1a1   : > { %v5645_v29 = vpop.f32.mrb[17].mxu1  ;;  %7821 = vmatpush3.bf16.msra.mxu0 %v11532_v63  ;;  %v11540_v63 = vld [vmem:[#allocation10_spill] sm:$0xff] }
 0x1a2   : > { %v5646_v31 = vadd.f32 %v5645_v29, %v5644_v49  ;;  %7665 = vmatpush3.bf16.msra.mxu1 %v11533_v53  ;;  %7823 = vmatprep.subr.bf16.mxu0 %v11534_v51  ;;  %v11538_v29 = vld [vmem:[#allocation83_spill] sm:$0xff]  ;;  %v11539_v51 = vld [vmem:[#allocation108_spill] sm:$0xff] }
 0x1a3   : > { %7667 = vmatprep.subr.bf16.mxu1 %v11535_v47 }
 0x1a4   : > { %v1185_v5 = vadd.f32 %v5646_v31, %v1074_v23  ;;  %v5647_v41 = vpop.f32.mrb[18].mxu1  ;;  %v11543_v31 = vld [vmem:[#allocation12_spill] sm:$0xff] }
 0x1a5   : > { %v5648_v52 = vpop.f32.mrb[19].mxu1  ;;  %7825 = vmatpush3.bf16.msra.mxu0 %v11536_v40  ;;  %v11541_v40 = vand.u32 4294901760, %v10219_v55  ;;  %v11549_v55 = vld [vmem:[#allocation16_spill] sm:$0xff] }
 0x1a6   : > { %v5649_v58 = vadd.f32 %v5648_v52, %v5647_v41  ;;  %7669 = vmatpush3.bf16.msra.mxu1 %v11484_v8  ;;  %7827 = vmatprep.subr.bf16.mxu0 %v11537_v11  ;;  %v1304_v2 = vadd.f32 %v10239_v42, %v1185_v5  ;;  %v11542_v41 = vld [vmem:[#allocation109_spill] sm:$0xff]  ;;  %v11544_v42 = vand.u32 4294901760, %v10227_v19  ;;  %v11546_v5 = vld [vmem:[#allocation110_spill] sm:$0xff]  ;;  %v11550_v52 = vld [vmem:[#allocation52_spill] sm:$0xff] }
 0x1a7   : > { %7671 = vmatprep.subr.bf16.mxu1 %v11486_v16  ;;  %v11551_v11 = vld [vmem:[#allocation18_spill] sm:$0xff]  ;;  %v11552_v19 = vld [vmem:[#allocation7_spill] sm:$0xff] }
 0x1a8   : > { %v1192_v49 = vadd.f32 %v5649_v58, %v1081_v17  ;;  %v11545_v58 = vld [vmem:[#allocation14_spill] sm:$0xff] }
 0x1a9   : > { %7829 = vmatpush3.bf16.msra.mxu0 %v11538_v29  ;;  %v11548_v17 = vld [vmem:[#allocation6_spill] sm:$0xff]  ;;  %v11554_v29 = vld [vmem:[#allocation9_spill] sm:$0xff] }
 0x1aa   : > { %7673 = vmatpush3.bf16.msra.mxu1 %v11377_v1  ;;  %7831 = vmatprep.subr.bf16.mxu0 %v11539_v51  ;;  %v1319_v23 = vadd.f32 %v10271_v4, %v1192_v49  ;;  %v11547_v4 = vand.u32 4294901760, %v10232_v61  ;;  %v11553_v49 = vld [vmem:[#allocation21_spill] sm:$0xff] }
 0x1ab   : > { %7675 = vmatprep.subr.bf16.mxu1 %v11540_v63  ;;  %v11555_v61 = vld [vmem:[#allocation25_spill] sm:$0xff]  ;;  %v11557_v63 = vld [vmem:[#allocation28_spill] sm:$0xff] }
 0x1ac   : > { %v11556_v51 = vld [vmem:[#allocation113_spill] sm:$0xff] }
 0x1ad   : > { %3413 = vmatmul.mubr.f32.vlgmr.msra.gmra.mrb[44].mxu1 %v11541_v40  ;;  %7833 = vmatpush3.bf16.msra.mxu0 %v11542_v41  ;;  %v11558_v40 = vld [vmem:[#allocation114_spill] sm:$0xff]  ;;  %v11559_v41 = vld [vmem:[#allocation32_spill] sm:$0xff] }
 0x1ae   : > { %7677 = vmatpush3.bf16.msra.mxu1 %v11543_v31  ;;  %3420 = vmatprep.mubr.f32.mxu1 %v11544_v42  ;;  %v11560_v31 = vld [vmem:[#allocation116_spill] sm:$0xff]  ;;  %v11561_v42 = vld [vmem:[#allocation34_spill] sm:$0xff] }
 0x1af   : > { %7679 = vmatprep.subr.bf16.mxu1 %v11545_v58  ;;  %7867 = vmatprep.subr.bf16.mxu0 %v11546_v5  ;;  %v11562_v58 = vld [vmem:[#allocation118_spill] sm:$0xff] }
 0x1b0   : > { %4214 = vmatmul.mubr.f32.vlgmr.msra.gmra.mrb[22].mxu0 %v10344_v14  ;;  %v11563_v5 = vld [vmem:[#allocation38_spill] sm:$0xff] }
 0x1b1   : > { %3424 = vmatmul.mubr.f32.gmra.mrb[46].mxu1 %v11547_v4  ;;  %7869 = vmatpush3.bf16.msra.mxu0 %v11548_v17 }
 0x1b2   : > { %7681 = vmatpush3.bf16.msra.mxu1 %v11549_v55  ;;  %7871 = vmatprep.subr.bf16.mxu0 %v11550_v52  ;;  %v11564_v55 = vld [vmem:[#allocation120_spill] sm:$0xff] }
 0x1b3   : > { %7683 = vmatprep.subr.bf16.mxu1 %v11551_v11  ;;  %3590 = vmatprep.mubr.f32.mxu1 %v10161_v45  ;;  %v11565_v11 = vld [vmem:[#allocation42_spill] sm:$0xff] }
 0x1b4   : > { %4220 = vmatprep.mubr.f32.mxu0 %v10358_v21 }
 0x1b5   : > { %7873 = vmatpush3.bf16.msra.mxu0 %v11552_v19  ;;  %v11566_v19 = vld [vmem:[#allocation121_spill] sm:$0xff] }
 0x1b6   : > { %7685 = vmatpush3.bf16.msra.mxu1 %v11553_v49  ;;  %7875 = vmatprep.subr.bf16.mxu0 %v11554_v29  ;;  %v11567_v49 = vld [vmem:[#allocation46_spill] sm:$0xff] }
 0x1b7   : > { %7687 = vmatprep.subr.bf16.mxu1 %v11555_v61  ;;  %4223 = vmatmul.mubr.f32.gmra.mrb[24].mxu0 %v10368_v3 }
 0x1b8   : > { %4508 = vmatprep.mubr.f32.mxu0 %v10285_v30 }
 0x1b9   : > { %7877 = vmatpush3.bf16.msra.mxu0 %v11556_v51 }
 0x1ba   : > { %7689 = vmatpush3.bf16.msra.mxu1 %v11557_v63  ;;  %7879 = vmatprep.subr.bf16.mxu0 %v11558_v40  ;;  %v11568_v63 = vld [vmem:[#allocation123_spill] sm:$0xff] }
 0x1bb   : > { %7691 = vmatprep.subr.bf16.mxu1 %v11559_v41  ;;  %v11569_v41 = vld [vmem:[#allocation50_spill] sm:$0xff] }
 0x1bd   : > { %7881 = vmatpush3.bf16.msra.mxu0 %v11560_v31  ;;  %v11570_v31 = vld [vmem:[#allocation125_spill] sm:$0xff] }
 0x1be   : > { %7693 = vmatpush3.bf16.msra.mxu1 %v11561_v42  ;;  %7883 = vmatprep.subr.bf16.mxu0 %v11562_v58  ;;  %v11571_v58 = vld [vmem:[#allocation54_spill] sm:$0xff] }
 0x1bf   : > { %7695 = vmatprep.subr.bf16.mxu1 %v11563_v5 }
 0x1c0   : > { %v5720_v4 = vpop.f32.mrb[20].mxu1 }
 0x1c1   : > { %v5721_v17 = vpop.f32.mrb[21].mxu1  ;;  %7885 = vmatpush3.bf16.msra.mxu0 %v11564_v55 }
 0x1c2   : > { %v5722_v52 = vadd.f32 %v5721_v17, %v5720_v4  ;;  %7697 = vmatpush3.bf16.msra.mxu1 %v11565_v11  ;;  %7887 = vmatprep.subr.bf16.mxu0 %v11566_v19  ;;  %v11572_v4 = vld [vmem:[#allocation128_spill] sm:$0xff]  ;;  %v11573_v17 = vld [vmem:[#allocation57_spill] sm:$0xff] }
 0x1c3   : > { %7699 = vmatprep.subr.bf16.mxu1 %v11567_v49 }
 0x1c4   : > { %v1551_v29 = vadd.f32 %v5722_v52, %v1304_v2  ;;  %v5723_v61 = vpop.f32.mrb[22].mxu1  ;;  %v11574_v2 = vld [vmem:[#allocation129_spill] sm:$0xff]  ;;  %v11575_v52 = vld [vmem:[#allocation131_spill] sm:$0xff] }
 0x1c5   : > { %v5724_v51 = vpop.f32.mrb[23].mxu1  ;;  %7889 = vmatpush3.bf16.msra.mxu0 %v11568_v63  ;;  %v11590_v63 = vld [vmem:[#allocation115_spill] sm:$0xff] }
 0x1c6   : > { %v5725_v40 = vadd.f32 %v5724_v51, %v5723_v61  ;;  %7701 = vmatpush3.bf16.msra.mxu1 %v11569_v41  ;;  %7891 = vmatprep.subr.bf16.mxu0 %v11570_v31  ;;  %v1696_v42 = vadd.f32 %v10296_v36, %v1551_v29  ;;  %v11576_v36 = vld [vmem:[#allocation148_spill] sm:$0xff]  ;;  %v11584_v61 = vld [vmem:[#allocation111_spill] sm:$0xff] }
 0x1c7   : > { %7703 = vmatprep.subr.bf16.mxu1 %v11571_v58  ;;  %v11593_v41 = vld [vmem:[#allocation119_spill] sm:$0xff]  ;;  %v11595_v31 = vld [vmem:[#allocation68_spill] sm:$0xff]  ;;  %v11597_v58 = vld [vmem:[#allocation126_spill] sm:$0xff] }
 0x1c8   : > { %v1558_v5 = vadd.f32 %v5725_v40, %v1319_v23  ;;  %v11592_v40 = vld [vmem:[#allocation64_spill] sm:$0xff] }
 0x1c9   : > { %7893 = vmatpush3.bf16.msra.mxu0 %v11572_v4  ;;  %v11599_v4 = vld [vmem:[#allocation127_spill] sm:$0xff] }
 0x1ca   : > { %7705 = vmatpush3.bf16.msra.mxu1 %v11573_v17  ;;  %7895 = vmatprep.subr.bf16.mxu0 %v11574_v2  ;;  %v1705_v55 = vadd.f32 %v10309_v15, %v1558_v5  ;;  %v185_v15 = vld [vmem:[%s8632_s10 + $0x48] sm:$0xff]  ;;  %v11598_v5 = vld [vmem:[#allocation70_spill] sm:$0xff] }
 0x1cb   : > { %7707 = vmatprep.subr.bf16.mxu1 %v11331_v56  ;;  %v11577_v56 = vld [vmem:[#allocation149_spill] sm:$0xff] }
 0x1cd   : > { %3592 = vmatmul.mubr.f32.vlgmr.msra.gmra.mrb[48].mxu1 %v10209_v0  ;;  %7897 = vmatpush3.bf16.msra.mxu0 %v11575_v52  ;;  %v11600_v52 = vld [vmem:[#allocation130_spill] sm:$0xff] }
 0x1ce   : > { %7709 = vmatpush3.bf16.msra.mxu1 %v11336_v57  ;;  %3597 = vmatprep.mubr.f32.mxu1 %v10215_v28  ;;  %v10489_v57 = vand.u32 4294901760, %v185_v15 }
 0x1cf   : > { %7711 = vmatprep.subr.bf16.mxu1 %v11338_v26  ;;  %7963 = vmatprep.subr.bf16.mxu0 %v11576_v36  ;;  %v11578_v26 = vld [vmem:[#allocation84_spill] sm:$0xff] }
 0x1d0   : > { %4510 = vmatmul.mubr.f32.vlgmr.msra.gmra.mrb[26].mxu0 %v10336_v24 }
 0x1d1   : > { %3599 = vmatmul.mubr.f32.gmra.mrb[50].mxu1 %v10221_v32  ;;  %7965 = vmatpush3.bf16.msra.mxu0 %v11576_v36  ;;  %v11601_v36 = vld [vmem:[#allocation99_spill] sm:$0xff] }
 0x1d2   : > { %7713 = vmatpush3.bf16.msra.mxu1 %v11342_v18  ;;  %7967 = vmatprep.subr.bf16.mxu0 %v11577_v56  ;;  %v11579_v18 = vld [vmem:[#allocation96_spill] sm:$0xff] }
 0x1d3   : > { %7715 = vmatprep.subr.bf16.mxu1 %v11471_v34  ;;  %3701 = vmatprep.mubr.f32.mxu1 %v10161_v45  ;;  %v11580_v45 = vld [vmem:[#allocation150_spill] sm:$0xff] }
 0x1d4   : > { %4515 = vmatprep.mubr.f32.mxu0 %v10346_v13 }
 0x1d5   : > { %7969 = vmatpush3.bf16.msra.mxu0 %v11577_v56 }
 0x1d6   : > { %7717 = vmatpush3.bf16.msra.mxu1 %v11472_v59  ;;  %7971 = vmatprep.subr.bf16.mxu0 %v11578_v26 }
 0x1d7   : > { %7719 = vmatprep.subr.bf16.mxu1 %v11474_v27  ;;  %4517 = vmatmul.mubr.f32.gmra.mrb[28].mxu0 %v10353_v39 }
 0x1d8   : > { %6827 = vmatprep.mubr.f32.mxu0 %v10489_v57 }
 0x1d9   : > { %7973 = vmatpush3.bf16.msra.mxu0 %v11578_v26 }
 0x1da   : > { %7721 = vmatpush3.bf16.msra.mxu1 %v11475_v38  ;;  %7975 = vmatprep.subr.bf16.mxu0 %v11579_v18  ;;  %v11581_v38 = vld [vmem:[#allocation151_spill] sm:$0xff] }
 0x1db   : > { %7723 = vmatprep.subr.bf16.mxu1 %v11477_v48 }
 0x1dd   : > { %7977 = vmatpush3.bf16.msra.mxu0 %v11579_v18 }
 0x1de   : > { %7725 = vmatpush3.bf16.msra.mxu1 %v11529_v33  ;;  %7979 = vmatprep.subr.bf16.mxu0 %v11580_v45 }
 0x1df   : > { %7727 = vmatprep.subr.bf16.mxu1 %v11531_v54  ;;  %v11582_v54 = vld [vmem:[#allocation152_spill] sm:$0xff] }
 0x1e0   : > { %v5796_v27 = vpop.f32.mrb[24].mxu1 }
 0x1e1   : > { %v5797_v34 = vpop.f32.mrb[25].mxu1  ;;  %7981 = vmatpush3.bf16.msra.mxu0 %v11580_v45 }
 0x1e2   : > { %v5798_v59 = vadd.f32 %v5797_v34, %v5796_v27  ;;  %7729 = vmatpush3.bf16.msra.mxu1 %v11533_v53  ;;  %7983 = vmatprep.subr.bf16.mxu0 %v11581_v38  ;;  %v195_v53 = vld [vmem:[%s8632_s10 + $0x98] sm:$0xff]  ;;  %v11603_v27 = vld [vmem:[#allocation43_spill] sm:$0xff]  ;;  %v11604_v34 = vld [vmem:[#allocation76_spill] sm:$0xff]  ;;  %s8253_s10 = smov 64  }
 0x1e3   : > { %7731 = vmatprep.subr.bf16.mxu1 %v11535_v47  ;;  %v11583_v47 = vld [vmem:[#allocation153_spill] sm:$0xff]  ;;  %v10520_v51 = vand.u32 4294901760, %v195_v53 }
 0x1e4   : > { %v1813_v48 = vadd.f32 %v5798_v59, %v1696_v42  ;;  %v5799_v23 = vpop.f32.mrb[26].mxu1  ;;  %v11596_v42 = vld [vmem:[#allocation124_spill] sm:$0xff]  ;;  %v11605_v59 = vld [vmem:[#allocation133_spill] sm:$0xff] }
 0x1e5   : > { %v5800_v11 = vpop.f32.mrb[27].mxu1  ;;  %7985 = vmatpush3.bf16.msra.mxu0 %v11581_v38 }
 0x1e6   : > { %v5801_v33 = vadd.f32 %v5800_v11, %v5799_v23  ;;  %7733 = vmatpush3.bf16.msra.mxu1 %v11484_v8  ;;  %7987 = vmatprep.subr.bf16.mxu0 %v11582_v54  ;;  %v1992_v19 = vadd.f32 %v10360_v25, %v1813_v48  ;;  %v11585_v8 = vld [vmem:[#allocation88_spill] sm:$0xff]  ;;  %v11587_v25 = vld [vmem:[#allocation58_spill] sm:$0xff]  ;;  %v11607_v23 = vld [vmem:[#allocation77_spill] sm:$0xff]  ;;  %v10568_v11 = vsub.f32 %v195_v53, %v10520_v51 }
 0x1e7   : > { %7735 = vmatprep.subr.bf16.mxu1 %v11486_v16  ;;  %v11586_v16 = vld [vmem:[#allocation8_spill] sm:$0xff]  ;;  %v11606_v48 = vld [vmem:[#allocation134_spill] sm:$0xff] }
 0x1e8   : > { %v1824_v49 = vadd.f32 %v5801_v33, %v1705_v55  ;;  %v11611_v53 = vld [vmem:[#allocation82_spill] sm:$0xff] }
 0x1e9   : > { %7989 = vmatpush3.bf16.msra.mxu0 %v11582_v54  ;;  %v11608_v54 = vand.u32 4294901760, %v10294_v35  ;;  %v11612_v35 = vld [vmem:[#allocation86_spill] sm:$0xff] }
 0x1ea   : > { %7737 = vmatpush3.bf16.msra.mxu1 %v11377_v1  ;;  %7991 = vmatprep.subr.bf16.mxu0 %v11583_v47  ;;  %v1999_v29 = vadd.f32 %v10381_v7, %v1824_v49  ;;  %v10530_v1 = vsub.f32 %v185_v15, %v10489_v57  ;;  %v11589_v7 = vld [vmem:[#allocation63_spill] sm:$0xff]  ;;  %v11602_v15 = vld [vmem:[#allocation132_spill] sm:$0xff]  ;;  %v11610_v49 = vld [vmem:[#allocation137_spill] sm:$0xff] }
 0x1eb   : > { %7771 = vmatprep.subr.bf16.mxu1 %v11584_v61 }
 0x1ec   : > { %v4716_v33 = vand.u32 4294901760, %v10530_v1 }
 0x1ed   : > { %3703 = vmatmul.mubr.f32.vlgmr.msra.gmra.mrb[52].mxu1 %v10209_v0  ;;  %7993 = vmatpush3.bf16.msra.mxu0 %v11583_v47  ;;  %v11588_v0 = vld [vmem:[#allocation112_spill] sm:$0xff]  ;;  %v11613_v47 = vld [vmem:[#allocation139_spill] sm:$0xff] }
 0x1ee   : > { %7773 = vmatpush3.bf16.msra.mxu1 %v11585_v8  ;;  %3708 = vmatprep.mubr.f32.mxu1 %v10215_v28  ;;  %v11591_v28 = vld [vmem:[#allocation117_spill] sm:$0xff] }
 0x1ef   : > { %7775 = vmatprep.subr.bf16.mxu1 %v11586_v16  ;;  %7995 = vmatprep.subr.bf16.mxu0 %v11587_v25  ;;  %v11614_v16 = vld [vmem:[#allocation141_spill] sm:$0xff] }
 0x1f0   : > { %6828 = vmatmul.mubr.f32.vlgmr.msra.gmra.mrb[30].mxu0 %v10520_v51 }
 0x1f1   : > { %3710 = vmatmul.mubr.f32.gmra.mrb[54].mxu1 %v10221_v32  ;;  %7997 = vmatpush3.bf16.msra.mxu0 %v11587_v25  ;;  %v11594_v32 = vld [vmem:[#allocation122_spill] sm:$0xff] }
 0x1f2   : > { %7777 = vmatpush3.bf16.msra.mxu1 %v11588_v0  ;;  %7999 = vmatprep.subr.bf16.mxu0 %v11589_v7 }
 0x1f3   : > { %7779 = vmatprep.subr.bf16.mxu1 %v11590_v63  ;;  %4067 = vmatprep.mubr.f32.mxu1 %v10285_v30  ;;  %v11616_v63 = vld [vmem:[#allocation143_spill] sm:$0xff] }
 0x1f4   : > { %6862 = vmatprep.mubr.f32.mxu0 %v10530_v1 }
 0x1f5   : > { %8001 = vmatpush3.bf16.msra.mxu0 %v11589_v7  ;;  %v11615_v7 = vld [vmem:[#allocation98_spill] sm:$0xff] }
 0x1f6   : > { %7781 = vmatpush3.bf16.msra.mxu1 %v11591_v28  ;;  %8003 = vmatprep.subr.bf16.mxu0 %v11592_v40 }
 0x1f7   : > { %7783 = vmatprep.subr.bf16.mxu1 %v11593_v41  ;;  %v11618_v41 = vld [vmem:[#allocation105_spill] sm:$0xff] }
 0x1f9   : > { %8005 = vmatpush3.bf16.msra.mxu0 %v11592_v40  ;;  %v11617_v40 = vld [vmem:[#allocation103_spill] sm:$0xff] }
 0x1fa   : > { %7785 = vmatpush3.bf16.msra.mxu1 %v11594_v32  ;;  %8007 = vmatprep.subr.bf16.mxu0 %v11595_v31  ;;  %v11619_v32 = vld [vmem:[#allocation145_spill] sm:$0xff] }
 0x1fb   : > { %7787 = vmatprep.subr.bf16.mxu1 %v11596_v42  ;;  %v11620_v42 = vand.u32 4294901760, %v10344_v14  ;;  %v11624_v14 = vld [vmem:[#allocation136_spill] sm:$0xff] }
 0x1fd   : > { %8009 = vmatpush3.bf16.msra.mxu0 %v11595_v31  ;;  %v4726_v31 = vand.u32 4294901760, %v10568_v11 }
 0x1fe   : > { %7789 = vmatpush3.bf16.msra.mxu1 %v11597_v58  ;;  %8011 = vmatprep.subr.bf16.mxu0 %v11598_v5  ;;  %v11621_v58 = vand.u32 4294901760, %v10358_v21  ;;  %v11628_v21 = vld [vmem:[#allocation144_spill] sm:$0xff] }
 0x1ff   : > { %7791 = vmatprep.subr.bf16.mxu1 %v11599_v4 }
 0x200   : > { %v5872_v17 = vpop.f32.mrb[28].mxu1 }
 0x201   : > { %v5873_v2 = vpop.f32.mrb[29].mxu1  ;;  %8013 = vmatpush3.bf16.msra.mxu0 %v11598_v5  ;;  %v11622_v5 = vld [vmem:[#allocation135_spill] sm:$0xff] }
 0x202   : > { %v5874_v55 = vadd.f32 %v5873_v2, %v5872_v17  ;;  %7793 = vmatpush3.bf16.msra.mxu1 %v11600_v52  ;;  %8015 = vmatprep.subr.bf16.mxu0 %v11601_v36 }
 0x203   : > { %7795 = vmatprep.subr.bf16.mxu1 %v11602_v15  ;;  %v4717_v15 = vsub.f32 %v10530_v1, %v4716_v33  ;;  %v4727_v1 = vsub.f32 %v10568_v11, %v4726_v31 }
 0x204   : > { %v5875_v56 = vpop.f32.mrb[30].mxu1  ;;  %v10555_v26 = vadd.f32 %v5874_v55, %v1992_v19  ;;  %v11609_v19 = vld [vmem:[#allocation80_spill] sm:$0xff] }
 0x205   : > { %v5876_v18 = vpop.f32.mrb[31].mxu1  ;;  %8017 = vmatpush3.bf16.msra.mxu0 %v11601_v36  ;;  %v11630_v36 = vld [vmem:[#allocation147_spill] sm:$0xff] }
 0x206   : > { %v5877_v45 = vadd.f32 %v5876_v18, %v5875_v56  ;;  %7797 = vmatpush3.bf16.msra.mxu1 %v11603_v27  ;;  %8019 = vmatprep.subr.bf16.mxu0 %v11604_v34  ;;  %v4718_v56 = vand.u32 4294901760, %v4717_v15 }
 0x207   : > { %7799 = vmatprep.subr.bf16.mxu1 %v11605_v59 }
 0x208   : > { %v10561_v38 = vadd.f32 %v5877_v45, %v1999_v29 }
 0x209   : > { %8021 = vmatpush3.bf16.msra.mxu0 %v11604_v34  ;;  %v4728_v34 = vand.u32 4294901760, %v4727_v1 }
 0x20a   : > { %7801 = vmatpush3.bf16.msra.mxu1 %v11606_v48  ;;  %8023 = vmatprep.subr.bf16.mxu0 %v11607_v23 }
 0x20b   : > { %7835 = vmatprep.subr.bf16.mxu1 %v11436_v62 }
 0x20d   : > { %4069 = vmatmul.mubr.f32.vlgmr.msra.gmra.mrb[56].mxu1 %v10336_v24  ;;  %8025 = vmatpush3.bf16.msra.mxu0 %v11607_v23 }
 0x20e   : > { %7837 = vmatpush3.bf16.msra.mxu1 %v11438_v12  ;;  %4074 = vmatprep.mubr.f32.mxu1 %v10346_v13 }
 0x20f   : > { %7839 = vmatprep.subr.bf16.mxu1 %v11440_v44  ;;  %8027 = vmatprep.subr.bf16.mxu0 %v9757_v50 }
 0x210   : > { %6863 = vmatmul.mubr.f32.vlgmr.msra.gmra.mrb[30].mxu0 %v10568_v11 }
 0x211   : > { %4076 = vmatmul.mubr.f32.gmra.mrb[58].mxu1 %v10353_v39  ;;  %8029 = vmatpush3.bf16.msra.mxu0 %v9757_v50 }
 0x212   : > { %7841 = vmatpush3.bf16.msra.mxu1 %v11441_v37  ;;  %8031 = vmatprep.subr.bf16.mxu0 %v9763_v9 }
 0x213   : > { %7843 = vmatprep.subr.bf16.mxu1 %v11443_v60  ;;  %4327 = vmatprep.mubr.f32.mxu1 %v11608_v54 }
 0x214   : > { %6897 = vmatprep.mubr.f32.mxu0 %v4716_v33 }
 0x215   : > { %8033 = vmatpush3.bf16.msra.mxu0 %v9763_v9 }
 0x216   : > { %7845 = vmatpush3.bf16.msra.mxu1 %v11446_v10  ;;  %8035 = vmatprep.subr.bf16.mxu0 %v9806_v46 }
 0x217   : > { %7847 = vmatprep.subr.bf16.mxu1 %v11448_v6 }
 0x219   : > { %8037 = vmatpush3.bf16.msra.mxu0 %v9806_v46 }
 0x21a   : > { %7849 = vmatpush3.bf16.msra.mxu1 %v11609_v19  ;;  %8039 = vmatprep.subr.bf16.mxu0 %v11610_v49 }
 0x21b   : > { %7851 = vmatprep.subr.bf16.mxu1 %v11611_v53 }
 0x21d   : > { %8041 = vmatpush3.bf16.msra.mxu0 %v11610_v49 }
 0x21e   : > { %7853 = vmatpush3.bf16.msra.mxu1 %v11612_v35  ;;  %8043 = vmatprep.subr.bf16.mxu0 %v11613_v47 }
 0x21f   : > { %7855 = vmatprep.subr.bf16.mxu1 %v11454_v43 }
 0x220   : > { %v6018_v29 = vpop.f32.mrb[32].mxu1 }
 0x221   : > { %8045 = vmatpush3.bf16.msra.mxu0 %v11613_v47  ;;  %v6019_v61 = vpop.f32.mrb[33].mxu1 }
 0x222   : > { %7857 = vmatpush3.bf16.msra.mxu1 %v11455_v22  ;;  %v6020_v8 = vadd.f32 %v6019_v61, %v6018_v29  ;;  %8047 = vmatprep.subr.bf16.mxu0 %v11614_v16 }
 0x223   : > { %7859 = vmatprep.subr.bf16.mxu1 %v11457_v20 }
 0x224   : > { %v6021_v25 = vpop.f32.mrb[34].mxu1 }
 0x225   : > { %8049 = vmatpush3.bf16.msra.mxu0 %v11614_v16  ;;  %v6022_v0 = vpop.f32.mrb[35].mxu1 }
 0x226   : > { %7861 = vmatpush3.bf16.msra.mxu1 %v11615_v7  ;;  %8051 = vmatprep.subr.bf16.mxu0 %v11616_v63  ;;  %v6023_v28 = vadd.f32 %v6022_v0, %v6021_v25 }
 0x227   : > { %7863 = vmatprep.subr.bf16.mxu1 %v11617_v40 }
 0x229   : > { %8053 = vmatpush3.bf16.msra.mxu0 %v11616_v63 }
 0x22a   : > { %7865 = vmatpush3.bf16.msra.mxu1 %v11618_v41  ;;  %8055 = vmatprep.subr.bf16.mxu0 %v11619_v32 }
 0x22b   : > { %7899 = vmatprep.subr.bf16.mxu1 %v11436_v62  ;;  %v11623_v62 = vand.u32 4294901760, %v10368_v3 }
 0x22d   : > { %4331 = vmatmul.mubr.f32.vlgmr.msra.gmra.mrb[60].mxu1 %v11620_v42  ;;  %8057 = vmatpush3.bf16.msra.mxu0 %v11619_v32 }
 0x22e   : > { %7901 = vmatpush3.bf16.msra.mxu1 %v11438_v12  ;;  %4338 = vmatprep.mubr.f32.mxu1 %v11621_v58  ;;  %v11625_v12 = vld [vmem:[#allocation138_spill] sm:$0xff] }
 0x22f   : > { %7903 = vmatprep.subr.bf16.mxu1 %v11440_v44  ;;  %8059 = vmatprep.subr.bf16.mxu0 %v11622_v5  ;;  %v11626_v44 = vld [vmem:[#allocation140_spill] sm:$0xff] }
 0x230   : > { %6898 = vmatmul.mubr.f32.vlgmr.msra.gmra.mrb[30].mxu0 %v4726_v31 }
 0x231   : > { %4342 = vmatmul.mubr.f32.gmra.mrb[62].mxu1 %v11623_v62  ;;  %8061 = vmatpush3.bf16.msra.mxu0 %v11622_v5 }
 0x232   : > { %7905 = vmatpush3.bf16.msra.mxu1 %v11441_v37  ;;  %8063 = vmatprep.subr.bf16.mxu0 %v11624_v14  ;;  %v11627_v37 = vld [vmem:[#allocation142_spill] sm:$0xff] }
 0x233   : > { %7907 = vmatprep.subr.bf16.mxu1 %v11443_v60  ;;  %4619 = vmatprep.mubr.f32.mxu1 %v10285_v30 }
 0x234   : > { %6932 = vmatprep.mubr.f32.mxu0 %v10489_v57 }
 0x235   : > { %8065 = vmatpush3.bf16.msra.mxu0 %v11624_v14 }
 0x236   : > { %7909 = vmatpush3.bf16.msra.mxu1 %v11446_v10  ;;  %8067 = vmatprep.subr.bf16.mxu0 %v11625_v12 }
 0x237   : > { %7911 = vmatprep.subr.bf16.mxu1 %v11448_v6 }
 0x239   : > { %8069 = vmatpush3.bf16.msra.mxu0 %v11625_v12 }
 0x23a   : > { %7913 = vmatpush3.bf16.msra.mxu1 %v11609_v19  ;;  %8071 = vmatprep.subr.bf16.mxu0 %v11626_v44 }
 0x23b   : > { %7915 = vmatprep.subr.bf16.mxu1 %v11611_v53 }
 0x23d   : > { %8073 = vmatpush3.bf16.msra.mxu0 %v11626_v44 }
 0x23e   : > { %7917 = vmatpush3.bf16.msra.mxu1 %v11612_v35  ;;  %8075 = vmatprep.subr.bf16.mxu0 %v11627_v37 }
 0x23f   : > { %7919 = vmatprep.subr.bf16.mxu1 %v11454_v43 }
 0x240   : > { %v6056_v60 = vpop.f32.mrb[36].mxu1 }
 0x241   : > { %v6057_v10 = vpop.f32.mrb[37].mxu1  ;;  %8077 = vmatpush3.bf16.msra.mxu0 %v11627_v37 }
 0x242   : > { %v6058_v6 = vadd.f32 %v6057_v10, %v6056_v60  ;;  %7921 = vmatpush3.bf16.msra.mxu1 %v11455_v22  ;;  %8079 = vmatprep.subr.bf16.mxu0 %v11628_v21  ;;  %v11629_v22 = vld [vmem:[#allocation146_spill] sm:$0xff] }
 0x243   : > { %v6759_v30 = vpop.f32.mrb[16].mxu0  ;;  %7923 = vmatprep.subr.bf16.mxu1 %v11457_v20 }
 0x244   : > { %v3153_v3 = vadd.f32 %v6058_v6, %v6020_v8  ;;  %v10647_v4 = vadd.f32 %v6759_v30, %v10561_v38  ;;  %v6059_v17 = vpop.f32.mrb[38].mxu1  ;;  %v2787_v2 = vpop.f32.mrb[17].mxu0 }
 0x245   : > { %v10650_v43 = vadd.f32 %v2787_v2, %v10555_v26  ;;  %v6060_v55 = vpop.f32.mrb[39].mxu1  ;;  %8081 = vmatpush3.bf16.msra.mxu0 %v11628_v21 }
 0x246   : > { %v6061_v52 = vadd.f32 %v6060_v55, %v6059_v17  ;;  %7925 = vmatpush3.bf16.msra.mxu1 %v11615_v7  ;;  %8083 = vmatprep.subr.bf16.mxu0 %v11629_v22 }
 0x247   : > { %7927 = vmatprep.subr.bf16.mxu1 %v11617_v40 }
 0x248   : > { %v3160_v20 = vadd.f32 %v6061_v52, %v6023_v28 }
 0x249   : > { %8085 = vmatpush3.bf16.msra.mxu0 %v11629_v22 }
 0x24a   : > { %7929 = vmatpush3.bf16.msra.mxu1 %v11618_v41  ;;  %8087 = vmatprep.subr.bf16.mxu0 %v11630_v36 }
 0x24b   : > { %7931 = vmatprep.subr.bf16.mxu1 %v9757_v50 }
 0x24d   : > { %4621 = vmatmul.mubr.f32.vlgmr.msra.gmra.mrb[64].mxu1 %v10336_v24  ;;  %8089 = vmatpush3.bf16.msra.mxu0 %v11630_v36 }
 0x24e   : > { %7933 = vmatpush3.bf16.msra.mxu1 %v9757_v50  ;;  %4626 = vmatprep.mubr.f32.mxu1 %v10346_v13 }
 0x24f   : > { %7935 = vmatprep.subr.bf16.mxu1 %v9763_v9  ;;  %8091 = vmatprep.subr.bf16.mxu0 %v9757_v50 }
 0x250   : > { %6933 = vmatmul.mubr.f32.vlgmr.msra.gmra.mrb[30].mxu0 %v10520_v51 }
 0x251   : > { %4628 = vmatmul.mubr.f32.gmra.mrb[66].mxu1 %v10353_v39  ;;  %8093 = vmatpush3.bf16.msra.mxu0 %v9757_v50 }
 0x252   : > { %7937 = vmatpush3.bf16.msra.mxu1 %v9763_v9  ;;  %8095 = vmatprep.subr.bf16.mxu0 %v9763_v9 }
 0x253   : > { %7939 = vmatprep.subr.bf16.mxu1 %v9806_v46  ;;  %6792 = vmatprep.mubr.f32.mxu1 %v4718_v56 }
 0x254   : > { %6967 = vmatprep.mubr.f32.mxu0 %v10489_v57 }
 0x255   : > { %8097 = vmatpush3.bf16.msra.mxu0 %v9763_v9 }
 0x256   : > { %7941 = vmatpush3.bf16.msra.mxu1 %v9806_v46  ;;  %8099 = vmatprep.subr.bf16.mxu0 %v9806_v46 }
 0x257   : > { %7943 = vmatprep.subr.bf16.mxu1 %v11610_v49 }
 0x259   : > { %8101 = vmatpush3.bf16.msra.mxu0 %v9806_v46 }
 0x25a   : > { %7945 = vmatpush3.bf16.msra.mxu1 %v11610_v49  ;;  %8103 = vmatprep.subr.bf16.mxu0 %v11610_v49 }
 0x25b   : > { %7947 = vmatprep.subr.bf16.mxu1 %v11613_v47 }
 0x25d   : > { %8105 = vmatpush3.bf16.msra.mxu0 %v11610_v49 }
 0x25e   : > { %7949 = vmatpush3.bf16.msra.mxu1 %v11613_v47  ;;  %8107 = vmatprep.subr.bf16.mxu0 %v11613_v47 }
 0x25f   : > { %7951 = vmatprep.subr.bf16.mxu1 %v11614_v16 }
 0x260   : > { %v6094_v39 = vpop.f32.mrb[40].mxu1 }
 0x261   : > { %v6095_v50 = vpop.f32.mrb[41].mxu1  ;;  %8109 = vmatpush3.bf16.msra.mxu0 %v11613_v47 }
 0x262   : > { %v6096_v9 = vadd.f32 %v6095_v50, %v6094_v39  ;;  %7953 = vmatpush3.bf16.msra.mxu1 %v11614_v16  ;;  %8111 = vmatprep.subr.bf16.mxu0 %v11614_v16 }
 0x263   : > { %v6246_v46 = vpop.f32.mrb[18].mxu0  ;;  %7955 = vmatprep.subr.bf16.mxu1 %v11616_v63 }
 0x264   : > { %v3298_v24 = vadd.f32 %v6096_v9, %v3153_v3  ;;  %v6097_v13 = vpop.f32.mrb[42].mxu1  ;;  %v6247_v57 = vpop.f32.mrb[19].mxu0 }
 0x265   : > { %v6098_v26 = vpop.f32.mrb[43].mxu1  ;;  %v6248_v18 = vadd.f32 %v6247_v57, %v6246_v46  ;;  %8113 = vmatpush3.bf16.msra.mxu0 %v11614_v16 }
 0x266   : > { %v6099_v45 = vadd.f32 %v6098_v26, %v6097_v13  ;;  %7957 = vmatpush3.bf16.msra.mxu1 %v11616_v63  ;;  %8115 = vmatprep.subr.bf16.mxu0 %v11616_v63 }
 0x267   : > { %7959 = vmatprep.subr.bf16.mxu1 %v11619_v32 }
 0x268   : > { %v3307_v27 = vadd.f32 %v6099_v45, %v3160_v20 }
 0x269   : > { %8117 = vmatpush3.bf16.msra.mxu0 %v11616_v63 }
 0x26a   : > { %7961 = vmatpush3.bf16.msra.mxu1 %v11619_v32  ;;  %8119 = vmatprep.subr.bf16.mxu0 %v11619_v32  ;;  %v6249_v59 = vpop.f32.mrb[20].mxu0 }
 0x26b   : > { %v6250_v38 = vpop.f32.mrb[21].mxu0 }
 0x26c   : > { %v6251_v48 = vadd.f32 %v6250_v38, %v6249_v59 }
 0x26d   : > { %6793 = vmatmul.mubr.f32.vlgmr.msra.gmra.mrb[68].mxu1 %v4728_v34  ;;  %8121 = vmatpush3.bf16.msra.mxu0 %v11619_v32 }
 0x270   : > { %6968 = vmatmul.mubr.f32.vlgmr.msra.gmra.mrb[30].mxu0 %v10520_v51 }
 0x280   : > { %v6132_v23 = vpop.f32.mrb[44].mxu1 }
 0x281   : > { %v6133_v11 = vpop.f32.mrb[45].mxu1 }
 0x282   : > { %v6134_v33 = vadd.f32 %v6133_v11, %v6132_v23 }
 0x283   : > { %v6322_v54 = vpop.f32.mrb[22].mxu0 }
 0x284   : > { %v3415_v19 = vadd.f32 %v6134_v33, %v3298_v24  ;;  %v6135_v49 = vpop.f32.mrb[46].mxu1  ;;  %v6323_v53 = vpop.f32.mrb[23].mxu0 }
 0x285   : > { %v6136_v35 = vpop.f32.mrb[47].mxu1  ;;  %v6324_v47 = vadd.f32 %v6323_v53, %v6322_v54 }
 0x286   : > { %v6137_v29 = vadd.f32 %v6136_v35, %v6135_v49 }
 0x288   : > { %v3426_v61 = vadd.f32 %v6137_v29, %v3307_v27 }
 0x28a   : > { %v6325_v8 = vpop.f32.mrb[24].mxu0 }
 0x28b   : > { %v6326_v16 = vpop.f32.mrb[25].mxu0 }
 0x28c   : > { %v6327_v25 = vadd.f32 %v6326_v16, %v6325_v8  ;;  %v5328_v16 = vstv %s276_s25 }
 0x2a0   : > { %v6170_v0 = vpop.f32.mrb[48].mxu1 }
 0x2a1   : > { %v6171_v7 = vpop.f32.mrb[49].mxu1 }
 0x2a2   : > { %v6172_v63 = vadd.f32 %v6171_v7, %v6170_v0 }
 0x2a3   : > { %v6398_v28 = vpop.f32.mrb[26].mxu0 }
 0x2a4   : > { %v3594_v40 = vadd.f32 %v6172_v63, %v3415_v19  ;;  %v6173_v51 = vpop.f32.mrb[50].mxu1  ;;  %v6399_v41 = vpop.f32.mrb[27].mxu0 }
 0x2a5   : > { %v6174_v32 = vpop.f32.mrb[51].mxu1  ;;  %v6400_v31 = vadd.f32 %v6399_v41, %v6398_v28 }
 0x2a6   : > { %v6175_v42 = vadd.f32 %v6174_v32, %v6173_v51 }
 0x2a8   : > { %v3601_v58 = vadd.f32 %v6175_v42, %v3426_v61 }
 0x2aa   : > { %v6401_v5 = vpop.f32.mrb[28].mxu0 }
 0x2ab   : > { %v6402_v62 = vpop.f32.mrb[29].mxu0 }
 0x2ac   : > { %v6403_v14 = vadd.f32 %v6402_v62, %v6401_v5 }
 0x2c0   : > { %v6208_v12 = vpop.f32.mrb[52].mxu1 }
 0x2c1   : > { %v6209_v44 = vpop.f32.mrb[53].mxu1 }
 0x2c2   : > { %v6210_v37 = vadd.f32 %v6209_v44, %v6208_v12 }
 0x2c4   : > { %v3705_v60 = vadd.f32 %v6210_v37, %v3594_v40  ;;  %v6211_v10 = vpop.f32.mrb[54].mxu1 }
 0x2c5   : > { %v6212_v6 = vpop.f32.mrb[55].mxu1 }
 0x2c6   : > { %v6213_v21 = vadd.f32 %v6212_v6, %v6211_v10  ;;  %v3824_v30 = vadd.f32 %v6248_v18, %v3705_v60 }
 0x2c8   : > { %v3712_v3 = vadd.f32 %v6213_v21, %v3601_v58 }
 0x2ca   : > { %v3839_v17 = vadd.f32 %v6251_v48, %v3712_v3 }
 0x2e0   : > { %v6284_v2 = vpop.f32.mrb[56].mxu1 }
 0x2e1   : > { %v6285_v55 = vpop.f32.mrb[57].mxu1 }
 0x2e2   : > { %v6286_v52 = vadd.f32 %v6285_v55, %v6284_v2 }
 0x2e4   : > { %v4071_v22 = vadd.f32 %v6286_v52, %v3824_v30  ;;  %v6287_v20 = vpop.f32.mrb[58].mxu1 }
 0x2e5   : > { %v6288_v36 = vpop.f32.mrb[59].mxu1 }
 0x2e6   : > { %v6289_v15 = vadd.f32 %v6288_v36, %v6287_v20  ;;  %v4216_v56 = vadd.f32 %v6324_v47, %v4071_v22 }
 0x2e8   : > { %v4078_v39 = vadd.f32 %v6289_v15, %v3839_v17 }
 0x2ea   : > { %v4225_v50 = vadd.f32 %v6327_v25, %v4078_v39 }
 0x300   : > { %v6360_v9 = vpop.f32.mrb[60].mxu1 }
 0x301   : > { %v6361_v46 = vpop.f32.mrb[61].mxu1 }
 0x302   : > { %v6362_v24 = vadd.f32 %v6361_v46, %v6360_v9 }
 0x304   : > { %v4333_v13 = vadd.f32 %v6362_v24, %v4216_v56  ;;  %v6363_v57 = vpop.f32.mrb[62].mxu1 }
 0x305   : > { %v6364_v1 = vpop.f32.mrb[63].mxu1 }
 0x306   : > { %v6365_v26 = vadd.f32 %v6364_v1, %v6363_v57  ;;  %v4512_v18 = vadd.f32 %v6400_v31, %v4333_v13 }
 0x308   : > { %v4344_v45 = vadd.f32 %v6365_v26, %v4225_v50 }
 0x30a   : > { %v4519_v27 = vadd.f32 %v6403_v14, %v4344_v45 }
 0x320   : > { %v6436_v34 = vpop.f32.mrb[64].mxu1 }
 0x321   : > { %v6437_v59 = vpop.f32.mrb[65].mxu1 }
 0x322   : > { %v6438_v38 = vadd.f32 %v6437_v59, %v6436_v34 }
 0x324   : > { %v6439_v48 = vpop.f32.mrb[66].mxu1  ;;  %v4623_v23 = vadd.f32 %v6438_v38, %v4512_v18 }
 0x325   : > { %v6440_v11 = vpop.f32.mrb[67].mxu1 }
 0x326   : > { %v6441_v33 = vadd.f32 %v6440_v11, %v6439_v48 }
 0x328   : > { %v4630_v54 = vadd.f32 %v6441_v33, %v4519_v27 }
 0x340   : > { %v6794_v19 = vpop.f32.mrb[68].mxu1 }
 0x341   : > { %v4731_v49 = vadd.f32 %v6794_v19, %v4630_v54  ;;  %v4720_v53 = vpop.f32.mrb[69].mxu1 }
 0x342   : > { %v4721_v35 = vadd.f32 %v4720_v53, %v4623_v23 }
 0x343   : > { %v6969_v47 = vpop.f32.mrb[30].mxu0 }
 0x344   : > { %v8125_v29 = vadd.f32 %v6969_v47, %v4731_v49  ;;  %v5307_v61 = vpop.f32.mrb[31].mxu0 }
 0x345   : > { %v8127_v8 = vadd.f32 %v5307_v61, %v4721_v35 }
 0x347   : > { %5319 = vrot.lane.b32.xlu0 %v8127_v8, %s8253_s10 }
 0x34b   : > { %5321 = vrot.lane.b32.xlu0 %v8125_v29, %s8253_s10 }
 0x3b9   : > { %v5320_v25 = vpop.permute.xlu0 %5319 }
 0x3ba   : > { %v5326_v0 = vsel %vm5325_vm0, %v10650_v43, %v5320_v25 }
 0x3bb   : > { %v5329_v7 = vadd.f32 %v5328_v16, %v5326_v0 }
 0x3bd   : > { %5331 = vst [vmem:[%s167_s28] sm:$0xff] %v5329_v7  ;;  %v5322_v63 = vpop.permute.xlu0 %5321 }
 0x3be   : > { %v5327_v28 = vsel %vm5325_vm0, %v10647_v4, %v5322_v63 }
 0x3bf   : > { %v5330_v40 = vadd.f32 %v5328_v16, %v5327_v28 }
 0x3c1   : > { %5332 = vst [vmem:[%s167_s28 + $0x8] sm:$0xff] %v5330_v40 }
 0x3c2   : > { %8202 = shalt.err (!%p8199_p3)
}
 0x3c3   : > { %s8203_s12 = scalar_lea.hbm %s10713_s6, 256  ;;  %s8207_s20 = scalar_lea.hbm %s10759_s3, 1024 }
 0x3c4   : > { %p8204_p4 = scmp.ne.s32.totalorder %s10713_s6, %s8203_s12  ;;  %p8208_p9 = scmp.lt.u32.totalorder %s10713_s6, %s10759_s3 }
 0x3c5   : > { %p8209_p10 = scmp.lt.u32.totalorder %s8207_s20, %s8203_s12  ;;  %p8211_p12 = scmp.lt.u32.totalorder %s8203_s12, %s10713_s6 }
 0x3c6   : > { %p8205_p7 = pnand %p8204_p4, %p8318_p5 }
 0x3c7   : > { %p8210_p11 = por %p8209_p10, %p8208_p9 }
 0x3c8   : > { %p8206_p8 = pneg %p8205_p7 }
 0x3c9   : > { %p8212_p13 = por %p8211_p12, %p8210_p11 }
 0x3cb   : > { %p8213_p0 = pnand %p8212_p13, %p8206_p8 }
 0x3cd   : > { %8216 = shalt.err (!%p8213_p0)
}
 0x3ce   : > { %s8255_s25 = smov 128   ;;  %s8256_s26 = smov 8  }
 0x3cf   : > { %8147 = dma.vmem_to_hbm [thread:$0]  (%p8318_p5), %s10707_s29, 256, %s10713_s6, %s10715_s7, %s8255_s25, %s8255_s25, %s8256_s26  }
 0x3d0 PF: > { %p8153_p1 = scmp.ge.s32.totalorder %s8251_s17, 2  ;;  %s5362_s27 = sand.u32 1, %s8239_s14  }
 0x3d1   : > { %s5363_s28 = scalar_lea.sflag [#allocation4], %s5362_s27 }
 0x3d2   : > { %p8150_p2 = pnand %p8153_p1, %p8322_p6 }
 0x3d4   : > { %8234 = dma.done.wait (!%p8150_p2), %s5363_s28, 256  }
 0x3d5   : > { %8236 = vsyncadd (!%p8150_p2), %s5363_s28, 4294967040  ;;  %p14_p3 = scmp.ge.s32.totalorder %s8305_s19, 6   ;;  %s11631_s14 = smov %s8243_s15 }
 0x3d6   : > { %s11632_s15 = smov %s8247_s16  ;;  %s11633_s16 = smov %s8316_s22 }
 0x3d7   : > { %s11634_s17 = smov %s8305_s19  ;;  %16 = sbr.rel (!%p14_p3) target bundleno = 5 (0x5), region = 67 }
 0x3de   :  { %5368 = vsyncpa [#allocation4], 1 }
 0x3df   :  { %5370 = vsyncpa [#allocation4 + $0x1], 1 }

</bundles_post_ra>
